<compile_context>
chip_gen: v7x
topology: tpu7x:2x2x1
jax: 0.10.0
libtpu: 0.0.40
codegen_flags: <defaults>
</compile_context>

<pallas_src>
import functools

import jax
import jax.numpy as jnp
import numpy as np
from jax.experimental import pallas as pl
from jax.experimental.pallas import tpu as pltpu

LANE = 128
SUBLANE = 8
BIG_CHUNK = 256              # streamed column-chunk width for the big layers
BIG_MIN_ELEMS = 128 * 1024   # layers at least this big (elements) get streamed


def _leaky(y, slope):
    return jnp.where(y >= 0.0, y, slope * y)


# ---------------------------------------------------------------------------
# Fused kernel
# ---------------------------------------------------------------------------
def _fused_encoder_kernel(x_ref, bigw_ref, tailw_ref, bias_ref, out_ref,
                          wbuf, twbuf, dma_sem, *, plan, slope):
    """Whole layer chain in one kernel invocation (grid-less).

    x_ref    : (Bp, K0) bf16, VMEM (auto-staged)
    bigw_ref : (total_chunks, K0, BIG_CHUNK) bf16, HBM (streamed manually)
    tailw_ref: (Rt, Ct) bf16, HBM (one manual DMA, overlapped with big layers)
    bias_ref : (1, Bt) f32, VMEM (all biases, 128-aligned segments)
    out_ref  : (Bp, out_pad) f32, VMEM
    wbuf     : (2, K0, BIG_CHUNK) bf16 VMEM scratch  (chunk double-buffer)
    twbuf    : (Rt, Ct) bf16 VMEM scratch            (packed tail weights)
    dma_sem  : DMA semaphores (3,): [0]/[1] chunk slots, [2] tail copy
    """
    big = plan["big"]              # ((n_out, n_chunks, bias_off), ...)
    tail = plan["tail"]            # ((row_off, k, n, bias_off, act), ...)
    total_chunks = plan["total_chunks"]

    def big_copy(c):
        return pltpu.make_async_copy(bigw_ref.at[c], wbuf.at[c % 2],
                                     dma_sem.at[c % 2])

    tail_copy = pltpu.make_async_copy(tailw_ref, twbuf, dma_sem.at[2])

    # Kick off the streaming pipeline: first big chunk, then the packed tail
    # weights (their DMA overlaps with all of the big-layer compute/DMA).
    if total_chunks > 0:
        big_copy(0).start()
    tail_copy.start()

    h = x_ref[...]                 # bf16 activations, resident in vregs/VMEM

    # --- big layers: stream 256-column weight chunks, double-buffered -------
    c = 0
    for (n_out, n_chunks, b_off) in big:
        parts = []
        for _ in range(n_chunks):
            if c + 1 < total_chunks:
                big_copy(c + 1).start()          # prefetch next chunk
            big_copy(c).wait()
            parts.append(jnp.dot(h, wbuf[c % 2],
                                 preferred_element_type=jnp.float32))
            c += 1
        y = parts[0] if len(parts) == 1 else jnp.concatenate(parts, axis=1)
        y = y + bias_ref[:, b_off:b_off + n_out]     # f32 epilogue
        y = _leaky(y, slope)                         # big layers are hidden
        h = y.astype(jnp.bfloat16)

    # --- tail layers: packed weights arrived while the big layers ran -------
    tail_copy.wait()
    n_tail = len(tail)
    for i, (r_off, k, n, b_off, act) in enumerate(tail):
        w = twbuf[r_off:r_off + k, 0:n]              # static slice of the pack
        y = jnp.dot(h, w, preferred_element_type=jnp.float32)
        y = y + bias_ref[:, b_off:b_off + n]
        if act:
            y = _leaky(y, slope)
        if i + 1 < n_tail:
            h = y.astype(jnp.bfloat16)
        else:
            out_ref[...] = y.astype(out_ref.dtype)   # lane-dense (Bp, out_pad)


# ---------------------------------------------------------------------------
# Parameter construction / preparation
# ---------------------------------------------------------------------------
def make_encoder_params(key, input_shape, latent_shape, node_count=1024):
    """Deterministic f32 params mirroring DenseEncoder's layer-shape logic.

    Returns a list of (W, b) with W stored as (in_features, out_features).
    """
    flattened = int(np.prod(input_shape))
    dims = []
    in_c = flattened
    nc = node_count
    while nc > latent_shape:
        dims.append((in_c, nc))
        in_c = nc
        nc = nc // 2
    dims.append((in_c, latent_shape))     # final fc layer (no activation)

    params = []
    for fan_in, fan_out in dims:
        key, k_w, k_b = jax.random.split(key, 3)
        bound = 1.0 / np.sqrt(fan_in)     # matches nn.Linear default init bound
        w = jax.random.uniform(k_w, (fan_in, fan_out), jnp.float32, -bound, bound)
        b = jax.random.uniform(k_b, (fan_out,), jnp.float32, -bound, bound)
        params.append((w, b))
    return params


def prepare_kernel_params(params, latent_shape):
    """Pack f32 (W, b) params into the kernel's streaming-friendly layout.

    Returns ((big_w, tail_w, bias), plan):
      big_w : (total_chunks, K0, BIG_CHUNK) bf16 — contiguous column chunks of
              the leading large layers (streamed from HBM inside the kernel).
      tail_w: (sum_k, max_n) bf16 — remaining layers row-stacked into one block.
      bias  : (1, total) f32 — all biases, 128-aligned segments.
      plan  : static Python metadata (offsets, chunk counts, activation flags).
    """
    n_layers = len(params)
    K0 = params[0][0].shape[0]

    # Pad the final layer's output dim to a lane multiple (unmasked HBM store).
    dims = []
    for i, (w, _) in enumerate(params):
        k, n = w.shape
        n_pad = n
        if i == n_layers - 1:
            n_pad = max(LANE, ((n + LANE - 1) // LANE) * LANE)
        dims.append((k, n, n_pad))

    # Classify: leading large layers with K == K0 get streamed ("big"); the
    # rest (incl. the final fc) are packed into a single VMEM-resident block.
    big_ids = []
    for i, (k, n, n_pad) in enumerate(dims):
        if (i == len(big_ids) and i < n_layers - 1 and k == K0
                and n_pad % BIG_CHUNK == 0 and k * n_pad >= BIG_MIN_ELEMS):
            big_ids.append(i)
        else:
            break
    tail_ids = [i for i in range(n_layers) if i not in big_ids]

    # --- coalesced biases: one (1, total) f32 buffer, 128-aligned segments ---
    bias_offs, bias_parts, off = [], [], 0
    for i, (_, b) in enumerate(params):
        n_pad = dims[i][2]
        seg = ((max(n_pad, b.shape[0]) + LANE - 1) // LANE) * LANE
        bseg = np.zeros((seg,), np.float32)
        bseg[: b.shape[0]] = np.asarray(b, np.float32)
        bias_parts.append(bseg)
        bias_offs.append(off)
        off += seg
    bias = jnp.asarray(np.concatenate(bias_parts)[None, :], jnp.float32)

    # --- big weights: (total_chunks, K0, BIG_CHUNK) bf16, contiguous chunks ---
    big_meta, big_chunks = [], []
    for i in big_ids:
        w = np.asarray(params[i][0], np.float32)
        k, n, n_pad = dims[i]
        nc = n_pad // BIG_CHUNK
        wc = w.reshape(k, nc, BIG_CHUNK).transpose(1, 0, 2)   # (nc, K0, CHUNK)
        big_chunks.append(wc)
        big_meta.append((n_pad, nc, bias_offs[i]))
    if big_chunks:
        big_w = jnp.asarray(np.concatenate(big_chunks, axis=0), jnp.bfloat16)
    else:                                       # dummy, never read
        big_w = jnp.zeros((1, K0, BIG_CHUNK), jnp.bfloat16)
    total_chunks = sum(m[1] for m in big_meta)

    # --- tail weights: one row-stacked (sum_k, max_n) bf16 buffer -------------
    max_n = max(dims[i][2] for i in tail_ids)
    max_n = ((max_n + LANE - 1) // LANE) * LANE
    tail_meta, tail_rows, r_off = [], [], 0
    for i in tail_ids:
        w = np.asarray(params[i][0], np.float32)
        k, n, n_pad = dims[i]
        blk = np.zeros((k, max_n), np.float32)
        blk[:, :n] = w                          # padded cols stay zero
        tail_rows.append(blk)
        tail_meta.append((r_off, k, n_pad, bias_offs[i], i < n_layers - 1))
        r_off += k
    tail_w = jnp.asarray(np.concatenate(tail_rows, axis=0), jnp.bfloat16)

    plan = {
        "k0": K0,
        "chunk": BIG_CHUNK,
        "big": tuple(big_meta),
        "tail": tuple(tail_meta),
        "total_chunks": total_chunks,
        "out_pad": dims[-1][2],
        "latent": latent_shape,
    }
    return (big_w, tail_w, bias), plan


# ---------------------------------------------------------------------------
# Forward pass wrapper
# ---------------------------------------------------------------------------
def dense_encoder_forward(x, big_w, tail_w, bias, *, plan, slope=0.01):
    """x: (B, C, H, W) NCHW -> (B, latent). Arrays from prepare_kernel_params."""
    B = x.shape[0]
    K0 = plan["k0"]
    chunk = plan["chunk"]
    out_pad = plan["out_pad"]

    h = x.reshape(B, -1).astype(jnp.bfloat16)          # nn.Flatten(), bf16 feed
    assert h.shape[1] == K0
    Bp = max(SUBLANE, ((B + SUBLANE - 1) // SUBLANE) * SUBLANE)
    if Bp != B:
        h = jnp.pad(h, ((0, Bp - B), (0, 0)))

    # Cost estimate (kernel is weight-DMA / latency bound at small B).
    layer_dims = ([(K0, m[0]) for m in plan["big"]]
                  + [(t[1], t[2]) for t in plan["tail"]])
    flops = 2 * Bp * sum(k * n for k, n in layer_dims)
    bytes_accessed = (h.size * 2
                      + big_w.size * big_w.dtype.itemsize
                      + tail_w.size * tail_w.dtype.itemsize
                      + bias.size * bias.dtype.itemsize
                      + Bp * out_pad * 4)

    # VMEM budget from actual buffers (+ headroom); well under v7x's 64 MiB.
    scratch_bytes = 2 * K0 * chunk * 2 + tail_w.size * 2
    staged_bytes = 2 * (h.size * 2 + bias.size * 4 + Bp * out_pad * 4)
    vmem_limit = int(scratch_bytes + staged_bytes + (8 << 20))

    kernel = functools.partial(_fused_encoder_kernel, plan=plan, slope=slope)
    out = pl.pallas_call(
        kernel,
        out_shape=jax.ShapeDtypeStruct((Bp, out_pad), jnp.float32),
        in_specs=[
            pl.BlockSpec(memory_space=pltpu.MemorySpace.VMEM),   # x (auto-staged)
            pl.BlockSpec(memory_space=pl.ANY),                   # big weights (HBM)
            pl.BlockSpec(memory_space=pl.ANY),                   # tail weights (HBM)
            pl.BlockSpec(memory_space=pltpu.MemorySpace.VMEM),   # packed biases
        ],
        out_specs=pl.BlockSpec(memory_space=pltpu.MemorySpace.VMEM),
        scratch_shapes=[
            pltpu.VMEM((2, K0, chunk), jnp.bfloat16),            # chunk double-buffer
            pltpu.VMEM(tail_w.shape, jnp.bfloat16),              # packed tail weights
            pltpu.SemaphoreType.DMA((3,)),
        ],
        cost_estimate=pl.CostEstimate(flops=flops, transcendentals=0,
                                      bytes_accessed=bytes_accessed),
        compiler_params=pltpu.CompilerParams(vmem_limit_bytes=vmem_limit),
    )(h, big_w, tail_w, bias)

    return out[:B, :plan["latent"]]


# ---------------------------------------------------------------------------
# References for correctness checking
# ---------------------------------------------------------------------------
def _reference_forward_f32(x, params, slope=0.01):
    """Pure-f32 jnp reference (original module semantics)."""
    h = x.reshape(x.shape[0], -1)
    for w, b in params[:-1]:
        h = h @ w + b
        h = jnp.where(h >= 0.0, h, slope * h)
    w, b = params[-1]
    return h @ w + b


def _reference_forward_matched(x, params, slope=0.01):
    """jnp reference mirroring the kernel numerics (bf16 MXU inputs, f32 acc)."""
    h = x.reshape(x.shape[0], -1).astype(jnp.float32)
    n_layers = len(params)
    for i, (w, b) in enumerate(params):
        y = jnp.dot(h.astype(jnp.bfloat16), w.astype(jnp.bfloat16),
                    preferred_element_type=jnp.float32) + b
        if i < n_layers - 1:
            y = jnp.where(y >= 0.0, y, slope * y)
        h = y
    return h


# ---------------------------------------------------------------------------
# Self-test
# ---------------------------------------------------------------------------
if __name__ == "__main__":
    key = jax.random.PRNGKey(0)
    k_x, k_p = jax.random.split(key)

    input_shape = (4, 16, 16)   # C, H, W -> flattened 1024
    latent_shape = 32
    batch = 2

    x = jax.random.normal(k_x, (batch,) + input_shape, dtype=jnp.float32)
    params = make_encoder_params(k_p, input_shape, latent_shape, node_count=1024)
    (big_w, tail_w, bias), plan = prepare_kernel_params(params, latent_shape)

    fwd = jax.jit(functools.partial(dense_encoder_forward, plan=plan))
    out = jax.block_until_ready(fwd(x, big_w, tail_w, bias))
    assert out.shape == (batch, latent_shape), out.shape

    # Tight check against a reference using the same bf16 numerics as the kernel.
    ref_matched = _reference_forward_matched(x, params)
    np.testing.assert_allclose(np.asarray(out), np.asarray(ref_matched),
                               rtol=1e-2, atol=1e-4)

    # Loose semantic check against the pure-f32 module reference (bf16 noise).
    ref_f32 = _reference_forward_f32(x, params)
    np.testing.assert_allclose(np.asarray(out), np.asarray(ref_f32),
                               rtol=5e-2, atol=2e-3)

    print("KERNEL_OK")
</pallas_src>

<mosaic_0001>
module attributes {stable_mosaic.version = 11 : i64} {
  func.func @_fused_encoder_kernel(%arg0: memref<8x1024xbf16, #tpu.memory_space<vmem>>, %arg1: memref<6x1024x256xbf16, #tpu.memory_space<any>>, %arg2: memref<960x256xbf16, #tpu.memory_space<any>>, %arg3: memref<1x2176xf32, #tpu.memory_space<vmem>>, %arg4: memref<8x128xf32, #tpu.memory_space<vmem>>, %arg5: memref<2x1024x256xbf16, #tpu.memory_space<vmem>>, %arg6: memref<960x256xbf16, #tpu.memory_space<vmem>>, %arg7: memref<3x!tpu.dma_semaphore, #tpu.memory_space<semaphore_mem>>) attributes {dimension_semantics = [], scalar_prefetch = 0 : i64, scratch_operands = 3 : i64, tpu.core_type = #tpu.core_type<tc>} {
    %c0_i32 = arith.constant 0 : i32
    %c0_i32_0 = arith.constant 0 : i32
    %c0_i32_1 = arith.constant 0 : i32
    %c0_i32_2 = arith.constant 0 : i32
    %c0_i32_3 = arith.constant 0 : i32
    %0 = tpu.memref_slice %arg1[%c0_i32, %c0_i32_2, %c0_i32_3] : memref<6x1024x256xbf16, #tpu.memory_space<any>> -> memref<1x1024x256xbf16, #tpu.memory_space<any>>
    %1 = tpu.memref_squeeze %0 : memref<1x1024x256xbf16, #tpu.memory_space<any>> -> memref<1024x256xbf16, #tpu.memory_space<any>>
    %c0_i32_4 = arith.constant 0 : i32
    %c0_i32_5 = arith.constant 0 : i32
    %2 = tpu.memref_slice %arg5[%c0_i32_0, %c0_i32_4, %c0_i32_5] : memref<2x1024x256xbf16, #tpu.memory_space<vmem>> -> memref<1x1024x256xbf16, #tpu.memory_space<vmem>>
    %3 = tpu.memref_squeeze %2 : memref<1x1024x256xbf16, #tpu.memory_space<vmem>> -> memref<1024x256xbf16, #tpu.memory_space<vmem>>
    %4 = tpu.memref_slice %arg7[%c0_i32_1] : memref<3x!tpu.dma_semaphore, #tpu.memory_space<semaphore_mem>> -> memref<1x!tpu.dma_semaphore, #tpu.memory_space<semaphore_mem>>
    %5 = tpu.memref_squeeze %4 : memref<1x!tpu.dma_semaphore, #tpu.memory_space<semaphore_mem>> -> memref<!tpu.dma_semaphore, #tpu.memory_space<semaphore_mem>>
    tpu.enqueue_dma source(%1 : memref<1024x256xbf16, #tpu.memory_space<any>>) target(%3 : memref<1024x256xbf16, #tpu.memory_space<vmem>>) target_semaphore(%5 : memref<!tpu.dma_semaphore, #tpu.memory_space<semaphore_mem>>)
    %c2_i32 = arith.constant 2 : i32
    %6 = tpu.memref_slice %arg7[%c2_i32] : memref<3x!tpu.dma_semaphore, #tpu.memory_space<semaphore_mem>> -> memref<1x!tpu.dma_semaphore, #tpu.memory_space<semaphore_mem>>
    %7 = tpu.memref_squeeze %6 : memref<1x!tpu.dma_semaphore, #tpu.memory_space<semaphore_mem>> -> memref<!tpu.dma_semaphore, #tpu.memory_space<semaphore_mem>>
    tpu.enqueue_dma source(%arg2 : memref<960x256xbf16, #tpu.memory_space<any>>) target(%arg6 : memref<960x256xbf16, #tpu.memory_space<vmem>>) target_semaphore(%7 : memref<!tpu.dma_semaphore, #tpu.memory_space<semaphore_mem>>)
    %c0 = arith.constant 0 : index
    %c0_6 = arith.constant 0 : index
    %8 = vector.load %arg0[%c0, %c0_6] : memref<8x1024xbf16, #tpu.memory_space<vmem>>, vector<8x1024xbf16>
    %c1_i32 = arith.constant 1 : i32
    %c1_i32_7 = arith.constant 1 : i32
    %c1_i32_8 = arith.constant 1 : i32
    %c0_i32_9 = arith.constant 0 : i32
    %c0_i32_10 = arith.constant 0 : i32
    %9 = tpu.memref_slice %arg1[%c1_i32, %c0_i32_9, %c0_i32_10] : memref<6x1024x256xbf16, #tpu.memory_space<any>> -> memref<1x1024x256xbf16, #tpu.memory_space<any>>
    %10 = tpu.memref_squeeze %9 : memref<1x1024x256xbf16, #tpu.memory_space<any>> -> memref<1024x256xbf16, #tpu.memory_space<any>>
    %c0_i32_11 = arith.constant 0 : i32
    %c0_i32_12 = arith.constant 0 : i32
    %11 = tpu.memref_slice %arg5[%c1_i32_7, %c0_i32_11, %c0_i32_12] : memref<2x1024x256xbf16, #tpu.memory_space<vmem>> -> memref<1x1024x256xbf16, #tpu.memory_space<vmem>>
    %12 = tpu.memref_squeeze %11 : memref<1x1024x256xbf16, #tpu.memory_space<vmem>> -> memref<1024x256xbf16, #tpu.memory_space<vmem>>
    %13 = tpu.memref_slice %arg7[%c1_i32_8] : memref<3x!tpu.dma_semaphore, #tpu.memory_space<semaphore_mem>> -> memref<1x!tpu.dma_semaphore, #tpu.memory_space<semaphore_mem>>
    %14 = tpu.memref_squeeze %13 : memref<1x!tpu.dma_semaphore, #tpu.memory_space<semaphore_mem>> -> memref<!tpu.dma_semaphore, #tpu.memory_space<semaphore_mem>>
    tpu.enqueue_dma source(%10 : memref<1024x256xbf16, #tpu.memory_space<any>>) target(%12 : memref<1024x256xbf16, #tpu.memory_space<vmem>>) target_semaphore(%14 : memref<!tpu.dma_semaphore, #tpu.memory_space<semaphore_mem>>)
    %c0_i32_13 = arith.constant 0 : i32
    %c0_i32_14 = arith.constant 0 : i32
    %c0_i32_15 = arith.constant 0 : i32
    %c0_i32_16 = arith.constant 0 : i32
    %c0_i32_17 = arith.constant 0 : i32
    %15 = tpu.memref_slice %arg1[%c0_i32_13, %c0_i32_16, %c0_i32_17] : memref<6x1024x256xbf16, #tpu.memory_space<any>> -> memref<1x1024x256xbf16, #tpu.memory_space<any>>
    %16 = tpu.memref_squeeze %15 : memref<1x1024x256xbf16, #tpu.memory_space<any>> -> memref<1024x256xbf16, #tpu.memory_space<any>>
    %c0_i32_18 = arith.constant 0 : i32
    %c0_i32_19 = arith.constant 0 : i32
    %17 = tpu.memref_slice %arg5[%c0_i32_14, %c0_i32_18, %c0_i32_19] : memref<2x1024x256xbf16, #tpu.memory_space<vmem>> -> memref<1x1024x256xbf16, #tpu.memory_space<vmem>>
    %18 = tpu.memref_squeeze %17 : memref<1x1024x256xbf16, #tpu.memory_space<vmem>> -> memref<1024x256xbf16, #tpu.memory_space<vmem>>
    %19 = tpu.memref_slice %arg7[%c0_i32_15] : memref<3x!tpu.dma_semaphore, #tpu.memory_space<semaphore_mem>> -> memref<1x!tpu.dma_semaphore, #tpu.memory_space<semaphore_mem>>
    %20 = tpu.memref_squeeze %19 : memref<1x!tpu.dma_semaphore, #tpu.memory_space<semaphore_mem>> -> memref<!tpu.dma_semaphore, #tpu.memory_space<semaphore_mem>>
    tpu.wait_dma2 semaphore(%20 : memref<!tpu.dma_semaphore, #tpu.memory_space<semaphore_mem>>) src(%16 : memref<1024x256xbf16, #tpu.memory_space<any>>) dst(%18 : memref<1024x256xbf16, #tpu.memory_space<vmem>>)
    %c0_20 = arith.constant 0 : index
    %c0_21 = arith.constant 0 : index
    %c0_22 = arith.constant 0 : index
    %21 = vector.load %arg5[%c0_20, %c0_21, %c0_22] : memref<2x1024x256xbf16, #tpu.memory_space<vmem>>, vector<1x1024x256xbf16>
    %22 = vector.shape_cast %21 : vector<1x1024x256xbf16> to vector<1024x256xbf16>
    %cst = arith.constant dense<0.000000e+00> : vector<8x256xf32>
    %23 = tpu.matmul %8, %22, %cst {dimension_numbers = #tpu.dot_dimension_numbers<[1], [0], [0], [1], [0, 0, 1, 1], [], []>} : vector<8x1024xbf16>, vector<1024x256xbf16>, vector<8x256xf32> -> vector<8x256xf32>
    %c2_i32_23 = arith.constant 2 : i32
    %c0_i32_24 = arith.constant 0 : i32
    %c0_i32_25 = arith.constant 0 : i32
    %c0_i32_26 = arith.constant 0 : i32
    %c0_i32_27 = arith.constant 0 : i32
    %24 = tpu.memref_slice %arg1[%c2_i32_23, %c0_i32_26, %c0_i32_27] : memref<6x1024x256xbf16, #tpu.memory_space<any>> -> memref<1x1024x256xbf16, #tpu.memory_space<any>>
    %25 = tpu.memref_squeeze %24 : memref<1x1024x256xbf16, #tpu.memory_space<any>> -> memref<1024x256xbf16, #tpu.memory_space<any>>
    %c0_i32_28 = arith.constant 0 : i32
    %c0_i32_29 = arith.constant 0 : i32
    %26 = tpu.memref_slice %arg5[%c0_i32_24, %c0_i32_28, %c0_i32_29] : memref<2x1024x256xbf16, #tpu.memory_space<vmem>> -> memref<1x1024x256xbf16, #tpu.memory_space<vmem>>
    %27 = tpu.memref_squeeze %26 : memref<1x1024x256xbf16, #tpu.memory_space<vmem>> -> memref<1024x256xbf16, #tpu.memory_space<vmem>>
    %28 = tpu.memref_slice %arg7[%c0_i32_25] : memref<3x!tpu.dma_semaphore, #tpu.memory_space<semaphore_mem>> -> memref<1x!tpu.dma_semaphore, #tpu.memory_space<semaphore_mem>>
    %29 = tpu.memref_squeeze %28 : memref<1x!tpu.dma_semaphore, #tpu.memory_space<semaphore_mem>> -> memref<!tpu.dma_semaphore, #tpu.memory_space<semaphore_mem>>
    tpu.enqueue_dma source(%25 : memref<1024x256xbf16, #tpu.memory_space<any>>) target(%27 : memref<1024x256xbf16, #tpu.memory_space<vmem>>) target_semaphore(%29 : memref<!tpu.dma_semaphore, #tpu.memory_space<semaphore_mem>>)
    %c1_i32_30 = arith.constant 1 : i32
    %c1_i32_31 = arith.constant 1 : i32
    %c1_i32_32 = arith.constant 1 : i32
    %c0_i32_33 = arith.constant 0 : i32
    %c0_i32_34 = arith.constant 0 : i32
    %30 = tpu.memref_slice %arg1[%c1_i32_30, %c0_i32_33, %c0_i32_34] : memref<6x1024x256xbf16, #tpu.memory_space<any>> -> memref<1x1024x256xbf16, #tpu.memory_space<any>>
    %31 = tpu.memref_squeeze %30 : memref<1x1024x256xbf16, #tpu.memory_space<any>> -> memref<1024x256xbf16, #tpu.memory_space<any>>
    %c0_i32_35 = arith.constant 0 : i32
    %c0_i32_36 = arith.constant 0 : i32
    %32 = tpu.memref_slice %arg5[%c1_i32_31, %c0_i32_35, %c0_i32_36] : memref<2x1024x256xbf16, #tpu.memory_space<vmem>> -> memref<1x1024x256xbf16, #tpu.memory_space<vmem>>
    %33 = tpu.memref_squeeze %32 : memref<1x1024x256xbf16, #tpu.memory_space<vmem>> -> memref<1024x256xbf16, #tpu.memory_space<vmem>>
    %34 = tpu.memref_slice %arg7[%c1_i32_32] : memref<3x!tpu.dma_semaphore, #tpu.memory_space<semaphore_mem>> -> memref<1x!tpu.dma_semaphore, #tpu.memory_space<semaphore_mem>>
    %35 = tpu.memref_squeeze %34 : memref<1x!tpu.dma_semaphore, #tpu.memory_space<semaphore_mem>> -> memref<!tpu.dma_semaphore, #tpu.memory_space<semaphore_mem>>
    tpu.wait_dma2 semaphore(%35 : memref<!tpu.dma_semaphore, #tpu.memory_space<semaphore_mem>>) src(%31 : memref<1024x256xbf16, #tpu.memory_space<any>>) dst(%33 : memref<1024x256xbf16, #tpu.memory_space<vmem>>)
    %c1 = arith.constant 1 : index
    %c0_37 = arith.constant 0 : index
    %c0_38 = arith.constant 0 : index
    %36 = vector.load %arg5[%c1, %c0_37, %c0_38] : memref<2x1024x256xbf16, #tpu.memory_space<vmem>>, vector<1x1024x256xbf16>
    %37 = vector.shape_cast %36 : vector<1x1024x256xbf16> to vector<1024x256xbf16>
    %cst_39 = arith.constant dense<0.000000e+00> : vector<8x256xf32>
    %38 = tpu.matmul %8, %37, %cst_39 {dimension_numbers = #tpu.dot_dimension_numbers<[1], [0], [0], [1], [0, 0, 1, 1], [], []>} : vector<8x1024xbf16>, vector<1024x256xbf16>, vector<8x256xf32> -> vector<8x256xf32>
    %c3_i32 = arith.constant 3 : i32
    %c1_i32_40 = arith.constant 1 : i32
    %c1_i32_41 = arith.constant 1 : i32
    %c0_i32_42 = arith.constant 0 : i32
    %c0_i32_43 = arith.constant 0 : i32
    %39 = tpu.memref_slice %arg1[%c3_i32, %c0_i32_42, %c0_i32_43] : memref<6x1024x256xbf16, #tpu.memory_space<any>> -> memref<1x1024x256xbf16, #tpu.memory_space<any>>
    %40 = tpu.memref_squeeze %39 : memref<1x1024x256xbf16, #tpu.memory_space<any>> -> memref<1024x256xbf16, #tpu.memory_space<any>>
    %c0_i32_44 = arith.constant 0 : i32
    %c0_i32_45 = arith.constant 0 : i32
    %41 = tpu.memref_slice %arg5[%c1_i32_40, %c0_i32_44, %c0_i32_45] : memref<2x1024x256xbf16, #tpu.memory_space<vmem>> -> memref<1x1024x256xbf16, #tpu.memory_space<vmem>>
    %42 = tpu.memref_squeeze %41 : memref<1x1024x256xbf16, #tpu.memory_space<vmem>> -> memref<1024x256xbf16, #tpu.memory_space<vmem>>
    %43 = tpu.memref_slice %arg7[%c1_i32_41] : memref<3x!tpu.dma_semaphore, #tpu.memory_space<semaphore_mem>> -> memref<1x!tpu.dma_semaphore, #tpu.memory_space<semaphore_mem>>
    %44 = tpu.memref_squeeze %43 : memref<1x!tpu.dma_semaphore, #tpu.memory_space<semaphore_mem>> -> memref<!tpu.dma_semaphore, #tpu.memory_space<semaphore_mem>>
    tpu.enqueue_dma source(%40 : memref<1024x256xbf16, #tpu.memory_space<any>>) target(%42 : memref<1024x256xbf16, #tpu.memory_space<vmem>>) target_semaphore(%44 : memref<!tpu.dma_semaphore, #tpu.memory_space<semaphore_mem>>)
    %c2_i32_46 = arith.constant 2 : i32
    %c0_i32_47 = arith.constant 0 : i32
    %c0_i32_48 = arith.constant 0 : i32
    %c0_i32_49 = arith.constant 0 : i32
    %c0_i32_50 = arith.constant 0 : i32
    %45 = tpu.memref_slice %arg1[%c2_i32_46, %c0_i32_49, %c0_i32_50] : memref<6x1024x256xbf16, #tpu.memory_space<any>> -> memref<1x1024x256xbf16, #tpu.memory_space<any>>
    %46 = tpu.memref_squeeze %45 : memref<1x1024x256xbf16, #tpu.memory_space<any>> -> memref<1024x256xbf16, #tpu.memory_space<any>>
    %c0_i32_51 = arith.constant 0 : i32
    %c0_i32_52 = arith.constant 0 : i32
    %47 = tpu.memref_slice %arg5[%c0_i32_47, %c0_i32_51, %c0_i32_52] : memref<2x1024x256xbf16, #tpu.memory_space<vmem>> -> memref<1x1024x256xbf16, #tpu.memory_space<vmem>>
    %48 = tpu.memref_squeeze %47 : memref<1x1024x256xbf16, #tpu.memory_space<vmem>> -> memref<1024x256xbf16, #tpu.memory_space<vmem>>
    %49 = tpu.memref_slice %arg7[%c0_i32_48] : memref<3x!tpu.dma_semaphore, #tpu.memory_space<semaphore_mem>> -> memref<1x!tpu.dma_semaphore, #tpu.memory_space<semaphore_mem>>
    %50 = tpu.memref_squeeze %49 : memref<1x!tpu.dma_semaphore, #tpu.memory_space<semaphore_mem>> -> memref<!tpu.dma_semaphore, #tpu.memory_space<semaphore_mem>>
    tpu.wait_dma2 semaphore(%50 : memref<!tpu.dma_semaphore, #tpu.memory_space<semaphore_mem>>) src(%46 : memref<1024x256xbf16, #tpu.memory_space<any>>) dst(%48 : memref<1024x256xbf16, #tpu.memory_space<vmem>>)
    %c0_53 = arith.constant 0 : index
    %c0_54 = arith.constant 0 : index
    %c0_55 = arith.constant 0 : index
    %51 = vector.load %arg5[%c0_53, %c0_54, %c0_55] : memref<2x1024x256xbf16, #tpu.memory_space<vmem>>, vector<1x1024x256xbf16>
    %52 = vector.shape_cast %51 : vector<1x1024x256xbf16> to vector<1024x256xbf16>
    %cst_56 = arith.constant dense<0.000000e+00> : vector<8x256xf32>
    %53 = tpu.matmul %8, %52, %cst_56 {dimension_numbers = #tpu.dot_dimension_numbers<[1], [0], [0], [1], [0, 0, 1, 1], [], []>} : vector<8x1024xbf16>, vector<1024x256xbf16>, vector<8x256xf32> -> vector<8x256xf32>
    %c4_i32 = arith.constant 4 : i32
    %c0_i32_57 = arith.constant 0 : i32
    %c0_i32_58 = arith.constant 0 : i32
    %c0_i32_59 = arith.constant 0 : i32
    %c0_i32_60 = arith.constant 0 : i32
    %54 = tpu.memref_slice %arg1[%c4_i32, %c0_i32_59, %c0_i32_60] : memref<6x1024x256xbf16, #tpu.memory_space<any>> -> memref<1x1024x256xbf16, #tpu.memory_space<any>>
    %55 = tpu.memref_squeeze %54 : memref<1x1024x256xbf16, #tpu.memory_space<any>> -> memref<1024x256xbf16, #tpu.memory_space<any>>
    %c0_i32_61 = arith.constant 0 : i32
    %c0_i32_62 = arith.constant 0 : i32
    %56 = tpu.memref_slice %arg5[%c0_i32_57, %c0_i32_61, %c0_i32_62] : memref<2x1024x256xbf16, #tpu.memory_space<vmem>> -> memref<1x1024x256xbf16, #tpu.memory_space<vmem>>
    %57 = tpu.memref_squeeze %56 : memref<1x1024x256xbf16, #tpu.memory_space<vmem>> -> memref<1024x256xbf16, #tpu.memory_space<vmem>>
    %58 = tpu.memref_slice %arg7[%c0_i32_58] : memref<3x!tpu.dma_semaphore, #tpu.memory_space<semaphore_mem>> -> memref<1x!tpu.dma_semaphore, #tpu.memory_space<semaphore_mem>>
    %59 = tpu.memref_squeeze %58 : memref<1x!tpu.dma_semaphore, #tpu.memory_space<semaphore_mem>> -> memref<!tpu.dma_semaphore, #tpu.memory_space<semaphore_mem>>
    tpu.enqueue_dma source(%55 : memref<1024x256xbf16, #tpu.memory_space<any>>) target(%57 : memref<1024x256xbf16, #tpu.memory_space<vmem>>) target_semaphore(%59 : memref<!tpu.dma_semaphore, #tpu.memory_space<semaphore_mem>>)
    %c3_i32_63 = arith.constant 3 : i32
    %c1_i32_64 = arith.constant 1 : i32
    %c1_i32_65 = arith.constant 1 : i32
    %c0_i32_66 = arith.constant 0 : i32
    %c0_i32_67 = arith.constant 0 : i32
    %60 = tpu.memref_slice %arg1[%c3_i32_63, %c0_i32_66, %c0_i32_67] : memref<6x1024x256xbf16, #tpu.memory_space<any>> -> memref<1x1024x256xbf16, #tpu.memory_space<any>>
    %61 = tpu.memref_squeeze %60 : memref<1x1024x256xbf16, #tpu.memory_space<any>> -> memref<1024x256xbf16, #tpu.memory_space<any>>
    %c0_i32_68 = arith.constant 0 : i32
    %c0_i32_69 = arith.constant 0 : i32
    %62 = tpu.memref_slice %arg5[%c1_i32_64, %c0_i32_68, %c0_i32_69] : memref<2x1024x256xbf16, #tpu.memory_space<vmem>> -> memref<1x1024x256xbf16, #tpu.memory_space<vmem>>
    %63 = tpu.memref_squeeze %62 : memref<1x1024x256xbf16, #tpu.memory_space<vmem>> -> memref<1024x256xbf16, #tpu.memory_space<vmem>>
    %64 = tpu.memref_slice %arg7[%c1_i32_65] : memref<3x!tpu.dma_semaphore, #tpu.memory_space<semaphore_mem>> -> memref<1x!tpu.dma_semaphore, #tpu.memory_space<semaphore_mem>>
    %65 = tpu.memref_squeeze %64 : memref<1x!tpu.dma_semaphore, #tpu.memory_space<semaphore_mem>> -> memref<!tpu.dma_semaphore, #tpu.memory_space<semaphore_mem>>
    tpu.wait_dma2 semaphore(%65 : memref<!tpu.dma_semaphore, #tpu.memory_space<semaphore_mem>>) src(%61 : memref<1024x256xbf16, #tpu.memory_space<any>>) dst(%63 : memref<1024x256xbf16, #tpu.memory_space<vmem>>)
    %c1_70 = arith.constant 1 : index
    %c0_71 = arith.constant 0 : index
    %c0_72 = arith.constant 0 : index
    %66 = vector.load %arg5[%c1_70, %c0_71, %c0_72] : memref<2x1024x256xbf16, #tpu.memory_space<vmem>>, vector<1x1024x256xbf16>
    %67 = vector.shape_cast %66 : vector<1x1024x256xbf16> to vector<1024x256xbf16>
    %cst_73 = arith.constant dense<0.000000e+00> : vector<8x256xf32>
    %68 = tpu.matmul %8, %67, %cst_73 {dimension_numbers = #tpu.dot_dimension_numbers<[1], [0], [0], [1], [0, 0, 1, 1], [], []>} : vector<8x1024xbf16>, vector<1024x256xbf16>, vector<8x256xf32> -> vector<8x256xf32>
    %69 = tpu.concatenate %23, %38, %53, %68 in 1 : vector<8x256xf32>, vector<8x256xf32>, vector<8x256xf32>, vector<8x256xf32> -> vector<8x1024xf32>
    %c0_74 = arith.constant 0 : index
    %c0_75 = arith.constant 0 : index
    %70 = vector.load %arg3[%c0_74, %c0_75] : memref<1x2176xf32, #tpu.memory_space<vmem>>, vector<1x1024xf32>
    %71 = vector.broadcast %70 : vector<1x1024xf32> to vector<8x1024xf32>
    %72 = arith.addf %69, %71 : vector<8x1024xf32>
    %cst_76 = arith.constant 0.000000e+00 : f32
    %73 = vector.broadcast %cst_76 : f32 to vector<8x1024xf32>
    %74 = arith.cmpf oge, %72, %73 : vector<8x1024xf32>
    %cst_77 = arith.constant 0.00999999977 : f32
    %75 = vector.broadcast %cst_77 : f32 to vector<8x1024xf32>
    %76 = arith.mulf %75, %72 : vector<8x1024xf32>
    %77 = arith.select %74, %72, %76 : vector<8x1024xi1>, vector<8x1024xf32>
    %78 = arith.truncf %77 : vector<8x1024xf32> to vector<8x1024xbf16>
    %c5_i32 = arith.constant 5 : i32
    %c1_i32_78 = arith.constant 1 : i32
    %c1_i32_79 = arith.constant 1 : i32
    %c0_i32_80 = arith.constant 0 : i32
    %c0_i32_81 = arith.constant 0 : i32
    %79 = tpu.memref_slice %arg1[%c5_i32, %c0_i32_80, %c0_i32_81] : memref<6x1024x256xbf16, #tpu.memory_space<any>> -> memref<1x1024x256xbf16, #tpu.memory_space<any>>
    %80 = tpu.memref_squeeze %79 : memref<1x1024x256xbf16, #tpu.memory_space<any>> -> memref<1024x256xbf16, #tpu.memory_space<any>>
    %c0_i32_82 = arith.constant 0 : i32
    %c0_i32_83 = arith.constant 0 : i32
    %81 = tpu.memref_slice %arg5[%c1_i32_78, %c0_i32_82, %c0_i32_83] : memref<2x1024x256xbf16, #tpu.memory_space<vmem>> -> memref<1x1024x256xbf16, #tpu.memory_space<vmem>>
    %82 = tpu.memref_squeeze %81 : memref<1x1024x256xbf16, #tpu.memory_space<vmem>> -> memref<1024x256xbf16, #tpu.memory_space<vmem>>
    %83 = tpu.memref_slice %arg7[%c1_i32_79] : memref<3x!tpu.dma_semaphore, #tpu.memory_space<semaphore_mem>> -> memref<1x!tpu.dma_semaphore, #tpu.memory_space<semaphore_mem>>
    %84 = tpu.memref_squeeze %83 : memref<1x!tpu.dma_semaphore, #tpu.memory_space<semaphore_mem>> -> memref<!tpu.dma_semaphore, #tpu.memory_space<semaphore_mem>>
    tpu.enqueue_dma source(%80 : memref<1024x256xbf16, #tpu.memory_space<any>>) target(%82 : memref<1024x256xbf16, #tpu.memory_space<vmem>>) target_semaphore(%84 : memref<!tpu.dma_semaphore, #tpu.memory_space<semaphore_mem>>)
    %c4_i32_84 = arith.constant 4 : i32
    %c0_i32_85 = arith.constant 0 : i32
    %c0_i32_86 = arith.constant 0 : i32
    %c0_i32_87 = arith.constant 0 : i32
    %c0_i32_88 = arith.constant 0 : i32
    %85 = tpu.memref_slice %arg1[%c4_i32_84, %c0_i32_87, %c0_i32_88] : memref<6x1024x256xbf16, #tpu.memory_space<any>> -> memref<1x1024x256xbf16, #tpu.memory_space<any>>
    %86 = tpu.memref_squeeze %85 : memref<1x1024x256xbf16, #tpu.memory_space<any>> -> memref<1024x256xbf16, #tpu.memory_space<any>>
    %c0_i32_89 = arith.constant 0 : i32
    %c0_i32_90 = arith.constant 0 : i32
    %87 = tpu.memref_slice %arg5[%c0_i32_85, %c0_i32_89, %c0_i32_90] : memref<2x1024x256xbf16, #tpu.memory_space<vmem>> -> memref<1x1024x256xbf16, #tpu.memory_space<vmem>>
    %88 = tpu.memref_squeeze %87 : memref<1x1024x256xbf16, #tpu.memory_space<vmem>> -> memref<1024x256xbf16, #tpu.memory_space<vmem>>
    %89 = tpu.memref_slice %arg7[%c0_i32_86] : memref<3x!tpu.dma_semaphore, #tpu.memory_space<semaphore_mem>> -> memref<1x!tpu.dma_semaphore, #tpu.memory_space<semaphore_mem>>
    %90 = tpu.memref_squeeze %89 : memref<1x!tpu.dma_semaphore, #tpu.memory_space<semaphore_mem>> -> memref<!tpu.dma_semaphore, #tpu.memory_space<semaphore_mem>>
    tpu.wait_dma2 semaphore(%90 : memref<!tpu.dma_semaphore, #tpu.memory_space<semaphore_mem>>) src(%86 : memref<1024x256xbf16, #tpu.memory_space<any>>) dst(%88 : memref<1024x256xbf16, #tpu.memory_space<vmem>>)
    %c0_91 = arith.constant 0 : index
    %c0_92 = arith.constant 0 : index
    %c0_93 = arith.constant 0 : index
    %91 = vector.load %arg5[%c0_91, %c0_92, %c0_93] : memref<2x1024x256xbf16, #tpu.memory_space<vmem>>, vector<1x1024x256xbf16>
    %92 = vector.shape_cast %91 : vector<1x1024x256xbf16> to vector<1024x256xbf16>
    %cst_94 = arith.constant dense<0.000000e+00> : vector<8x256xf32>
    %93 = tpu.matmul %78, %92, %cst_94 {dimension_numbers = #tpu.dot_dimension_numbers<[1], [0], [0], [1], [0, 0, 1, 1], [], []>} : vector<8x1024xbf16>, vector<1024x256xbf16>, vector<8x256xf32> -> vector<8x256xf32>
    %c5_i32_95 = arith.constant 5 : i32
    %c1_i32_96 = arith.constant 1 : i32
    %c1_i32_97 = arith.constant 1 : i32
    %c0_i32_98 = arith.constant 0 : i32
    %c0_i32_99 = arith.constant 0 : i32
    %94 = tpu.memref_slice %arg1[%c5_i32_95, %c0_i32_98, %c0_i32_99] : memref<6x1024x256xbf16, #tpu.memory_space<any>> -> memref<1x1024x256xbf16, #tpu.memory_space<any>>
    %95 = tpu.memref_squeeze %94 : memref<1x1024x256xbf16, #tpu.memory_space<any>> -> memref<1024x256xbf16, #tpu.memory_space<any>>
    %c0_i32_100 = arith.constant 0 : i32
    %c0_i32_101 = arith.constant 0 : i32
    %96 = tpu.memref_slice %arg5[%c1_i32_96, %c0_i32_100, %c0_i32_101] : memref<2x1024x256xbf16, #tpu.memory_space<vmem>> -> memref<1x1024x256xbf16, #tpu.memory_space<vmem>>
    %97 = tpu.memref_squeeze %96 : memref<1x1024x256xbf16, #tpu.memory_space<vmem>> -> memref<1024x256xbf16, #tpu.memory_space<vmem>>
    %98 = tpu.memref_slice %arg7[%c1_i32_97] : memref<3x!tpu.dma_semaphore, #tpu.memory_space<semaphore_mem>> -> memref<1x!tpu.dma_semaphore, #tpu.memory_space<semaphore_mem>>
    %99 = tpu.memref_squeeze %98 : memref<1x!tpu.dma_semaphore, #tpu.memory_space<semaphore_mem>> -> memref<!tpu.dma_semaphore, #tpu.memory_space<semaphore_mem>>
    tpu.wait_dma2 semaphore(%99 : memref<!tpu.dma_semaphore, #tpu.memory_space<semaphore_mem>>) src(%95 : memref<1024x256xbf16, #tpu.memory_space<any>>) dst(%97 : memref<1024x256xbf16, #tpu.memory_space<vmem>>)
    %c1_102 = arith.constant 1 : index
    %c0_103 = arith.constant 0 : index
    %c0_104 = arith.constant 0 : index
    %100 = vector.load %arg5[%c1_102, %c0_103, %c0_104] : memref<2x1024x256xbf16, #tpu.memory_space<vmem>>, vector<1x1024x256xbf16>
    %101 = vector.shape_cast %100 : vector<1x1024x256xbf16> to vector<1024x256xbf16>
    %cst_105 = arith.constant dense<0.000000e+00> : vector<8x256xf32>
    %102 = tpu.matmul %78, %101, %cst_105 {dimension_numbers = #tpu.dot_dimension_numbers<[1], [0], [0], [1], [0, 0, 1, 1], [], []>} : vector<8x1024xbf16>, vector<1024x256xbf16>, vector<8x256xf32> -> vector<8x256xf32>
    %103 = tpu.concatenate %93, %102 in 1 : vector<8x256xf32>, vector<8x256xf32> -> vector<8x512xf32>
    %c0_106 = arith.constant 0 : index
    %c1024 = arith.constant 1024 : index
    %104 = vector.load %arg3[%c0_106, %c1024] : memref<1x2176xf32, #tpu.memory_space<vmem>>, vector<1x512xf32>
    %105 = vector.broadcast %104 : vector<1x512xf32> to vector<8x512xf32>
    %106 = arith.addf %103, %105 : vector<8x512xf32>
    %cst_107 = arith.constant 0.000000e+00 : f32
    %107 = vector.broadcast %cst_107 : f32 to vector<8x512xf32>
    %108 = arith.cmpf oge, %106, %107 : vector<8x512xf32>
    %cst_108 = arith.constant 0.00999999977 : f32
    %109 = vector.broadcast %cst_108 : f32 to vector<8x512xf32>
    %110 = arith.mulf %109, %106 : vector<8x512xf32>
    %111 = arith.select %108, %106, %110 : vector<8x512xi1>, vector<8x512xf32>
    %112 = arith.truncf %111 : vector<8x512xf32> to vector<8x512xbf16>
    %c2_i32_109 = arith.constant 2 : i32
    %113 = tpu.memref_slice %arg7[%c2_i32_109] : memref<3x!tpu.dma_semaphore, #tpu.memory_space<semaphore_mem>> -> memref<1x!tpu.dma_semaphore, #tpu.memory_space<semaphore_mem>>
    %114 = tpu.memref_squeeze %113 : memref<1x!tpu.dma_semaphore, #tpu.memory_space<semaphore_mem>> -> memref<!tpu.dma_semaphore, #tpu.memory_space<semaphore_mem>>
    tpu.wait_dma2 semaphore(%114 : memref<!tpu.dma_semaphore, #tpu.memory_space<semaphore_mem>>) src(%arg2 : memref<960x256xbf16, #tpu.memory_space<any>>) dst(%arg6 : memref<960x256xbf16, #tpu.memory_space<vmem>>)
    %c0_110 = arith.constant 0 : index
    %c0_111 = arith.constant 0 : index
    %115 = vector.load %arg6[%c0_110, %c0_111] : memref<960x256xbf16, #tpu.memory_space<vmem>>, vector<512x256xbf16>
    %cst_112 = arith.constant dense<0.000000e+00> : vector<8x256xf32>
    %116 = tpu.matmul %112, %115, %cst_112 {dimension_numbers = #tpu.dot_dimension_numbers<[1], [0], [0], [1], [0, 0, 1, 1], [], []>} : vector<8x512xbf16>, vector<512x256xbf16>, vector<8x256xf32> -> vector<8x256xf32>
    %c0_113 = arith.constant 0 : index
    %c1536 = arith.constant 1536 : index
    %117 = vector.load %arg3[%c0_113, %c1536] : memref<1x2176xf32, #tpu.memory_space<vmem>>, vector<1x256xf32>
    %118 = vector.broadcast %117 : vector<1x256xf32> to vector<8x256xf32>
    %119 = arith.addf %116, %118 : vector<8x256xf32>
    %cst_114 = arith.constant 0.000000e+00 : f32
    %120 = vector.broadcast %cst_114 : f32 to vector<8x256xf32>
    %121 = arith.cmpf oge, %119, %120 : vector<8x256xf32>
    %cst_115 = arith.constant 0.00999999977 : f32
    %122 = vector.broadcast %cst_115 : f32 to vector<8x256xf32>
    %123 = arith.mulf %122, %119 : vector<8x256xf32>
    %124 = arith.select %121, %119, %123 : vector<8x256xi1>, vector<8x256xf32>
    %125 = arith.truncf %124 : vector<8x256xf32> to vector<8x256xbf16>
    %c512 = arith.constant 512 : index
    %c0_116 = arith.constant 0 : index
    %126 = vector.load %arg6[%c512, %c0_116] : memref<960x256xbf16, #tpu.memory_space<vmem>>, vector<256x128xbf16>
    %cst_117 = arith.constant dense<0.000000e+00> : vector<8x128xf32>
    %127 = tpu.matmul %125, %126, %cst_117 {dimension_numbers = #tpu.dot_dimension_numbers<[1], [0], [0], [1], [0, 0, 1, 1], [], []>} : vector<8x256xbf16>, vector<256x128xbf16>, vector<8x128xf32> -> vector<8x128xf32>
    %c0_118 = arith.constant 0 : index
    %c1792 = arith.constant 1792 : index
    %128 = vector.load %arg3[%c0_118, %c1792] : memref<1x2176xf32, #tpu.memory_space<vmem>>, vector<1x128xf32>
    %129 = vector.broadcast %128 : vector<1x128xf32> to vector<8x128xf32>
    %130 = arith.addf %127, %129 : vector<8x128xf32>
    %cst_119 = arith.constant 0.000000e+00 : f32
    %131 = vector.broadcast %cst_119 : f32 to vector<8x128xf32>
    %132 = arith.cmpf oge, %130, %131 : vector<8x128xf32>
    %cst_120 = arith.constant 0.00999999977 : f32
    %133 = vector.broadcast %cst_120 : f32 to vector<8x128xf32>
    %134 = arith.mulf %133, %130 : vector<8x128xf32>
    %135 = arith.select %132, %130, %134 : vector<8x128xi1>, vector<8x128xf32>
    %136 = arith.truncf %135 : vector<8x128xf32> to vector<8x128xbf16>
    %c768 = arith.constant 768 : index
    %c0_121 = arith.constant 0 : index
    %137 = vector.load %arg6[%c768, %c0_121] : memref<960x256xbf16, #tpu.memory_space<vmem>>, vector<128x64xbf16>
    %cst_122 = arith.constant dense<0.000000e+00> : vector<8x64xf32>
    %138 = tpu.matmul %136, %137, %cst_122 {dimension_numbers = #tpu.dot_dimension_numbers<[1], [0], [0], [1], [0, 0, 1, 1], [], []>} : vector<8x128xbf16>, vector<128x64xbf16>, vector<8x64xf32> -> vector<8x64xf32>
    %c0_123 = arith.constant 0 : index
    %c1920 = arith.constant 1920 : index
    %139 = vector.load %arg3[%c0_123, %c1920] : memref<1x2176xf32, #tpu.memory_space<vmem>>, vector<1x64xf32>
    %140 = vector.broadcast %139 : vector<1x64xf32> to vector<8x64xf32>
    %141 = arith.addf %138, %140 : vector<8x64xf32>
    %cst_124 = arith.constant 0.000000e+00 : f32
    %142 = vector.broadcast %cst_124 : f32 to vector<8x64xf32>
    %143 = arith.cmpf oge, %141, %142 : vector<8x64xf32>
    %cst_125 = arith.constant 0.00999999977 : f32
    %144 = vector.broadcast %cst_125 : f32 to vector<8x64xf32>
    %145 = arith.mulf %144, %141 : vector<8x64xf32>
    %146 = arith.select %143, %141, %145 : vector<8x64xi1>, vector<8x64xf32>
    %147 = arith.truncf %146 : vector<8x64xf32> to vector<8x64xbf16>
    %c896 = arith.constant 896 : index
    %c0_126 = arith.constant 0 : index
    %148 = vector.load %arg6[%c896, %c0_126] : memref<960x256xbf16, #tpu.memory_space<vmem>>, vector<64x128xbf16>
    %cst_127 = arith.constant dense<0.000000e+00> : vector<8x128xf32>
    %149 = tpu.matmul %147, %148, %cst_127 {dimension_numbers = #tpu.dot_dimension_numbers<[1], [0], [0], [1], [0, 0, 1, 1], [], []>} : vector<8x64xbf16>, vector<64x128xbf16>, vector<8x128xf32> -> vector<8x128xf32>
    %c0_128 = arith.constant 0 : index
    %c2048 = arith.constant 2048 : index
    %150 = vector.load %arg3[%c0_128, %c2048] : memref<1x2176xf32, #tpu.memory_space<vmem>>, vector<1x128xf32>
    %151 = vector.broadcast %150 : vector<1x128xf32> to vector<8x128xf32>
    %152 = arith.addf %149, %151 : vector<8x128xf32>
    %c0_129 = arith.constant 0 : index
    %c0_130 = arith.constant 0 : index
    %153 = vector.load %arg4[%c0_129, %c0_130] : memref<8x128xf32, #tpu.memory_space<vmem>>, vector<8x128xf32>
    tpu.vector_store %arg4[%c0_129, %c0_130], %152 {strides = array<i32>} : memref<8x128xf32, #tpu.memory_space<vmem>>, vector<8x128xf32>,
    return
  }
}

</mosaic_0001>

<bundles_post_ra>
// kernel: dense_encoder_forward.1
= control target key start
LH: loop header
LB: loop body
LE: loop exit
PB: predicated region body
PF: predicated region fallthrough
CT: control target
= control target key end

     0   :  { %9 = vsyncpa [#allocation6], 0  ;;  %s2734_s15 = smov [#allocation5]   ;;  %s3120_s0 = inlined_call_operand.vmem [shape: bf16[8,1024], index: 0, kind: input, shape index: {}]   ;;  %s3121_s1 = inlined_call_operand.hbm [shape: bf16[6,1024,256], index: 1, kind: input, shape index: {}]   ;;  %s3122_s2 = inlined_call_operand.hbm [shape: bf16[960,256], index: 2, kind: input, shape index: {}]   ;;  %s3123_s3 = inlined_call_operand.hbm [shape: f32[1,2176], index: 3, kind: input, shape index: {}]   ;;  %s3124_s4 = inlined_call_operand.vmem [shape: f32[8,128], index: 4, kind: output, shape index: {}]  }
   0x1   :  { %s18_s16 = sshll.u32 %s2734_s15, 4  ;;  %s2696_s19 = scalar_lea.hbm %s3123_s3, 272  ;;  %s19_s16 = int_to_ptr.vmem [resolvable:$true] %s18_s16 }
   0x2   :  { %p2697_p0 = scmp.ne.s32.totalorder %s3123_s3, %s2696_s19  ;;  %p2700_p1 = scmp.lt.u32.totalorder %s2696_s19, %s3123_s3 }
   0x4   :  { %p2702_p2 = pnand %p2700_p1, %p2697_p0 }
   0x6   :  { %2705 = shalt.err (!%p2702_p2)
}
   0x7   :  { %s2706_s24 = scalar_lea.vmem %s19_s16, 272  ;;  %s2710_s25 = scalar_lea.vmem %s19_s16, 288 }
   0x8   :  { %p2707_p3 = scmp.ne.s32.totalorder %s19_s16, %s2706_s24  ;;  %p2711_p4 = scmp.lt.s32.totalorder %s19_s16, %s19_s16 }
   0x9   :  { %p2712_p5 = scmp.lt.s32.totalorder %s2710_s25, %s2706_s24 }
   0xb   :  { %p2713_p6 = por %p2712_p5, %p2711_p4 }
   0xd   :  { %p2714_p7 = pnand %p2713_p6, %p2707_p3 }
   0xf   :  { %2717 = shalt.err (!%p2714_p7)
}
  0x10   :  { %21 = dma.hbm_to_vmem [thread:$0]  %s3123_s3, 272, %s19_s16, [#allocation6]  }
  0x11   :  { %2718 = dma.done.wait [#allocation6], 272  }
  0x12   :  { %2719 = vsyncadd [#allocation6], 4294967024  ;;  %s30_s28 = sld [smem:[#allocation0]]   ;;  %s2735_s29 = smov 256  }
  0x13   :  { %42 = sst [smem:[#allocation8]] %s2735_s29  ;;  %s2736_s30 = smov 2  }
  0x14   :  { %44 = sst [smem:[#allocation8 + $0x1]] %s2735_s29  ;;  %s2737_s5 = smov 64  }
  0x15   :  { %46 = sst [smem:[#allocation8 + $0x2]] %s2736_s30  ;;  %s2738_s6 = smov 128  }
  0x16   :  { %48 = sst [smem:[#allocation8 + $0x3]] %s2737_s5  ;;  %s2739_s7 = smov [#allocation2]  }
  0x17   :  { %50 = sst [smem:[#allocation8 + $0x4]] %s2738_s6  ;;  %s38_s8 = sshll.u32 %s2739_s7, 4  ;;  %s2798_s8 = int_to_ptr.vmem [resolvable:$true] %s38_s8 }
  0x18   :  { %52 = sst [smem:[#allocation8 + $0x5]] %s2736_s30  ;;  %s2572_s3 = sshll.u32 %s30_s28, 26 }
  0x19   :  { %54 = sst [smem:[#allocation8 + $0x6]] %s2738_s6  ;;  %s2801_s9 = sadd.s32 134217728, %s2572_s3 }
  0x1a   :  { %56 = sst [smem:[#allocation8 + $0x7]] %s2737_s5  ;;  %s2740_s10 = smov 4  }
  0x1b   :  { %58 = sst [smem:[#allocation8 + $0x8]] %s2740_s10  ;;  %s2741_s11 = smov [#allocation4]  }
  0x1c   :  { %s2742_s12 = smov [#allocation7]   ;;  %s2743_s15 = smov [#allocation3]  }
  0x1d   :  { %60 = dma.general %s3121_s1, 16384, %s2798_s8, %s2741_s11, %s2742_s12, [#allocation8], %s2801_s9, 0  }
  0x1e   :  { %77 = sst [smem:[#allocation10]] %s2735_s29  ;;  %s73_s16 = sshll.u32 %s2743_s15, 4  ;;  %s74_s16 = int_to_ptr.vmem [resolvable:$true] %s73_s16 }
  0x1f   :  { %79 = sst [smem:[#allocation10 + $0x1]] %s2735_s29  ;;  %s2744_s17 = smov [#allocation4 + $0x2]  }
  0x20   :  { %81 = sst [smem:[#allocation10 + $0x2]] %s2736_s30  ;;  %s2745_s18 = smov [#allocation9]  }
  0x21   :  { %83 = sst [smem:[#allocation10 + $0x3]] %s2737_s5  ;;  %s2746_s21 = smov [#allocation2 + $0x400]  }
  0x22   :  { %85 = sst [smem:[#allocation10 + $0x4]] %s2738_s6  ;;  %s114_s22 = sshll.u32 %s2746_s21, 4  ;;  %s2832_s22 = int_to_ptr.vmem [resolvable:$true] %s114_s22 }
  0x23   :  { %87 = sst [smem:[#allocation10 + $0x5]] %s2736_s30  ;;  %s100_s25 = scalar_lea.hbm %s3121_s1, 16384 }
  0x24   :  { %89 = sst [smem:[#allocation10 + $0x6]] %s2738_s6  ;;  %s2747_s14 = smov [#allocation4 + $0x1]  }
  0x25   :  { %91 = sst [smem:[#allocation10 + $0x7]] %s2737_s5  ;;  %s2748_s15 = smov [#allocation11]  }
  0x26   :  { %93 = sst [smem:[#allocation10 + $0x8]] %s2740_s10 }
  0x27   :  { %95 = dma.general %s3122_s2, 15360, %s74_s16, %s2744_s17, %s2745_s18, [#allocation10], %s2801_s9, 0  }
  0x28   :  { %118 = sst [smem:[#allocation12]] %s2735_s29  ;;  %v2839_v0 = vld [vmem:[%s3120_s0] sm:$0xff]  ;;  %v2844_v1 = vld [vmem:[%s3120_s0 + $0x8] sm:$0xff]  ;;  %v2849_v2 = vld [vmem:[%s3120_s0 + $0x10] sm:$0xff] }
  0x29   :  { %120 = sst [smem:[#allocation12 + $0x1]] %s2735_s29  ;;  %v2855_v3 = vld [vmem:[%s3120_s0 + $0x18] sm:$0xff] }
  0x2a   :  { %122 = sst [smem:[#allocation12 + $0x2]] %s2736_s30 }
  0x2b   :  { %124 = sst [smem:[#allocation12 + $0x3]] %s2737_s5 }
  0x2c   :  { %126 = sst [smem:[#allocation12 + $0x4]] %s2738_s6 }
  0x2d   :  { %128 = sst [smem:[#allocation12 + $0x5]] %s2736_s30 }
  0x2e   :  { %130 = sst [smem:[#allocation12 + $0x6]] %s2738_s6 }
  0x2f   :  { %132 = sst [smem:[#allocation12 + $0x7]] %s2737_s5 }
  0x30   :  { %134 = sst [smem:[#allocation12 + $0x8]] %s2740_s10 }
  0x31   :  { %136 = dma.general %s100_s25, 16384, %s2832_s22, %s2747_s14, %s2748_s15, [#allocation12], %s2801_s9, 0  }
  0x32   :  { %2720 = dma.done.wait [#allocation4], 16384 }
  0x33   :  { %2721 = vsyncadd [#allocation4], 4294950912  ;;  %v2863_v4 = vcombine.high %v2839_v0, %v2839_v0  ;;  %v2867_v5 = vcombine.high %v2844_v1, %v2844_v1  ;;  %477 = sst [smem:[#allocation14]] %s2735_s29  ;;  %v142_v6 = vld [vmem:[#allocation2 + $0x8] sm:$0xff]  ;;  %v141_v8 = vld [vmem:[#allocation2] sm:$0xff]  ;;  %s461_s17 = scalar_lea.hbm %s3121_s1, 32768 }
  0x34   :  { %479 = sst [smem:[#allocation14 + $0x1]] %s2735_s29  ;;  %v174_v7 = vld [vmem:[#allocation2 + $0x108] sm:$0xff]  ;;  %297 = vmatprep.subr.bf16.mxu0 %v142_v6  ;;  %v173_v9 = vld [vmem:[#allocation2 + $0x100] sm:$0xff]  ;;  %v144_v10 = vld [vmem:[#allocation2 + $0x18] sm:$0xff]  ;;  %s2749_s18 = smov [#allocation13]  }
  0x35   :  { %329 = vmatprep.mubr.bf16.mxu0 %v2863_v4  ;;  %370 = vmatprep.mubr.bf16.mxu1 %v2867_v5  ;;  %481 = sst [smem:[#allocation14 + $0x2]] %s2736_s30  ;;  %v176_v11 = vld [vmem:[#allocation2 + $0x118] sm:$0xff]  ;;  %v143_v12 = vld [vmem:[#allocation2 + $0x10] sm:$0xff]  ;;  %v146_v14 = vld [vmem:[#allocation2 + $0x28] sm:$0xff] }
  0x36   :  { %483 = sst [smem:[#allocation14 + $0x3]] %s2737_s5  ;;  %338 = vmatprep.subr.bf16.mxu1 %v174_v7  ;;  %298 = vmatpush1.bf16.msra.mxu0 %v141_v8  ;;  %v175_v13 = vld [vmem:[#allocation2 + $0x110] sm:$0xff]  ;;  %v178_v15 = vld [vmem:[#allocation2 + $0x128] sm:$0xff]  ;;  %v145_v16 = vld [vmem:[#allocation2 + $0x20] sm:$0xff] }
  0x37   :  { %485 = sst [smem:[#allocation14 + $0x4]] %s2738_s6  ;;  %339 = vmatpush1.bf16.msra.mxu1 %v173_v9  ;;  %299 = vmatprep.subr.bf16.mxu0 %v144_v10  ;;  %v177_v17 = vld [vmem:[#allocation2 + $0x120] sm:$0xff]  ;;  %v148_v18 = vld [vmem:[#allocation2 + $0x38] sm:$0xff]  ;;  %v147_v20 = vld [vmem:[#allocation2 + $0x30] sm:$0xff] }
  0x38   :  { %487 = sst [smem:[#allocation14 + $0x5]] %s2736_s30  ;;  %340 = vmatprep.subr.bf16.mxu1 %v176_v11  ;;  %v180_v19 = vld [vmem:[#allocation2 + $0x138] sm:$0xff]  ;;  %v179_v21 = vld [vmem:[#allocation2 + $0x130] sm:$0xff]  ;;  %v150_v22 = vld [vmem:[#allocation2 + $0x48] sm:$0xff] }
  0x39   :  { %489 = sst [smem:[#allocation14 + $0x6]] %s2738_s6  ;;  %v182_v23 = vld [vmem:[#allocation2 + $0x148] sm:$0xff]  ;;  %v149_v24 = vld [vmem:[#allocation2 + $0x40] sm:$0xff]  ;;  %v152_v26 = vld [vmem:[#allocation2 + $0x58] sm:$0xff] }
  0x3a   :  { %491 = sst [smem:[#allocation14 + $0x7]] %s2737_s5  ;;  %300 = vmatpush1.bf16.msra.mxu0 %v143_v12  ;;  %v181_v25 = vld [vmem:[#allocation2 + $0x140] sm:$0xff]  ;;  %v184_v27 = vld [vmem:[#allocation2 + $0x158] sm:$0xff]  ;;  %v151_v28 = vld [vmem:[#allocation2 + $0x50] sm:$0xff] }
  0x3b   :  { %493 = sst [smem:[#allocation14 + $0x8]] %s2740_s10  ;;  %341 = vmatpush1.bf16.msra.mxu1 %v175_v13  ;;  %301 = vmatprep.subr.bf16.mxu0 %v146_v14  ;;  %v183_v29 = vld [vmem:[#allocation2 + $0x150] sm:$0xff]  ;;  %v154_v30 = vld [vmem:[#allocation2 + $0x68] sm:$0xff]  ;;  %v153_v32 = vld [vmem:[#allocation2 + $0x60] sm:$0xff]  ;;  %v2882_v14 = vcombine.low %v2839_v0, %v2839_v0  ;;  %v2894_v0 = vcombine.high %v2855_v3, %v2855_v3 }
  0x3c   :  { %342 = vmatprep.subr.bf16.mxu1 %v178_v15  ;;  %v186_v31 = vld [vmem:[#allocation2 + $0x168] sm:$0xff]  ;;  %v185_v33 = vld [vmem:[#allocation2 + $0x160] sm:$0xff]  ;;  %v156_v34 = vld [vmem:[#allocation2 + $0x78] sm:$0xff]  ;;  %v2886_v15 = vcombine.low %v2844_v1, %v2844_v1 }
  0x3d   :  { %v188_v35 = vld [vmem:[#allocation2 + $0x178] sm:$0xff]  ;;  %v155_v36 = vld [vmem:[#allocation2 + $0x70] sm:$0xff]  ;;  %v158_v38 = vld [vmem:[#allocation2 + $0x88] sm:$0xff] }
  0x3e   :  { %302 = vmatpush1.bf16.msra.mxu0 %v145_v16  ;;  %v187_v37 = vld [vmem:[#allocation2 + $0x170] sm:$0xff]  ;;  %v190_v39 = vld [vmem:[#allocation2 + $0x188] sm:$0xff]  ;;  %v157_v40 = vld [vmem:[#allocation2 + $0x80] sm:$0xff] }
  0x3f   :  { %343 = vmatpush1.bf16.msra.mxu1 %v177_v17  ;;  %303 = vmatprep.subr.bf16.mxu0 %v148_v18  ;;  %v189_v41 = vld [vmem:[#allocation2 + $0x180] sm:$0xff]  ;;  %v160_v42 = vld [vmem:[#allocation2 + $0x98] sm:$0xff]  ;;  %v159_v44 = vld [vmem:[#allocation2 + $0x90] sm:$0xff] }
  0x40   :  { %344 = vmatprep.subr.bf16.mxu1 %v180_v19  ;;  %v192_v43 = vld [vmem:[#allocation2 + $0x198] sm:$0xff]  ;;  %v191_v45 = vld [vmem:[#allocation2 + $0x190] sm:$0xff]  ;;  %v162_v46 = vld [vmem:[#allocation2 + $0xa8] sm:$0xff] }
  0x41   :  { %v194_v47 = vld [vmem:[#allocation2 + $0x1a8] sm:$0xff]  ;;  %v161_v48 = vld [vmem:[#allocation2 + $0xa0] sm:$0xff]  ;;  %v164_v50 = vld [vmem:[#allocation2 + $0xb8] sm:$0xff] }
  0x42   :  { %304 = vmatpush1.bf16.msra.mxu0 %v147_v20  ;;  %v193_v49 = vld [vmem:[#allocation2 + $0x1a0] sm:$0xff]  ;;  %v196_v51 = vld [vmem:[#allocation2 + $0x1b8] sm:$0xff]  ;;  %v163_v52 = vld [vmem:[#allocation2 + $0xb0] sm:$0xff]  ;;  %v2890_v20 = vcombine.high %v2849_v2, %v2849_v2 }
  0x43   :  { %345 = vmatpush1.bf16.msra.mxu1 %v179_v21  ;;  %305 = vmatprep.subr.bf16.mxu0 %v150_v22  ;;  %v195_v53 = vld [vmem:[#allocation2 + $0x1b0] sm:$0xff]  ;;  %v166_v54 = vld [vmem:[#allocation2 + $0xc8] sm:$0xff]  ;;  %v165_v56 = vld [vmem:[#allocation2 + $0xc0] sm:$0xff] }
  0x44   :  { %346 = vmatprep.subr.bf16.mxu1 %v182_v23  ;;  %v198_v55 = vld [vmem:[#allocation2 + $0x1c8] sm:$0xff]  ;;  %v197_v57 = vld [vmem:[#allocation2 + $0x1c0] sm:$0xff]  ;;  %v168_v58 = vld [vmem:[#allocation2 + $0xd8] sm:$0xff] }
  0x45   :  { %v200_v59 = vld [vmem:[#allocation2 + $0x1d8] sm:$0xff]  ;;  %v167_v60 = vld [vmem:[#allocation2 + $0xd0] sm:$0xff]  ;;  %v170_v62 = vld [vmem:[#allocation2 + $0xe8] sm:$0xff] }
  0x46   :  { %306 = vmatpush1.bf16.msra.mxu0 %v149_v24  ;;  %v199_v61 = vld [vmem:[#allocation2 + $0x1d0] sm:$0xff]  ;;  %v202_v63 = vld [vmem:[#allocation2 + $0x1e8] sm:$0xff]  ;;  %v169_v6 = vld [vmem:[#allocation2 + $0xe0] sm:$0xff] }
  0x47   :  { %347 = vmatpush1.bf16.msra.mxu1 %v181_v25  ;;  %307 = vmatprep.subr.bf16.mxu0 %v152_v26  ;;  %v201_v7 = vld [vmem:[#allocation2 + $0x1e0] sm:$0xff]  ;;  %v172_v8 = vld [vmem:[#allocation2 + $0xf8] sm:$0xff]  ;;  %v171_v10 = vld [vmem:[#allocation2 + $0xf0] sm:$0xff] }
  0x48   :  { %348 = vmatprep.subr.bf16.mxu1 %v184_v27  ;;  %v204_v9 = vld [vmem:[#allocation2 + $0x1f8] sm:$0xff]  ;;  %v203_v11 = vld [vmem:[#allocation2 + $0x1f0] sm:$0xff]  ;;  %v206_v12 = vld [vmem:[#allocation2 + $0x208] sm:$0xff] }
  0x49   :  { %v238_v13 = vld [vmem:[#allocation2 + $0x308] sm:$0xff]  ;;  %v205_v16 = vld [vmem:[#allocation2 + $0x200] sm:$0xff]  ;;  %v208_v18 = vld [vmem:[#allocation2 + $0x218] sm:$0xff] }
  0x4a   :  { %308 = vmatpush1.bf16.msra.mxu0 %v151_v28  ;;  %v237_v17 = vld [vmem:[#allocation2 + $0x300] sm:$0xff]  ;;  %v240_v19 = vld [vmem:[#allocation2 + $0x318] sm:$0xff]  ;;  %v207_v1 = vld [vmem:[#allocation2 + $0x210] sm:$0xff] }
  0x4b   :  { %349 = vmatpush1.bf16.msra.mxu1 %v183_v29  ;;  %309 = vmatprep.subr.bf16.mxu0 %v154_v30  ;;  %v239_v21 = vld [vmem:[#allocation2 + $0x310] sm:$0xff]  ;;  %v210_v22 = vld [vmem:[#allocation2 + $0x228] sm:$0xff]  ;;  %v209_v24 = vld [vmem:[#allocation2 + $0x220] sm:$0xff] }
  0x4c   :  { %350 = vmatprep.subr.bf16.mxu1 %v186_v31  ;;  %v242_v23 = vld [vmem:[#allocation2 + $0x328] sm:$0xff]  ;;  %v241_v25 = vld [vmem:[#allocation2 + $0x320] sm:$0xff]  ;;  %v212_v26 = vld [vmem:[#allocation2 + $0x238] sm:$0xff] }
  0x4d   :  { %v244_v27 = vld [vmem:[#allocation2 + $0x338] sm:$0xff]  ;;  %v211_v28 = vld [vmem:[#allocation2 + $0x230] sm:$0xff]  ;;  %v214_v30 = vld [vmem:[#allocation2 + $0x248] sm:$0xff] }
  0x4e   :  { %310 = vmatpush1.bf16.msra.mxu0 %v153_v32  ;;  %v243_v29 = vld [vmem:[#allocation2 + $0x330] sm:$0xff]  ;;  %v246_v31 = vld [vmem:[#allocation2 + $0x348] sm:$0xff]  ;;  %v213_v32 = vld [vmem:[#allocation2 + $0x240] sm:$0xff] }
  0x4f   :  { %351 = vmatpush1.bf16.msra.mxu1 %v185_v33  ;;  %311 = vmatprep.subr.bf16.mxu0 %v156_v34  ;;  %v245_v33 = vld [vmem:[#allocation2 + $0x340] sm:$0xff]  ;;  %v216_v34 = vld [vmem:[#allocation2 + $0x258] sm:$0xff] }
  0x50   :  { %352 = vmatprep.subr.bf16.mxu1 %v188_v35  ;;  %v248_v35 = vld [vmem:[#allocation2 + $0x358] sm:$0xff] }
  0x52   :  { %312 = vmatpush1.bf16.msra.mxu0 %v155_v36  ;;  %v215_v36 = vld [vmem:[#allocation2 + $0x250] sm:$0xff] }
  0x53   :  { %353 = vmatpush1.bf16.msra.mxu1 %v187_v37  ;;  %313 = vmatprep.subr.bf16.mxu0 %v158_v38  ;;  %v247_v37 = vld [vmem:[#allocation2 + $0x350] sm:$0xff]  ;;  %v218_v38 = vld [vmem:[#allocation2 + $0x268] sm:$0xff] }
  0x54   :  { %354 = vmatprep.subr.bf16.mxu1 %v190_v39  ;;  %v250_v39 = vld [vmem:[#allocation2 + $0x368] sm:$0xff] }
  0x56   :  { %314 = vmatpush1.bf16.msra.mxu0 %v157_v40  ;;  %v217_v40 = vld [vmem:[#allocation2 + $0x260] sm:$0xff] }
  0x57   :  { %355 = vmatpush1.bf16.msra.mxu1 %v189_v41  ;;  %315 = vmatprep.subr.bf16.mxu0 %v160_v42  ;;  %v249_v41 = vld [vmem:[#allocation2 + $0x360] sm:$0xff]  ;;  %v220_v42 = vld [vmem:[#allocation2 + $0x278] sm:$0xff] }
  0x58   :  { %356 = vmatprep.subr.bf16.mxu1 %v192_v43  ;;  %v252_v43 = vld [vmem:[#allocation2 + $0x378] sm:$0xff] }
  0x5a   :  { %316 = vmatpush1.bf16.msra.mxu0 %v159_v44  ;;  %v219_v44 = vld [vmem:[#allocation2 + $0x270] sm:$0xff] }
  0x5b   :  { %357 = vmatpush1.bf16.msra.mxu1 %v191_v45  ;;  %317 = vmatprep.subr.bf16.mxu0 %v162_v46  ;;  %v251_v45 = vld [vmem:[#allocation2 + $0x370] sm:$0xff]  ;;  %v222_v46 = vld [vmem:[#allocation2 + $0x288] sm:$0xff] }
  0x5c   :  { %358 = vmatprep.subr.bf16.mxu1 %v194_v47  ;;  %v254_v47 = vld [vmem:[#allocation2 + $0x388] sm:$0xff] }
  0x5e   :  { %318 = vmatpush1.bf16.msra.mxu0 %v161_v48  ;;  %v221_v48 = vld [vmem:[#allocation2 + $0x280] sm:$0xff] }
  0x5f   :  { %359 = vmatpush1.bf16.msra.mxu1 %v193_v49  ;;  %319 = vmatprep.subr.bf16.mxu0 %v164_v50  ;;  %v253_v49 = vld [vmem:[#allocation2 + $0x380] sm:$0xff]  ;;  %v224_v50 = vld [vmem:[#allocation2 + $0x298] sm:$0xff] }
  0x60   :  { %360 = vmatprep.subr.bf16.mxu1 %v196_v51  ;;  %v256_v51 = vld [vmem:[#allocation2 + $0x398] sm:$0xff] }
  0x62   :  { %320 = vmatpush1.bf16.msra.mxu0 %v163_v52  ;;  %v223_v52 = vld [vmem:[#allocation2 + $0x290] sm:$0xff] }
  0x63   :  { %361 = vmatpush1.bf16.msra.mxu1 %v195_v53  ;;  %321 = vmatprep.subr.bf16.mxu0 %v166_v54  ;;  %v255_v53 = vld [vmem:[#allocation2 + $0x390] sm:$0xff]  ;;  %v226_v54 = vld [vmem:[#allocation2 + $0x2a8] sm:$0xff] }
  0x64   :  { %362 = vmatprep.subr.bf16.mxu1 %v198_v55  ;;  %v258_v55 = vld [vmem:[#allocation2 + $0x3a8] sm:$0xff] }
  0x66   :  { %322 = vmatpush1.bf16.msra.mxu0 %v165_v56  ;;  %v225_v56 = vld [vmem:[#allocation2 + $0x2a0] sm:$0xff] }
  0x67   :  { %363 = vmatpush1.bf16.msra.mxu1 %v197_v57  ;;  %323 = vmatprep.subr.bf16.mxu0 %v168_v58  ;;  %v257_v57 = vld [vmem:[#allocation2 + $0x3a0] sm:$0xff]  ;;  %v228_v58 = vld [vmem:[#allocation2 + $0x2b8] sm:$0xff] }
  0x68   :  { %364 = vmatprep.subr.bf16.mxu1 %v200_v59  ;;  %v260_v59 = vld [vmem:[#allocation2 + $0x3b8] sm:$0xff] }
  0x6a   :  { %324 = vmatpush1.bf16.msra.mxu0 %v167_v60  ;;  %v227_v60 = vld [vmem:[#allocation2 + $0x2b0] sm:$0xff] }
  0x6b   :  { %365 = vmatpush1.bf16.msra.mxu1 %v199_v61  ;;  %325 = vmatprep.subr.bf16.mxu0 %v170_v62  ;;  %v259_v61 = vld [vmem:[#allocation2 + $0x3b0] sm:$0xff]  ;;  %v230_v62 = vld [vmem:[#allocation2 + $0x2c8] sm:$0xff] }
  0x6c   :  { %366 = vmatprep.subr.bf16.mxu1 %v202_v63  ;;  %v262_v63 = vld [vmem:[#allocation2 + $0x3c8] sm:$0xff] }
  0x6e   :  { %326 = vmatpush1.bf16.msra.mxu0 %v169_v6  ;;  %v229_v6 = vld [vmem:[#allocation2 + $0x2c0] sm:$0xff] }
  0x6f   :  { %367 = vmatpush1.bf16.msra.mxu1 %v201_v7  ;;  %327 = vmatprep.subr.bf16.mxu0 %v172_v8  ;;  %v261_v7 = vld [vmem:[#allocation2 + $0x3c0] sm:$0xff]  ;;  %v232_v8 = vld [vmem:[#allocation2 + $0x2d8] sm:$0xff] }
  0x70   :  { %368 = vmatprep.subr.bf16.mxu1 %v204_v9  ;;  %v264_v9 = vld [vmem:[#allocation2 + $0x3d8] sm:$0xff] }
  0x72   :  { %328 = vmatpush1.bf16.msra.mxu0 %v171_v10  ;;  %v231_v10 = vld [vmem:[#allocation2 + $0x2d0] sm:$0xff] }
  0x73   :  { %369 = vmatpush1.bf16.msra.mxu1 %v203_v11  ;;  %379 = vmatprep.subr.bf16.mxu0 %v206_v12  ;;  %v263_v11 = vld [vmem:[#allocation2 + $0x3d0] sm:$0xff]  ;;  %v234_v12 = vld [vmem:[#allocation2 + $0x2e8] sm:$0xff] }
  0x74   :  { %420 = vmatprep.subr.bf16.mxu1 %v238_v13  ;;  %v266_v13 = vld [vmem:[#allocation2 + $0x3e8] sm:$0xff] }
  0x75   :  { %330 = vmatmul.mubr.bf16.vlgmr.msra.gmra.mrb[0].mxu0 %v2882_v14 }
  0x76   :  { %371 = vmatmul.mubr.bf16.vlgmr.msra.gmra.mrb[0].mxu1 %v2886_v15  ;;  %380 = vmatpush1.bf16.msra.mxu0 %v205_v16  ;;  %v233_v16 = vld [vmem:[#allocation2 + $0x2e0] sm:$0xff] }
  0x77   :  { %421 = vmatpush1.bf16.msra.mxu1 %v237_v17  ;;  %381 = vmatprep.subr.bf16.mxu0 %v208_v18  ;;  %v265_v17 = vld [vmem:[#allocation2 + $0x3e0] sm:$0xff]  ;;  %v236_v18 = vld [vmem:[#allocation2 + $0x2f8] sm:$0xff] }
  0x78   :  { %422 = vmatprep.subr.bf16.mxu1 %v240_v19  ;;  %411 = vmatprep.mubr.bf16.mxu0 %v2890_v20  ;;  %v268_v19 = vld [vmem:[#allocation2 + $0x3f8] sm:$0xff] }
  0x79   :  { %452 = vmatprep.mubr.bf16.mxu1 %v2894_v0 }
  0x7a   :  { %382 = vmatpush1.bf16.msra.mxu0 %v207_v1  ;;  %v235_v1 = vld [vmem:[#allocation2 + $0x2f0] sm:$0xff] }
  0x7b   :  { %423 = vmatpush1.bf16.msra.mxu1 %v239_v21  ;;  %383 = vmatprep.subr.bf16.mxu0 %v210_v22  ;;  %v267_v21 = vld [vmem:[#allocation2 + $0x3f0] sm:$0xff]  ;;  %v2902_v22 = vcombine.low %v2849_v2, %v2849_v2 }
  0x7c   :  { %424 = vmatprep.subr.bf16.mxu1 %v242_v23  ;;  %v2906_v23 = vcombine.low %v2855_v3, %v2855_v3  ;;  %495 = dma.general %s461_s17, 16384, %s2798_s8, %s2741_s11, %s2749_s18, [#allocation14], %s2801_s9, 0  }
  0x7e   :  { %384 = vmatpush1.bf16.msra.mxu0 %v209_v24 }
  0x7f   :  { %425 = vmatpush1.bf16.msra.mxu1 %v241_v25  ;;  %385 = vmatprep.subr.bf16.mxu0 %v212_v26 }
  0x80   :  { %426 = vmatprep.subr.bf16.mxu1 %v244_v27 }
  0x82   :  { %386 = vmatpush1.bf16.msra.mxu0 %v211_v28 }
  0x83   :  { %427 = vmatpush1.bf16.msra.mxu1 %v243_v29  ;;  %387 = vmatprep.subr.bf16.mxu0 %v214_v30 }
  0x84   :  { %428 = vmatprep.subr.bf16.mxu1 %v246_v31 }
  0x86   :  { %388 = vmatpush1.bf16.msra.mxu0 %v213_v32 }
  0x87   :  { %429 = vmatpush1.bf16.msra.mxu1 %v245_v33  ;;  %389 = vmatprep.subr.bf16.mxu0 %v216_v34 }
  0x88   :  { %430 = vmatprep.subr.bf16.mxu1 %v248_v35 }
  0x8a   :  { %390 = vmatpush1.bf16.msra.mxu0 %v215_v36 }
  0x8b   :  { %431 = vmatpush1.bf16.msra.mxu1 %v247_v37  ;;  %391 = vmatprep.subr.bf16.mxu0 %v218_v38 }
  0x8c   :  { %432 = vmatprep.subr.bf16.mxu1 %v250_v39 }
  0x8e   :  { %392 = vmatpush1.bf16.msra.mxu0 %v217_v40 }
  0x8f   :  { %433 = vmatpush1.bf16.msra.mxu1 %v249_v41  ;;  %393 = vmatprep.subr.bf16.mxu0 %v220_v42 }
  0x90   :  { %434 = vmatprep.subr.bf16.mxu1 %v252_v43 }
  0x92   :  { %394 = vmatpush1.bf16.msra.mxu0 %v219_v44 }
  0x93   :  { %435 = vmatpush1.bf16.msra.mxu1 %v251_v45  ;;  %395 = vmatprep.subr.bf16.mxu0 %v222_v46 }
  0x94   :  { %436 = vmatprep.subr.bf16.mxu1 %v254_v47 }
  0x96   :  { %396 = vmatpush1.bf16.msra.mxu0 %v221_v48 }
  0x97   :  { %437 = vmatpush1.bf16.msra.mxu1 %v253_v49  ;;  %397 = vmatprep.subr.bf16.mxu0 %v224_v50 }
  0x98   :  { %438 = vmatprep.subr.bf16.mxu1 %v256_v51 }
  0x9a   :  { %398 = vmatpush1.bf16.msra.mxu0 %v223_v52 }
  0x9b   :  { %439 = vmatpush1.bf16.msra.mxu1 %v255_v53  ;;  %399 = vmatprep.subr.bf16.mxu0 %v226_v54 }
  0x9c   :  { %440 = vmatprep.subr.bf16.mxu1 %v258_v55 }
  0x9e   :  { %400 = vmatpush1.bf16.msra.mxu0 %v225_v56 }
  0x9f   :  { %441 = vmatpush1.bf16.msra.mxu1 %v257_v57  ;;  %401 = vmatprep.subr.bf16.mxu0 %v228_v58 }
  0xa0   :  { %442 = vmatprep.subr.bf16.mxu1 %v260_v59 }
  0xa2   :  { %402 = vmatpush1.bf16.msra.mxu0 %v227_v60 }
  0xa3   :  { %443 = vmatpush1.bf16.msra.mxu1 %v259_v61  ;;  %403 = vmatprep.subr.bf16.mxu0 %v230_v62 }
  0xa4   :  { %444 = vmatprep.subr.bf16.mxu1 %v262_v63 }
  0xa6   :  { %404 = vmatpush1.bf16.msra.mxu0 %v229_v6 }
  0xa7   :  { %445 = vmatpush1.bf16.msra.mxu1 %v261_v7  ;;  %405 = vmatprep.subr.bf16.mxu0 %v232_v8 }
  0xa8   :  { %446 = vmatprep.subr.bf16.mxu1 %v264_v9 }
  0xaa   :  { %406 = vmatpush1.bf16.msra.mxu0 %v231_v10 }
  0xab   :  { %447 = vmatpush1.bf16.msra.mxu1 %v263_v11  ;;  %407 = vmatprep.subr.bf16.mxu0 %v234_v12 }
  0xac   :  { %448 = vmatprep.subr.bf16.mxu1 %v266_v13 }
  0xae   :  { %408 = vmatpush1.bf16.msra.mxu0 %v233_v16 }
  0xaf   :  { %449 = vmatpush1.bf16.msra.mxu1 %v265_v17  ;;  %409 = vmatprep.subr.bf16.mxu0 %v236_v18 }
  0xb0   :  { %450 = vmatprep.subr.bf16.mxu1 %v268_v19 }
  0xb2   :  { %410 = vmatpush1.bf16.msra.mxu0 %v235_v1 }
  0xb3   :  { %451 = vmatpush1.bf16.msra.mxu1 %v267_v21 }
  0xb5   :  { %412 = vmatmul.mubr.bf16.vlgmr.msra.gmra.mrb[4].mxu0 %v2902_v22 }
  0xb6   :  { %453 = vmatmul.mubr.bf16.vlgmr.msra.gmra.mrb[4].mxu1 %v2906_v23 }
 0x148   :  { %v331_v24 = vpop.f32.mrb[0].mxu0 }
 0x149   :  { %v372_v2 = vpop.f32.mrb[0].mxu1  ;;  %v333_v26 = vpop.f32.mrb[1].mxu0 }
 0x14a   :  { %v373_v25 = vadd.f32 %v372_v2, %v331_v24  ;;  %v374_v27 = vpop.f32.mrb[1].mxu1  ;;  %v335_v28 = vpop.f32.mrb[2].mxu0 }
 0x14b   :  { %v375_v3 = vadd.f32 %v374_v27, %v333_v26  ;;  %v376_v29 = vpop.f32.mrb[2].mxu1  ;;  %v336_v30 = vpop.f32.mrb[3].mxu0 }
 0x14c   :  { %v377_v31 = vpop.f32.mrb[3].mxu1 }
 0x188   :  { %v413_v32 = vpop.f32.mrb[4].mxu0 }
 0x189   :  { %v454_v33 = vpop.f32.mrb[4].mxu1  ;;  %v414_v34 = vadd.f32 %v413_v32, %v373_v25  ;;  %v415_v35 = vpop.f32.mrb[5].mxu0 }
 0x18a   :  { %v456_v36 = vpop.f32.mrb[5].mxu1  ;;  %v416_v37 = vadd.f32 %v415_v35, %v375_v3  ;;  %v417_v38 = vpop.f32.mrb[6].mxu0 }
 0x18b   :  { %v458_v39 = vpop.f32.mrb[6].mxu1  ;;  %v2916_v40 = vadd.f32 %v454_v33, %v414_v34  ;;  %v418_v41 = vpop.f32.mrb[7].mxu0 }
 0x18c   :  { %v459_v42 = vpop.f32.mrb[7].mxu1  ;;  %v2918_v43 = vadd.f32 %v456_v36, %v416_v37 }
 0x18d   :  { %2722 = dma.done.wait [#allocation4 + $0x1], 16384 }
 0x18e   :  { %2723 = vsyncadd [#allocation4 + $0x1], 4294950912  ;;  %658 = vmatprep.mubr.bf16.mxu0 %v2863_v4  ;;  %699 = vmatprep.mubr.bf16.mxu1 %v2867_v5  ;;  %806 = sst [smem:[#allocation16]] %s2735_s29  ;;  %v499_v44 = vld [vmem:[#allocation2 + $0x408] sm:$0xff]  ;;  %v498_v46 = vld [vmem:[#allocation2 + $0x400] sm:$0xff]  ;;  %s790_s21 = scalar_lea.hbm %s3121_s1, 49152 }
 0x18f   :  { %808 = sst [smem:[#allocation16 + $0x1]] %s2735_s29  ;;  %v531_v45 = vld [vmem:[#allocation2 + $0x508] sm:$0xff]  ;;  %626 = vmatprep.subr.bf16.mxu0 %v499_v44  ;;  %v530_v47 = vld [vmem:[#allocation2 + $0x500] sm:$0xff]  ;;  %v501_v48 = vld [vmem:[#allocation2 + $0x418] sm:$0xff]  ;;  %s2750_s23 = smov [#allocation15]  }
 0x190   :  { %810 = sst [smem:[#allocation16 + $0x2]] %s2736_s30  ;;  %667 = vmatprep.subr.bf16.mxu1 %v531_v45  ;;  %v533_v49 = vld [vmem:[#allocation2 + $0x518] sm:$0xff]  ;;  %627 = vmatpush1.bf16.msra.mxu0 %v498_v46  ;;  %v500_v50 = vld [vmem:[#allocation2 + $0x410] sm:$0xff]  ;;  %v503_v52 = vld [vmem:[#allocation2 + $0x428] sm:$0xff] }
 0x191   :  { %812 = sst [smem:[#allocation16 + $0x3]] %s2737_s5  ;;  %668 = vmatpush1.bf16.msra.mxu1 %v530_v47  ;;  %628 = vmatprep.subr.bf16.mxu0 %v501_v48  ;;  %v532_v51 = vld [vmem:[#allocation2 + $0x510] sm:$0xff]  ;;  %v535_v53 = vld [vmem:[#allocation2 + $0x528] sm:$0xff]  ;;  %v502_v54 = vld [vmem:[#allocation2 + $0x420] sm:$0xff] }
 0x192   :  { %814 = sst [smem:[#allocation16 + $0x4]] %s2738_s6  ;;  %669 = vmatprep.subr.bf16.mxu1 %v533_v49  ;;  %v534_v55 = vld [vmem:[#allocation2 + $0x520] sm:$0xff]  ;;  %v505_v56 = vld [vmem:[#allocation2 + $0x438] sm:$0xff]  ;;  %v504_v58 = vld [vmem:[#allocation2 + $0x430] sm:$0xff] }
 0x193   :  { %816 = sst [smem:[#allocation16 + $0x5]] %s2736_s30  ;;  %v537_v57 = vld [vmem:[#allocation2 + $0x538] sm:$0xff]  ;;  %v536_v59 = vld [vmem:[#allocation2 + $0x530] sm:$0xff]  ;;  %v507_v60 = vld [vmem:[#allocation2 + $0x448] sm:$0xff] }
 0x194   :  { %818 = sst [smem:[#allocation16 + $0x6]] %s2738_s6  ;;  %629 = vmatpush1.bf16.msra.mxu0 %v500_v50  ;;  %v539_v61 = vld [vmem:[#allocation2 + $0x548] sm:$0xff]  ;;  %v506_v62 = vld [vmem:[#allocation2 + $0x440] sm:$0xff]  ;;  %v509_v6 = vld [vmem:[#allocation2 + $0x458] sm:$0xff] }
 0x195   :  { %820 = sst [smem:[#allocation16 + $0x7]] %s2737_s5  ;;  %670 = vmatpush1.bf16.msra.mxu1 %v532_v51  ;;  %630 = vmatprep.subr.bf16.mxu0 %v503_v52  ;;  %v538_v63 = vld [vmem:[#allocation2 + $0x540] sm:$0xff]  ;;  %v541_v7 = vld [vmem:[#allocation2 + $0x558] sm:$0xff]  ;;  %v508_v8 = vld [vmem:[#allocation2 + $0x450] sm:$0xff] }
 0x196   :  { %822 = sst [smem:[#allocation16 + $0x8]] %s2740_s10  ;;  %671 = vmatprep.subr.bf16.mxu1 %v535_v53  ;;  %v540_v9 = vld [vmem:[#allocation2 + $0x550] sm:$0xff]  ;;  %v511_v10 = vld [vmem:[#allocation2 + $0x468] sm:$0xff]  ;;  %v510_v12 = vld [vmem:[#allocation2 + $0x460] sm:$0xff] }
 0x197   :  { %v543_v11 = vld [vmem:[#allocation2 + $0x568] sm:$0xff]  ;;  %v542_v13 = vld [vmem:[#allocation2 + $0x560] sm:$0xff]  ;;  %v513_v16 = vld [vmem:[#allocation2 + $0x478] sm:$0xff] }
 0x198   :  { %631 = vmatpush1.bf16.msra.mxu0 %v502_v54  ;;  %v545_v17 = vld [vmem:[#allocation2 + $0x578] sm:$0xff]  ;;  %v512_v18 = vld [vmem:[#allocation2 + $0x470] sm:$0xff]  ;;  %v515_v1 = vld [vmem:[#allocation2 + $0x488] sm:$0xff] }
 0x199   :  { %672 = vmatpush1.bf16.msra.mxu1 %v534_v55  ;;  %632 = vmatprep.subr.bf16.mxu0 %v505_v56  ;;  %v544_v19 = vld [vmem:[#allocation2 + $0x570] sm:$0xff]  ;;  %v547_v21 = vld [vmem:[#allocation2 + $0x588] sm:$0xff]  ;;  %v514_v24 = vld [vmem:[#allocation2 + $0x480] sm:$0xff] }
 0x19a   :  { %673 = vmatprep.subr.bf16.mxu1 %v537_v57  ;;  %v546_v2 = vld [vmem:[#allocation2 + $0x580] sm:$0xff]  ;;  %v517_v25 = vld [vmem:[#allocation2 + $0x498] sm:$0xff]  ;;  %v516_v27 = vld [vmem:[#allocation2 + $0x490] sm:$0xff] }
 0x19b   :  { %v549_v26 = vld [vmem:[#allocation2 + $0x598] sm:$0xff]  ;;  %v548_v3 = vld [vmem:[#allocation2 + $0x590] sm:$0xff]  ;;  %v519_v28 = vld [vmem:[#allocation2 + $0x4a8] sm:$0xff] }
 0x19c   :  { %633 = vmatpush1.bf16.msra.mxu0 %v504_v58  ;;  %v551_v29 = vld [vmem:[#allocation2 + $0x5a8] sm:$0xff]  ;;  %v518_v30 = vld [vmem:[#allocation2 + $0x4a0] sm:$0xff]  ;;  %v521_v32 = vld [vmem:[#allocation2 + $0x4b8] sm:$0xff] }
 0x19d   :  { %674 = vmatpush1.bf16.msra.mxu1 %v536_v59  ;;  %634 = vmatprep.subr.bf16.mxu0 %v507_v60  ;;  %v550_v31 = vld [vmem:[#allocation2 + $0x5a0] sm:$0xff]  ;;  %v553_v33 = vld [vmem:[#allocation2 + $0x5b8] sm:$0xff]  ;;  %v520_v34 = vld [vmem:[#allocation2 + $0x4b0] sm:$0xff] }
 0x19e   :  { %675 = vmatprep.subr.bf16.mxu1 %v539_v61  ;;  %v552_v35 = vld [vmem:[#allocation2 + $0x5b0] sm:$0xff]  ;;  %v523_v36 = vld [vmem:[#allocation2 + $0x4c8] sm:$0xff]  ;;  %v522_v38 = vld [vmem:[#allocation2 + $0x4c0] sm:$0xff] }
 0x19f   :  { %v555_v37 = vld [vmem:[#allocation2 + $0x5c8] sm:$0xff]  ;;  %v554_v39 = vld [vmem:[#allocation2 + $0x5c0] sm:$0xff]  ;;  %v525_v41 = vld [vmem:[#allocation2 + $0x4d8] sm:$0xff] }
 0x1a0   :  { %635 = vmatpush1.bf16.msra.mxu0 %v506_v62  ;;  %v557_v42 = vld [vmem:[#allocation2 + $0x5d8] sm:$0xff]  ;;  %v524_v44 = vld [vmem:[#allocation2 + $0x4d0] sm:$0xff]  ;;  %v527_v46 = vld [vmem:[#allocation2 + $0x4e8] sm:$0xff] }
 0x1a1   :  { %676 = vmatpush1.bf16.msra.mxu1 %v538_v63  ;;  %636 = vmatprep.subr.bf16.mxu0 %v509_v6  ;;  %v556_v45 = vld [vmem:[#allocation2 + $0x5d0] sm:$0xff]  ;;  %v559_v47 = vld [vmem:[#allocation2 + $0x5e8] sm:$0xff]  ;;  %v526_v48 = vld [vmem:[#allocation2 + $0x4e0] sm:$0xff] }
 0x1a2   :  { %677 = vmatprep.subr.bf16.mxu1 %v541_v7  ;;  %v558_v49 = vld [vmem:[#allocation2 + $0x5e0] sm:$0xff]  ;;  %v529_v50 = vld [vmem:[#allocation2 + $0x4f8] sm:$0xff]  ;;  %v528_v52 = vld [vmem:[#allocation2 + $0x4f0] sm:$0xff] }
 0x1a3   :  { %v561_v51 = vld [vmem:[#allocation2 + $0x5f8] sm:$0xff]  ;;  %v560_v53 = vld [vmem:[#allocation2 + $0x5f0] sm:$0xff]  ;;  %v563_v54 = vld [vmem:[#allocation2 + $0x608] sm:$0xff] }
 0x1a4   :  { %637 = vmatpush1.bf16.msra.mxu0 %v508_v8  ;;  %v595_v55 = vld [vmem:[#allocation2 + $0x708] sm:$0xff]  ;;  %v562_v56 = vld [vmem:[#allocation2 + $0x600] sm:$0xff]  ;;  %v565_v58 = vld [vmem:[#allocation2 + $0x618] sm:$0xff] }
 0x1a5   :  { %678 = vmatpush1.bf16.msra.mxu1 %v540_v9  ;;  %638 = vmatprep.subr.bf16.mxu0 %v511_v10  ;;  %v594_v57 = vld [vmem:[#allocation2 + $0x700] sm:$0xff]  ;;  %v597_v59 = vld [vmem:[#allocation2 + $0x718] sm:$0xff]  ;;  %v564_v60 = vld [vmem:[#allocation2 + $0x610] sm:$0xff] }
 0x1a6   :  { %679 = vmatprep.subr.bf16.mxu1 %v543_v11  ;;  %v596_v61 = vld [vmem:[#allocation2 + $0x710] sm:$0xff]  ;;  %v567_v62 = vld [vmem:[#allocation2 + $0x628] sm:$0xff]  ;;  %v566_v6 = vld [vmem:[#allocation2 + $0x620] sm:$0xff] }
 0x1a7   :  { %v599_v63 = vld [vmem:[#allocation2 + $0x728] sm:$0xff]  ;;  %v598_v7 = vld [vmem:[#allocation2 + $0x720] sm:$0xff]  ;;  %v569_v8 = vld [vmem:[#allocation2 + $0x638] sm:$0xff] }
 0x1a8   :  { %639 = vmatpush1.bf16.msra.mxu0 %v510_v12  ;;  %v601_v9 = vld [vmem:[#allocation2 + $0x738] sm:$0xff]  ;;  %v568_v10 = vld [vmem:[#allocation2 + $0x630] sm:$0xff]  ;;  %v571_v12 = vld [vmem:[#allocation2 + $0x648] sm:$0xff] }
 0x1a9   :  { %680 = vmatpush1.bf16.msra.mxu1 %v542_v13  ;;  %640 = vmatprep.subr.bf16.mxu0 %v513_v16  ;;  %v600_v11 = vld [vmem:[#allocation2 + $0x730] sm:$0xff]  ;;  %v603_v13 = vld [vmem:[#allocation2 + $0x748] sm:$0xff]  ;;  %v570_v16 = vld [vmem:[#allocation2 + $0x640] sm:$0xff] }
 0x1aa   :  { %681 = vmatprep.subr.bf16.mxu1 %v545_v17  ;;  %v602_v17 = vld [vmem:[#allocation2 + $0x740] sm:$0xff] }
 0x1ac   :  { %641 = vmatpush1.bf16.msra.mxu0 %v512_v18  ;;  %v573_v18 = vld [vmem:[#allocation2 + $0x658] sm:$0xff] }
 0x1ad   :  { %682 = vmatpush1.bf16.msra.mxu1 %v544_v19  ;;  %642 = vmatprep.subr.bf16.mxu0 %v515_v1  ;;  %v605_v19 = vld [vmem:[#allocation2 + $0x758] sm:$0xff]  ;;  %v572_v1 = vld [vmem:[#allocation2 + $0x650] sm:$0xff] }
 0x1ae   :  { %683 = vmatprep.subr.bf16.mxu1 %v547_v21  ;;  %v604_v21 = vld [vmem:[#allocation2 + $0x750] sm:$0xff] }
 0x1b0   :  { %643 = vmatpush1.bf16.msra.mxu0 %v514_v24  ;;  %v575_v24 = vld [vmem:[#allocation2 + $0x668] sm:$0xff] }
 0x1b1   :  { %684 = vmatpush1.bf16.msra.mxu1 %v546_v2  ;;  %644 = vmatprep.subr.bf16.mxu0 %v517_v25  ;;  %v607_v2 = vld [vmem:[#allocation2 + $0x768] sm:$0xff]  ;;  %v574_v25 = vld [vmem:[#allocation2 + $0x660] sm:$0xff] }
 0x1b2   :  { %685 = vmatprep.subr.bf16.mxu1 %v549_v26  ;;  %v606_v26 = vld [vmem:[#allocation2 + $0x760] sm:$0xff] }
 0x1b4   :  { %645 = vmatpush1.bf16.msra.mxu0 %v516_v27  ;;  %v577_v27 = vld [vmem:[#allocation2 + $0x678] sm:$0xff] }
 0x1b5   :  { %686 = vmatpush1.bf16.msra.mxu1 %v548_v3  ;;  %646 = vmatprep.subr.bf16.mxu0 %v519_v28  ;;  %v609_v3 = vld [vmem:[#allocation2 + $0x778] sm:$0xff]  ;;  %v576_v28 = vld [vmem:[#allocation2 + $0x670] sm:$0xff] }
 0x1b6   :  { %687 = vmatprep.subr.bf16.mxu1 %v551_v29  ;;  %v608_v29 = vld [vmem:[#allocation2 + $0x770] sm:$0xff] }
 0x1b8   :  { %647 = vmatpush1.bf16.msra.mxu0 %v518_v30  ;;  %v579_v30 = vld [vmem:[#allocation2 + $0x688] sm:$0xff] }
 0x1b9   :  { %688 = vmatpush1.bf16.msra.mxu1 %v550_v31  ;;  %648 = vmatprep.subr.bf16.mxu0 %v521_v32  ;;  %v611_v31 = vld [vmem:[#allocation2 + $0x788] sm:$0xff]  ;;  %v578_v32 = vld [vmem:[#allocation2 + $0x680] sm:$0xff] }
 0x1ba   :  { %689 = vmatprep.subr.bf16.mxu1 %v553_v33  ;;  %v610_v33 = vld [vmem:[#allocation2 + $0x780] sm:$0xff] }
 0x1bc   :  { %649 = vmatpush1.bf16.msra.mxu0 %v520_v34  ;;  %v581_v34 = vld [vmem:[#allocation2 + $0x698] sm:$0xff] }
 0x1bd   :  { %690 = vmatpush1.bf16.msra.mxu1 %v552_v35  ;;  %650 = vmatprep.subr.bf16.mxu0 %v523_v36  ;;  %v613_v35 = vld [vmem:[#allocation2 + $0x798] sm:$0xff]  ;;  %v580_v36 = vld [vmem:[#allocation2 + $0x690] sm:$0xff] }
 0x1be   :  { %691 = vmatprep.subr.bf16.mxu1 %v555_v37  ;;  %v612_v37 = vld [vmem:[#allocation2 + $0x790] sm:$0xff] }
 0x1c0   :  { %651 = vmatpush1.bf16.msra.mxu0 %v522_v38  ;;  %v583_v38 = vld [vmem:[#allocation2 + $0x6a8] sm:$0xff] }
 0x1c1   :  { %692 = vmatpush1.bf16.msra.mxu1 %v554_v39  ;;  %652 = vmatprep.subr.bf16.mxu0 %v525_v41  ;;  %v615_v39 = vld [vmem:[#allocation2 + $0x7a8] sm:$0xff]  ;;  %v582_v41 = vld [vmem:[#allocation2 + $0x6a0] sm:$0xff] }
 0x1c2   :  { %693 = vmatprep.subr.bf16.mxu1 %v557_v42  ;;  %v614_v42 = vld [vmem:[#allocation2 + $0x7a0] sm:$0xff] }
 0x1c4   :  { %653 = vmatpush1.bf16.msra.mxu0 %v524_v44  ;;  %v585_v44 = vld [vmem:[#allocation2 + $0x6b8] sm:$0xff] }
 0x1c5   :  { %694 = vmatpush1.bf16.msra.mxu1 %v556_v45  ;;  %654 = vmatprep.subr.bf16.mxu0 %v527_v46  ;;  %v617_v45 = vld [vmem:[#allocation2 + $0x7b8] sm:$0xff]  ;;  %v584_v46 = vld [vmem:[#allocation2 + $0x6b0] sm:$0xff] }
 0x1c6   :  { %695 = vmatprep.subr.bf16.mxu1 %v559_v47  ;;  %v616_v47 = vld [vmem:[#allocation2 + $0x7b0] sm:$0xff] }
 0x1c8   :  { %655 = vmatpush1.bf16.msra.mxu0 %v526_v48  ;;  %v587_v48 = vld [vmem:[#allocation2 + $0x6c8] sm:$0xff] }
 0x1c9   :  { %696 = vmatpush1.bf16.msra.mxu1 %v558_v49  ;;  %656 = vmatprep.subr.bf16.mxu0 %v529_v50  ;;  %v619_v49 = vld [vmem:[#allocation2 + $0x7c8] sm:$0xff]  ;;  %v586_v50 = vld [vmem:[#allocation2 + $0x6c0] sm:$0xff] }
 0x1ca   :  { %697 = vmatprep.subr.bf16.mxu1 %v561_v51  ;;  %v618_v51 = vld [vmem:[#allocation2 + $0x7c0] sm:$0xff] }
 0x1cc   :  { %657 = vmatpush1.bf16.msra.mxu0 %v528_v52  ;;  %v589_v52 = vld [vmem:[#allocation2 + $0x6d8] sm:$0xff] }
 0x1cd   :  { %698 = vmatpush1.bf16.msra.mxu1 %v560_v53  ;;  %708 = vmatprep.subr.bf16.mxu0 %v563_v54  ;;  %v621_v53 = vld [vmem:[#allocation2 + $0x7d8] sm:$0xff]  ;;  %v588_v54 = vld [vmem:[#allocation2 + $0x6d0] sm:$0xff] }
 0x1ce   :  { %749 = vmatprep.subr.bf16.mxu1 %v595_v55  ;;  %v620_v55 = vld [vmem:[#allocation2 + $0x7d0] sm:$0xff] }
 0x1cf   :  { %659 = vmatmul.mubr.bf16.vlgmr.msra.gmra.mrb[8].mxu0 %v2882_v14 }
 0x1d0   :  { %700 = vmatmul.mubr.bf16.vlgmr.msra.gmra.mrb[8].mxu1 %v2886_v15  ;;  %709 = vmatpush1.bf16.msra.mxu0 %v562_v56  ;;  %v591_v56 = vld [vmem:[#allocation2 + $0x6e8] sm:$0xff] }
 0x1d1   :  { %750 = vmatpush1.bf16.msra.mxu1 %v594_v57  ;;  %710 = vmatprep.subr.bf16.mxu0 %v565_v58  ;;  %v623_v57 = vld [vmem:[#allocation2 + $0x7e8] sm:$0xff]  ;;  %v590_v58 = vld [vmem:[#allocation2 + $0x6e0] sm:$0xff] }
 0x1d2   :  { %751 = vmatprep.subr.bf16.mxu1 %v597_v59  ;;  %740 = vmatprep.mubr.bf16.mxu0 %v2890_v20  ;;  %v622_v59 = vld [vmem:[#allocation2 + $0x7e0] sm:$0xff] }
 0x1d3   :  { %781 = vmatprep.mubr.bf16.mxu1 %v2894_v0 }
 0x1d4   :  { %711 = vmatpush1.bf16.msra.mxu0 %v564_v60  ;;  %v593_v60 = vld [vmem:[#allocation2 + $0x6f8] sm:$0xff] }
 0x1d5   :  { %752 = vmatpush1.bf16.msra.mxu1 %v596_v61  ;;  %712 = vmatprep.subr.bf16.mxu0 %v567_v62  ;;  %v625_v61 = vld [vmem:[#allocation2 + $0x7f8] sm:$0xff]  ;;  %v592_v62 = vld [vmem:[#allocation2 + $0x6f0] sm:$0xff] }
 0x1d6   :  { %753 = vmatprep.subr.bf16.mxu1 %v599_v63  ;;  %v624_v63 = vld [vmem:[#allocation2 + $0x7f0] sm:$0xff] }
 0x1d7   :  { %824 = dma.general %s790_s21, 16384, %s2832_s22, %s2747_s14, %s2750_s23, [#allocation16], %s2801_s9, 0  }
 0x1d8   :  { %713 = vmatpush1.bf16.msra.mxu0 %v566_v6 }
 0x1d9   :  { %754 = vmatpush1.bf16.msra.mxu1 %v598_v7  ;;  %714 = vmatprep.subr.bf16.mxu0 %v569_v8 }
 0x1da   :  { %755 = vmatprep.subr.bf16.mxu1 %v601_v9 }
 0x1dc   :  { %715 = vmatpush1.bf16.msra.mxu0 %v568_v10 }
 0x1dd   :  { %756 = vmatpush1.bf16.msra.mxu1 %v600_v11  ;;  %716 = vmatprep.subr.bf16.mxu0 %v571_v12 }
 0x1de   :  { %757 = vmatprep.subr.bf16.mxu1 %v603_v13 }
 0x1e0   :  { %717 = vmatpush1.bf16.msra.mxu0 %v570_v16 }
 0x1e1   :  { %758 = vmatpush1.bf16.msra.mxu1 %v602_v17  ;;  %718 = vmatprep.subr.bf16.mxu0 %v573_v18 }
 0x1e2   :  { %759 = vmatprep.subr.bf16.mxu1 %v605_v19 }
 0x1e4   :  { %719 = vmatpush1.bf16.msra.mxu0 %v572_v1 }
 0x1e5   :  { %760 = vmatpush1.bf16.msra.mxu1 %v604_v21  ;;  %720 = vmatprep.subr.bf16.mxu0 %v575_v24 }
 0x1e6   :  { %761 = vmatprep.subr.bf16.mxu1 %v607_v2 }
 0x1e8   :  { %721 = vmatpush1.bf16.msra.mxu0 %v574_v25 }
 0x1e9   :  { %762 = vmatpush1.bf16.msra.mxu1 %v606_v26  ;;  %722 = vmatprep.subr.bf16.mxu0 %v577_v27 }
 0x1ea   :  { %763 = vmatprep.subr.bf16.mxu1 %v609_v3 }
 0x1ec   :  { %723 = vmatpush1.bf16.msra.mxu0 %v576_v28 }
 0x1ed   :  { %764 = vmatpush1.bf16.msra.mxu1 %v608_v29  ;;  %724 = vmatprep.subr.bf16.mxu0 %v579_v30 }
 0x1ee   :  { %765 = vmatprep.subr.bf16.mxu1 %v611_v31 }
 0x1f0   :  { %725 = vmatpush1.bf16.msra.mxu0 %v578_v32 }
 0x1f1   :  { %766 = vmatpush1.bf16.msra.mxu1 %v610_v33  ;;  %726 = vmatprep.subr.bf16.mxu0 %v581_v34 }
 0x1f2   :  { %767 = vmatprep.subr.bf16.mxu1 %v613_v35 }
 0x1f4   :  { %727 = vmatpush1.bf16.msra.mxu0 %v580_v36 }
 0x1f5   :  { %768 = vmatpush1.bf16.msra.mxu1 %v612_v37  ;;  %728 = vmatprep.subr.bf16.mxu0 %v583_v38 }
 0x1f6   :  { %769 = vmatprep.subr.bf16.mxu1 %v615_v39 }
 0x1f8   :  { %729 = vmatpush1.bf16.msra.mxu0 %v582_v41 }
 0x1f9   :  { %770 = vmatpush1.bf16.msra.mxu1 %v614_v42  ;;  %730 = vmatprep.subr.bf16.mxu0 %v585_v44 }
 0x1fa   :  { %771 = vmatprep.subr.bf16.mxu1 %v617_v45 }
 0x1fc   :  { %731 = vmatpush1.bf16.msra.mxu0 %v584_v46 }
 0x1fd   :  { %772 = vmatpush1.bf16.msra.mxu1 %v616_v47  ;;  %732 = vmatprep.subr.bf16.mxu0 %v587_v48 }
 0x1fe   :  { %773 = vmatprep.subr.bf16.mxu1 %v619_v49 }
 0x200   :  { %733 = vmatpush1.bf16.msra.mxu0 %v586_v50 }
 0x201   :  { %774 = vmatpush1.bf16.msra.mxu1 %v618_v51  ;;  %734 = vmatprep.subr.bf16.mxu0 %v589_v52 }
 0x202   :  { %775 = vmatprep.subr.bf16.mxu1 %v621_v53 }
 0x204   :  { %735 = vmatpush1.bf16.msra.mxu0 %v588_v54 }
 0x205   :  { %776 = vmatpush1.bf16.msra.mxu1 %v620_v55  ;;  %736 = vmatprep.subr.bf16.mxu0 %v591_v56 }
 0x206   :  { %777 = vmatprep.subr.bf16.mxu1 %v623_v57 }
 0x208   :  { %737 = vmatpush1.bf16.msra.mxu0 %v590_v58 }
 0x209   :  { %778 = vmatpush1.bf16.msra.mxu1 %v622_v59  ;;  %738 = vmatprep.subr.bf16.mxu0 %v593_v60 }
 0x20a   :  { %779 = vmatprep.subr.bf16.mxu1 %v625_v61 }
 0x20c   :  { %739 = vmatpush1.bf16.msra.mxu0 %v592_v62 }
 0x20d   :  { %780 = vmatpush1.bf16.msra.mxu1 %v624_v63 }
 0x20f   :  { %741 = vmatmul.mubr.bf16.vlgmr.msra.gmra.mrb[12].mxu0 %v2902_v22 }
 0x210   :  { %782 = vmatmul.mubr.bf16.vlgmr.msra.gmra.mrb[12].mxu1 %v2906_v23 }
 0x2a2   :  { %v660_v6 = vpop.f32.mrb[8].mxu0 }
 0x2a3   :  { %v701_v7 = vpop.f32.mrb[8].mxu1  ;;  %v662_v9 = vpop.f32.mrb[9].mxu0 }
 0x2a4   :  { %v702_v8 = vadd.f32 %v701_v7, %v660_v6  ;;  %v703_v10 = vpop.f32.mrb[9].mxu1  ;;  %v664_v12 = vpop.f32.mrb[10].mxu0 }
 0x2a5   :  { %v704_v11 = vadd.f32 %v703_v10, %v662_v9  ;;  %v705_v13 = vpop.f32.mrb[10].mxu1  ;;  %v665_v16 = vpop.f32.mrb[11].mxu0 }
 0x2a6   :  { %v706_v17 = vpop.f32.mrb[11].mxu1 }
 0x2e2   :  { %v742_v18 = vpop.f32.mrb[12].mxu0 }
 0x2e3   :  { %v783_v19 = vpop.f32.mrb[12].mxu1  ;;  %v743_v1 = vadd.f32 %v742_v18, %v702_v8  ;;  %v744_v21 = vpop.f32.mrb[13].mxu0 }
 0x2e4   :  { %v785_v24 = vpop.f32.mrb[13].mxu1  ;;  %v745_v2 = vadd.f32 %v744_v21, %v704_v11  ;;  %v746_v25 = vpop.f32.mrb[14].mxu0 }
 0x2e5   :  { %v787_v26 = vpop.f32.mrb[14].mxu1  ;;  %v2943_v27 = vadd.f32 %v783_v19, %v743_v1  ;;  %v747_v3 = vpop.f32.mrb[15].mxu0 }
 0x2e6   :  { %v788_v28 = vpop.f32.mrb[15].mxu1  ;;  %v2945_v29 = vadd.f32 %v785_v24, %v745_v2 }
 0x2e7   :  { %2724 = dma.done.wait [#allocation4], 16384 }
 0x2e8   :  { %2725 = vsyncadd [#allocation4], 4294950912  ;;  %987 = vmatprep.mubr.bf16.mxu0 %v2863_v4  ;;  %1028 = vmatprep.mubr.bf16.mxu1 %v2867_v5  ;;  %1135 = sst [smem:[#allocation18]] %s2735_s29  ;;  %v828_v30 = vld [vmem:[#allocation2 + $0x8] sm:$0xff]  ;;  %v827_v32 = vld [vmem:[#allocation2] sm:$0xff]  ;;  %s1119_s2 = scalar_lea.hbm %s3121_s1, 65536 }
 0x2e9   :  { %1137 = sst [smem:[#allocation18 + $0x1]] %s2735_s29  ;;  %v860_v31 = vld [vmem:[#allocation2 + $0x108] sm:$0xff]  ;;  %955 = vmatprep.subr.bf16.mxu0 %v828_v30  ;;  %v859_v33 = vld [vmem:[#allocation2 + $0x100] sm:$0xff]  ;;  %v830_v34 = vld [vmem:[#allocation2 + $0x18] sm:$0xff]  ;;  %s2751_s26 = smov [#allocation17]  }
 0x2ea   :  { %1139 = sst [smem:[#allocation18 + $0x2]] %s2736_s30  ;;  %996 = vmatprep.subr.bf16.mxu1 %v860_v31  ;;  %v862_v35 = vld [vmem:[#allocation2 + $0x118] sm:$0xff]  ;;  %956 = vmatpush1.bf16.msra.mxu0 %v827_v32  ;;  %v829_v36 = vld [vmem:[#allocation2 + $0x10] sm:$0xff]  ;;  %v832_v38 = vld [vmem:[#allocation2 + $0x28] sm:$0xff] }
 0x2eb   :  { %1141 = sst [smem:[#allocation18 + $0x3]] %s2737_s5  ;;  %997 = vmatpush1.bf16.msra.mxu1 %v859_v33  ;;  %957 = vmatprep.subr.bf16.mxu0 %v830_v34  ;;  %v861_v37 = vld [vmem:[#allocation2 + $0x110] sm:$0xff]  ;;  %v864_v39 = vld [vmem:[#allocation2 + $0x128] sm:$0xff]  ;;  %v831_v41 = vld [vmem:[#allocation2 + $0x20] sm:$0xff] }
 0x2ec   :  { %1143 = sst [smem:[#allocation18 + $0x4]] %s2738_s6  ;;  %998 = vmatprep.subr.bf16.mxu1 %v862_v35  ;;  %v863_v42 = vld [vmem:[#allocation2 + $0x120] sm:$0xff]  ;;  %v834_v44 = vld [vmem:[#allocation2 + $0x38] sm:$0xff]  ;;  %v833_v46 = vld [vmem:[#allocation2 + $0x30] sm:$0xff] }
 0x2ed   :  { %1145 = sst [smem:[#allocation18 + $0x5]] %s2736_s30  ;;  %v866_v45 = vld [vmem:[#allocation2 + $0x138] sm:$0xff]  ;;  %v865_v47 = vld [vmem:[#allocation2 + $0x130] sm:$0xff]  ;;  %v836_v48 = vld [vmem:[#allocation2 + $0x48] sm:$0xff] }
 0x2ee   :  { %1147 = sst [smem:[#allocation18 + $0x6]] %s2738_s6  ;;  %958 = vmatpush1.bf16.msra.mxu0 %v829_v36  ;;  %v868_v49 = vld [vmem:[#allocation2 + $0x148] sm:$0xff]  ;;  %v835_v50 = vld [vmem:[#allocation2 + $0x40] sm:$0xff]  ;;  %v838_v52 = vld [vmem:[#allocation2 + $0x58] sm:$0xff] }
 0x2ef   :  { %1149 = sst [smem:[#allocation18 + $0x7]] %s2737_s5  ;;  %999 = vmatpush1.bf16.msra.mxu1 %v861_v37  ;;  %959 = vmatprep.subr.bf16.mxu0 %v832_v38  ;;  %v867_v51 = vld [vmem:[#allocation2 + $0x140] sm:$0xff]  ;;  %v870_v53 = vld [vmem:[#allocation2 + $0x158] sm:$0xff]  ;;  %v837_v54 = vld [vmem:[#allocation2 + $0x50] sm:$0xff] }
 0x2f0   :  { %1151 = sst [smem:[#allocation18 + $0x8]] %s2740_s10  ;;  %1000 = vmatprep.subr.bf16.mxu1 %v864_v39  ;;  %v869_v55 = vld [vmem:[#allocation2 + $0x150] sm:$0xff]  ;;  %v840_v56 = vld [vmem:[#allocation2 + $0x68] sm:$0xff]  ;;  %v839_v58 = vld [vmem:[#allocation2 + $0x60] sm:$0xff] }
 0x2f1   :  { %v872_v57 = vld [vmem:[#allocation2 + $0x168] sm:$0xff]  ;;  %v871_v59 = vld [vmem:[#allocation2 + $0x160] sm:$0xff]  ;;  %v842_v60 = vld [vmem:[#allocation2 + $0x78] sm:$0xff] }
 0x2f2   :  { %960 = vmatpush1.bf16.msra.mxu0 %v831_v41  ;;  %v874_v61 = vld [vmem:[#allocation2 + $0x178] sm:$0xff]  ;;  %v841_v62 = vld [vmem:[#allocation2 + $0x70] sm:$0xff]  ;;  %v844_v6 = vld [vmem:[#allocation2 + $0x88] sm:$0xff] }
 0x2f3   :  { %1001 = vmatpush1.bf16.msra.mxu1 %v863_v42  ;;  %961 = vmatprep.subr.bf16.mxu0 %v834_v44  ;;  %v873_v63 = vld [vmem:[#allocation2 + $0x170] sm:$0xff]  ;;  %v876_v7 = vld [vmem:[#allocation2 + $0x188] sm:$0xff]  ;;  %v843_v8 = vld [vmem:[#allocation2 + $0x80] sm:$0xff] }
 0x2f4   :  { %1002 = vmatprep.subr.bf16.mxu1 %v866_v45  ;;  %v875_v9 = vld [vmem:[#allocation2 + $0x180] sm:$0xff]  ;;  %v846_v10 = vld [vmem:[#allocation2 + $0x98] sm:$0xff]  ;;  %v845_v12 = vld [vmem:[#allocation2 + $0x90] sm:$0xff] }
 0x2f5   :  { %v878_v11 = vld [vmem:[#allocation2 + $0x198] sm:$0xff]  ;;  %v877_v13 = vld [vmem:[#allocation2 + $0x190] sm:$0xff]  ;;  %v848_v16 = vld [vmem:[#allocation2 + $0xa8] sm:$0xff] }
 0x2f6   :  { %962 = vmatpush1.bf16.msra.mxu0 %v833_v46  ;;  %v880_v17 = vld [vmem:[#allocation2 + $0x1a8] sm:$0xff]  ;;  %v847_v18 = vld [vmem:[#allocation2 + $0xa0] sm:$0xff]  ;;  %v850_v1 = vld [vmem:[#allocation2 + $0xb8] sm:$0xff] }
 0x2f7   :  { %1003 = vmatpush1.bf16.msra.mxu1 %v865_v47  ;;  %963 = vmatprep.subr.bf16.mxu0 %v836_v48  ;;  %v879_v19 = vld [vmem:[#allocation2 + $0x1a0] sm:$0xff]  ;;  %v882_v21 = vld [vmem:[#allocation2 + $0x1b8] sm:$0xff]  ;;  %v849_v24 = vld [vmem:[#allocation2 + $0xb0] sm:$0xff] }
 0x2f8   :  { %1004 = vmatprep.subr.bf16.mxu1 %v868_v49  ;;  %v881_v2 = vld [vmem:[#allocation2 + $0x1b0] sm:$0xff]  ;;  %v852_v25 = vld [vmem:[#allocation2 + $0xc8] sm:$0xff]  ;;  %v851_v3 = vld [vmem:[#allocation2 + $0xc0] sm:$0xff] }
 0x2f9   :  { %v884_v26 = vld [vmem:[#allocation2 + $0x1c8] sm:$0xff]  ;;  %v883_v28 = vld [vmem:[#allocation2 + $0x1c0] sm:$0xff]  ;;  %v854_v30 = vld [vmem:[#allocation2 + $0xd8] sm:$0xff] }
 0x2fa   :  { %964 = vmatpush1.bf16.msra.mxu0 %v835_v50  ;;  %v886_v31 = vld [vmem:[#allocation2 + $0x1d8] sm:$0xff]  ;;  %v853_v32 = vld [vmem:[#allocation2 + $0xd0] sm:$0xff]  ;;  %v856_v34 = vld [vmem:[#allocation2 + $0xe8] sm:$0xff] }
 0x2fb   :  { %1005 = vmatpush1.bf16.msra.mxu1 %v867_v51  ;;  %965 = vmatprep.subr.bf16.mxu0 %v838_v52  ;;  %v885_v33 = vld [vmem:[#allocation2 + $0x1d0] sm:$0xff]  ;;  %v888_v35 = vld [vmem:[#allocation2 + $0x1e8] sm:$0xff]  ;;  %v855_v36 = vld [vmem:[#allocation2 + $0xe0] sm:$0xff] }
 0x2fc   :  { %1006 = vmatprep.subr.bf16.mxu1 %v870_v53  ;;  %v887_v37 = vld [vmem:[#allocation2 + $0x1e0] sm:$0xff]  ;;  %v858_v38 = vld [vmem:[#allocation2 + $0xf8] sm:$0xff]  ;;  %v857_v41 = vld [vmem:[#allocation2 + $0xf0] sm:$0xff] }
 0x2fd   :  { %v890_v39 = vld [vmem:[#allocation2 + $0x1f8] sm:$0xff]  ;;  %v889_v42 = vld [vmem:[#allocation2 + $0x1f0] sm:$0xff]  ;;  %v892_v44 = vld [vmem:[#allocation2 + $0x208] sm:$0xff] }
 0x2fe   :  { %966 = vmatpush1.bf16.msra.mxu0 %v837_v54  ;;  %v924_v45 = vld [vmem:[#allocation2 + $0x308] sm:$0xff]  ;;  %v891_v46 = vld [vmem:[#allocation2 + $0x200] sm:$0xff]  ;;  %v894_v48 = vld [vmem:[#allocation2 + $0x218] sm:$0xff] }
 0x2ff   :  { %1007 = vmatpush1.bf16.msra.mxu1 %v869_v55  ;;  %967 = vmatprep.subr.bf16.mxu0 %v840_v56  ;;  %v923_v47 = vld [vmem:[#allocation2 + $0x300] sm:$0xff]  ;;  %v926_v49 = vld [vmem:[#allocation2 + $0x318] sm:$0xff]  ;;  %v893_v50 = vld [vmem:[#allocation2 + $0x210] sm:$0xff] }
 0x300   :  { %1008 = vmatprep.subr.bf16.mxu1 %v872_v57  ;;  %v925_v51 = vld [vmem:[#allocation2 + $0x310] sm:$0xff]  ;;  %v896_v52 = vld [vmem:[#allocation2 + $0x228] sm:$0xff]  ;;  %v895_v54 = vld [vmem:[#allocation2 + $0x220] sm:$0xff] }
 0x301   :  { %v928_v53 = vld [vmem:[#allocation2 + $0x328] sm:$0xff]  ;;  %v927_v55 = vld [vmem:[#allocation2 + $0x320] sm:$0xff]  ;;  %v898_v56 = vld [vmem:[#allocation2 + $0x238] sm:$0xff] }
 0x302   :  { %968 = vmatpush1.bf16.msra.mxu0 %v839_v58  ;;  %v930_v57 = vld [vmem:[#allocation2 + $0x338] sm:$0xff]  ;;  %v897_v58 = vld [vmem:[#allocation2 + $0x230] sm:$0xff] }
 0x303   :  { %1009 = vmatpush1.bf16.msra.mxu1 %v871_v59  ;;  %969 = vmatprep.subr.bf16.mxu0 %v842_v60  ;;  %v929_v59 = vld [vmem:[#allocation2 + $0x330] sm:$0xff]  ;;  %v900_v60 = vld [vmem:[#allocation2 + $0x248] sm:$0xff] }
 0x304   :  { %1010 = vmatprep.subr.bf16.mxu1 %v874_v61  ;;  %v932_v61 = vld [vmem:[#allocation2 + $0x348] sm:$0xff] }
 0x306   :  { %970 = vmatpush1.bf16.msra.mxu0 %v841_v62  ;;  %v899_v62 = vld [vmem:[#allocation2 + $0x240] sm:$0xff] }
 0x307   :  { %1011 = vmatpush1.bf16.msra.mxu1 %v873_v63  ;;  %971 = vmatprep.subr.bf16.mxu0 %v844_v6  ;;  %v931_v63 = vld [vmem:[#allocation2 + $0x340] sm:$0xff]  ;;  %v902_v6 = vld [vmem:[#allocation2 + $0x258] sm:$0xff] }
 0x308   :  { %1012 = vmatprep.subr.bf16.mxu1 %v876_v7  ;;  %v934_v7 = vld [vmem:[#allocation2 + $0x358] sm:$0xff] }
 0x30a   :  { %972 = vmatpush1.bf16.msra.mxu0 %v843_v8  ;;  %v901_v8 = vld [vmem:[#allocation2 + $0x250] sm:$0xff] }
 0x30b   :  { %1013 = vmatpush1.bf16.msra.mxu1 %v875_v9  ;;  %973 = vmatprep.subr.bf16.mxu0 %v846_v10  ;;  %v933_v9 = vld [vmem:[#allocation2 + $0x350] sm:$0xff]  ;;  %v904_v10 = vld [vmem:[#allocation2 + $0x268] sm:$0xff] }
 0x30c   :  { %1014 = vmatprep.subr.bf16.mxu1 %v878_v11  ;;  %v936_v11 = vld [vmem:[#allocation2 + $0x368] sm:$0xff] }
 0x30e   :  { %974 = vmatpush1.bf16.msra.mxu0 %v845_v12  ;;  %v903_v12 = vld [vmem:[#allocation2 + $0x260] sm:$0xff] }
 0x30f   :  { %1015 = vmatpush1.bf16.msra.mxu1 %v877_v13  ;;  %975 = vmatprep.subr.bf16.mxu0 %v848_v16  ;;  %v935_v13 = vld [vmem:[#allocation2 + $0x360] sm:$0xff]  ;;  %v906_v16 = vld [vmem:[#allocation2 + $0x278] sm:$0xff] }
 0x310   :  { %1016 = vmatprep.subr.bf16.mxu1 %v880_v17  ;;  %v938_v17 = vld [vmem:[#allocation2 + $0x378] sm:$0xff] }
 0x312   :  { %976 = vmatpush1.bf16.msra.mxu0 %v847_v18  ;;  %v905_v18 = vld [vmem:[#allocation2 + $0x270] sm:$0xff] }
 0x313   :  { %1017 = vmatpush1.bf16.msra.mxu1 %v879_v19  ;;  %977 = vmatprep.subr.bf16.mxu0 %v850_v1  ;;  %v937_v19 = vld [vmem:[#allocation2 + $0x370] sm:$0xff]  ;;  %v908_v1 = vld [vmem:[#allocation2 + $0x288] sm:$0xff] }
 0x314   :  { %1018 = vmatprep.subr.bf16.mxu1 %v882_v21  ;;  %v940_v21 = vld [vmem:[#allocation2 + $0x388] sm:$0xff] }
 0x316   :  { %978 = vmatpush1.bf16.msra.mxu0 %v849_v24  ;;  %v907_v24 = vld [vmem:[#allocation2 + $0x280] sm:$0xff] }
 0x317   :  { %1019 = vmatpush1.bf16.msra.mxu1 %v881_v2  ;;  %979 = vmatprep.subr.bf16.mxu0 %v852_v25  ;;  %v939_v2 = vld [vmem:[#allocation2 + $0x380] sm:$0xff]  ;;  %v910_v25 = vld [vmem:[#allocation2 + $0x298] sm:$0xff] }
 0x318   :  { %1020 = vmatprep.subr.bf16.mxu1 %v884_v26  ;;  %v942_v26 = vld [vmem:[#allocation2 + $0x398] sm:$0xff] }
 0x31a   :  { %980 = vmatpush1.bf16.msra.mxu0 %v851_v3  ;;  %v909_v3 = vld [vmem:[#allocation2 + $0x290] sm:$0xff] }
 0x31b   :  { %1021 = vmatpush1.bf16.msra.mxu1 %v883_v28  ;;  %981 = vmatprep.subr.bf16.mxu0 %v854_v30  ;;  %v941_v28 = vld [vmem:[#allocation2 + $0x390] sm:$0xff]  ;;  %v912_v30 = vld [vmem:[#allocation2 + $0x2a8] sm:$0xff] }
 0x31c   :  { %1022 = vmatprep.subr.bf16.mxu1 %v886_v31  ;;  %v944_v31 = vld [vmem:[#allocation2 + $0x3a8] sm:$0xff] }
 0x31e   :  { %982 = vmatpush1.bf16.msra.mxu0 %v853_v32  ;;  %v911_v32 = vld [vmem:[#allocation2 + $0x2a0] sm:$0xff] }
 0x31f   :  { %1023 = vmatpush1.bf16.msra.mxu1 %v885_v33  ;;  %983 = vmatprep.subr.bf16.mxu0 %v856_v34  ;;  %v943_v33 = vld [vmem:[#allocation2 + $0x3a0] sm:$0xff]  ;;  %v914_v34 = vld [vmem:[#allocation2 + $0x2b8] sm:$0xff] }
 0x320   :  { %1024 = vmatprep.subr.bf16.mxu1 %v888_v35  ;;  %v946_v35 = vld [vmem:[#allocation2 + $0x3b8] sm:$0xff] }
 0x322   :  { %984 = vmatpush1.bf16.msra.mxu0 %v855_v36  ;;  %v913_v36 = vld [vmem:[#allocation2 + $0x2b0] sm:$0xff] }
 0x323   :  { %1025 = vmatpush1.bf16.msra.mxu1 %v887_v37  ;;  %985 = vmatprep.subr.bf16.mxu0 %v858_v38  ;;  %v945_v37 = vld [vmem:[#allocation2 + $0x3b0] sm:$0xff]  ;;  %v916_v38 = vld [vmem:[#allocation2 + $0x2c8] sm:$0xff] }
 0x324   :  { %1026 = vmatprep.subr.bf16.mxu1 %v890_v39  ;;  %v948_v39 = vld [vmem:[#allocation2 + $0x3c8] sm:$0xff] }
 0x326   :  { %986 = vmatpush1.bf16.msra.mxu0 %v857_v41  ;;  %v915_v41 = vld [vmem:[#allocation2 + $0x2c0] sm:$0xff] }
 0x327   :  { %1027 = vmatpush1.bf16.msra.mxu1 %v889_v42  ;;  %1037 = vmatprep.subr.bf16.mxu0 %v892_v44  ;;  %v947_v42 = vld [vmem:[#allocation2 + $0x3c0] sm:$0xff]  ;;  %v918_v44 = vld [vmem:[#allocation2 + $0x2d8] sm:$0xff] }
 0x328   :  { %1078 = vmatprep.subr.bf16.mxu1 %v924_v45  ;;  %v950_v45 = vld [vmem:[#allocation2 + $0x3d8] sm:$0xff] }
 0x329   :  { %988 = vmatmul.mubr.bf16.vlgmr.msra.gmra.mrb[16].mxu0 %v2882_v14 }
 0x32a   :  { %1029 = vmatmul.mubr.bf16.vlgmr.msra.gmra.mrb[16].mxu1 %v2886_v15  ;;  %1038 = vmatpush1.bf16.msra.mxu0 %v891_v46  ;;  %v917_v46 = vld [vmem:[#allocation2 + $0x2d0] sm:$0xff] }
 0x32b   :  { %1079 = vmatpush1.bf16.msra.mxu1 %v923_v47  ;;  %1039 = vmatprep.subr.bf16.mxu0 %v894_v48  ;;  %v949_v47 = vld [vmem:[#allocation2 + $0x3d0] sm:$0xff]  ;;  %v920_v48 = vld [vmem:[#allocation2 + $0x2e8] sm:$0xff] }
 0x32c   :  { %1080 = vmatprep.subr.bf16.mxu1 %v926_v49  ;;  %1069 = vmatprep.mubr.bf16.mxu0 %v2890_v20  ;;  %v952_v49 = vld [vmem:[#allocation2 + $0x3e8] sm:$0xff] }
 0x32d   :  { %1110 = vmatprep.mubr.bf16.mxu1 %v2894_v0 }
 0x32e   :  { %1040 = vmatpush1.bf16.msra.mxu0 %v893_v50  ;;  %v919_v50 = vld [vmem:[#allocation2 + $0x2e0] sm:$0xff] }
 0x32f   :  { %1081 = vmatpush1.bf16.msra.mxu1 %v925_v51  ;;  %1041 = vmatprep.subr.bf16.mxu0 %v896_v52  ;;  %v951_v51 = vld [vmem:[#allocation2 + $0x3e0] sm:$0xff]  ;;  %v922_v52 = vld [vmem:[#allocation2 + $0x2f8] sm:$0xff] }
 0x330   :  { %1082 = vmatprep.subr.bf16.mxu1 %v928_v53  ;;  %v954_v53 = vld [vmem:[#allocation2 + $0x3f8] sm:$0xff] }
 0x332   :  { %1042 = vmatpush1.bf16.msra.mxu0 %v895_v54  ;;  %v921_v54 = vld [vmem:[#allocation2 + $0x2f0] sm:$0xff] }
 0x333   :  { %1083 = vmatpush1.bf16.msra.mxu1 %v927_v55  ;;  %1043 = vmatprep.subr.bf16.mxu0 %v898_v56  ;;  %v953_v55 = vld [vmem:[#allocation2 + $0x3f0] sm:$0xff] }
 0x334   :  { %1084 = vmatprep.subr.bf16.mxu1 %v930_v57  ;;  %1153 = dma.general %s1119_s2, 16384, %s2798_s8, %s2741_s11, %s2751_s26, [#allocation18], %s2801_s9, 0  }
 0x336   :  { %1044 = vmatpush1.bf16.msra.mxu0 %v897_v58 }
 0x337   :  { %1085 = vmatpush1.bf16.msra.mxu1 %v929_v59  ;;  %1045 = vmatprep.subr.bf16.mxu0 %v900_v60 }
 0x338   :  { %1086 = vmatprep.subr.bf16.mxu1 %v932_v61 }
 0x33a   :  { %1046 = vmatpush1.bf16.msra.mxu0 %v899_v62 }
 0x33b   :  { %1087 = vmatpush1.bf16.msra.mxu1 %v931_v63  ;;  %1047 = vmatprep.subr.bf16.mxu0 %v902_v6 }
 0x33c   :  { %1088 = vmatprep.subr.bf16.mxu1 %v934_v7 }
 0x33e   :  { %1048 = vmatpush1.bf16.msra.mxu0 %v901_v8 }
 0x33f   :  { %1089 = vmatpush1.bf16.msra.mxu1 %v933_v9  ;;  %1049 = vmatprep.subr.bf16.mxu0 %v904_v10 }
 0x340   :  { %1090 = vmatprep.subr.bf16.mxu1 %v936_v11 }
 0x342   :  { %1050 = vmatpush1.bf16.msra.mxu0 %v903_v12 }
 0x343   :  { %1091 = vmatpush1.bf16.msra.mxu1 %v935_v13  ;;  %1051 = vmatprep.subr.bf16.mxu0 %v906_v16 }
 0x344   :  { %1092 = vmatprep.subr.bf16.mxu1 %v938_v17 }
 0x346   :  { %1052 = vmatpush1.bf16.msra.mxu0 %v905_v18 }
 0x347   :  { %1093 = vmatpush1.bf16.msra.mxu1 %v937_v19  ;;  %1053 = vmatprep.subr.bf16.mxu0 %v908_v1 }
 0x348   :  { %1094 = vmatprep.subr.bf16.mxu1 %v940_v21 }
 0x34a   :  { %1054 = vmatpush1.bf16.msra.mxu0 %v907_v24 }
 0x34b   :  { %1095 = vmatpush1.bf16.msra.mxu1 %v939_v2  ;;  %1055 = vmatprep.subr.bf16.mxu0 %v910_v25 }
 0x34c   :  { %1096 = vmatprep.subr.bf16.mxu1 %v942_v26 }
 0x34e   :  { %1056 = vmatpush1.bf16.msra.mxu0 %v909_v3 }
 0x34f   :  { %1097 = vmatpush1.bf16.msra.mxu1 %v941_v28  ;;  %1057 = vmatprep.subr.bf16.mxu0 %v912_v30 }
 0x350   :  { %1098 = vmatprep.subr.bf16.mxu1 %v944_v31 }
 0x352   :  { %1058 = vmatpush1.bf16.msra.mxu0 %v911_v32 }
 0x353   :  { %1099 = vmatpush1.bf16.msra.mxu1 %v943_v33  ;;  %1059 = vmatprep.subr.bf16.mxu0 %v914_v34 }
 0x354   :  { %1100 = vmatprep.subr.bf16.mxu1 %v946_v35 }
 0x356   :  { %1060 = vmatpush1.bf16.msra.mxu0 %v913_v36 }
 0x357   :  { %1101 = vmatpush1.bf16.msra.mxu1 %v945_v37  ;;  %1061 = vmatprep.subr.bf16.mxu0 %v916_v38 }
 0x358   :  { %1102 = vmatprep.subr.bf16.mxu1 %v948_v39 }
 0x35a   :  { %1062 = vmatpush1.bf16.msra.mxu0 %v915_v41 }
 0x35b   :  { %1103 = vmatpush1.bf16.msra.mxu1 %v947_v42  ;;  %1063 = vmatprep.subr.bf16.mxu0 %v918_v44 }
 0x35c   :  { %1104 = vmatprep.subr.bf16.mxu1 %v950_v45 }
 0x35e   :  { %1064 = vmatpush1.bf16.msra.mxu0 %v917_v46 }
 0x35f   :  { %1105 = vmatpush1.bf16.msra.mxu1 %v949_v47  ;;  %1065 = vmatprep.subr.bf16.mxu0 %v920_v48 }
 0x360   :  { %1106 = vmatprep.subr.bf16.mxu1 %v952_v49 }
 0x362   :  { %1066 = vmatpush1.bf16.msra.mxu0 %v919_v50 }
 0x363   :  { %1107 = vmatpush1.bf16.msra.mxu1 %v951_v51  ;;  %1067 = vmatprep.subr.bf16.mxu0 %v922_v52 }
 0x364   :  { %1108 = vmatprep.subr.bf16.mxu1 %v954_v53 }
 0x366   :  { %1068 = vmatpush1.bf16.msra.mxu0 %v921_v54 }
 0x367   :  { %1109 = vmatpush1.bf16.msra.mxu1 %v953_v55 }
 0x369   :  { %1070 = vmatmul.mubr.bf16.vlgmr.msra.gmra.mrb[20].mxu0 %v2902_v22 }
 0x36a   :  { %1111 = vmatmul.mubr.bf16.vlgmr.msra.gmra.mrb[20].mxu1 %v2906_v23 }
 0x3fc   :  { %v989_v56 = vpop.f32.mrb[16].mxu0 }
 0x3fd   :  { %v1030_v57 = vpop.f32.mrb[16].mxu1  ;;  %v991_v59 = vpop.f32.mrb[17].mxu0 }
 0x3fe   :  { %v1031_v58 = vadd.f32 %v1030_v57, %v989_v56  ;;  %v1032_v60 = vpop.f32.mrb[17].mxu1  ;;  %v993_v62 = vpop.f32.mrb[18].mxu0 }
 0x3ff   :  { %v1033_v61 = vadd.f32 %v1032_v60, %v991_v59  ;;  %v1034_v63 = vpop.f32.mrb[18].mxu1  ;;  %v994_v6 = vpop.f32.mrb[19].mxu0 }
 0x400   :  { %v1035_v7 = vpop.f32.mrb[19].mxu1 }
 0x43c   :  { %v1071_v8 = vpop.f32.mrb[20].mxu0 }
 0x43d   :  { %v1112_v9 = vpop.f32.mrb[20].mxu1  ;;  %v1072_v10 = vadd.f32 %v1071_v8, %v1031_v58  ;;  %v1073_v11 = vpop.f32.mrb[21].mxu0 }
 0x43e   :  { %v1114_v12 = vpop.f32.mrb[21].mxu1  ;;  %v1074_v13 = vadd.f32 %v1073_v11, %v1033_v61  ;;  %v1075_v16 = vpop.f32.mrb[22].mxu0 }
 0x43f   :  { %v1116_v17 = vpop.f32.mrb[22].mxu1  ;;  %v2970_v18 = vadd.f32 %v1112_v9, %v1072_v10  ;;  %v1076_v19 = vpop.f32.mrb[23].mxu0 }
 0x440   :  { %v1117_v1 = vpop.f32.mrb[23].mxu1  ;;  %v2972_v21 = vadd.f32 %v1114_v12, %v1074_v13 }
 0x441   :  { %2726 = dma.done.wait [#allocation4 + $0x1], 16384 }
 0x442   :  { %2727 = vsyncadd [#allocation4 + $0x1], 4294950912  ;;  %1316 = vmatprep.mubr.bf16.mxu0 %v2863_v4  ;;  %1357 = vmatprep.mubr.bf16.mxu1 %v2867_v5  ;;  %1546 = sst [smem:[#allocation20]] %s2735_s29  ;;  %v1157_v24 = vld [vmem:[#allocation2 + $0x408] sm:$0xff]  ;;  %v1156_v25 = vld [vmem:[#allocation2 + $0x400] sm:$0xff] }
 0x443   :  { %1548 = sst [smem:[#allocation20 + $0x1]] %s2735_s29  ;;  %v1189_v2 = vld [vmem:[#allocation2 + $0x508] sm:$0xff]  ;;  %1284 = vmatprep.subr.bf16.mxu0 %v1157_v24  ;;  %v1188_v4 = vld [vmem:[#allocation2 + $0x500] sm:$0xff]  ;;  %v1159_v5 = vld [vmem:[#allocation2 + $0x418] sm:$0xff] }
 0x444   :  { %1550 = sst [smem:[#allocation20 + $0x2]] %s2736_s30  ;;  %1325 = vmatprep.subr.bf16.mxu1 %v1189_v2  ;;  %v1191_v26 = vld [vmem:[#allocation2 + $0x518] sm:$0xff]  ;;  %1285 = vmatpush1.bf16.msra.mxu0 %v1156_v25  ;;  %v1158_v3 = vld [vmem:[#allocation2 + $0x410] sm:$0xff]  ;;  %v1161_v30 = vld [vmem:[#allocation2 + $0x428] sm:$0xff] }
 0x445   :  { %1552 = sst [smem:[#allocation20 + $0x3]] %s2737_s5  ;;  %1326 = vmatpush1.bf16.msra.mxu1 %v1188_v4  ;;  %1286 = vmatprep.subr.bf16.mxu0 %v1159_v5  ;;  %v1190_v28 = vld [vmem:[#allocation2 + $0x510] sm:$0xff]  ;;  %v1193_v31 = vld [vmem:[#allocation2 + $0x528] sm:$0xff]  ;;  %v1160_v32 = vld [vmem:[#allocation2 + $0x420] sm:$0xff] }
 0x446   :  { %1554 = sst [smem:[#allocation20 + $0x4]] %s2738_s6  ;;  %1327 = vmatprep.subr.bf16.mxu1 %v1191_v26  ;;  %v1192_v33 = vld [vmem:[#allocation2 + $0x520] sm:$0xff]  ;;  %v1163_v34 = vld [vmem:[#allocation2 + $0x438] sm:$0xff]  ;;  %v1162_v36 = vld [vmem:[#allocation2 + $0x430] sm:$0xff] }
 0x447   :  { %1556 = sst [smem:[#allocation20 + $0x5]] %s2736_s30  ;;  %v1195_v35 = vld [vmem:[#allocation2 + $0x538] sm:$0xff]  ;;  %v1194_v37 = vld [vmem:[#allocation2 + $0x530] sm:$0xff]  ;;  %v1165_v38 = vld [vmem:[#allocation2 + $0x448] sm:$0xff] }
 0x448   :  { %1558 = sst [smem:[#allocation20 + $0x6]] %s2738_s6  ;;  %1287 = vmatpush1.bf16.msra.mxu0 %v1158_v3  ;;  %v1197_v39 = vld [vmem:[#allocation2 + $0x548] sm:$0xff]  ;;  %v1164_v41 = vld [vmem:[#allocation2 + $0x440] sm:$0xff]  ;;  %v1167_v44 = vld [vmem:[#allocation2 + $0x458] sm:$0xff]  ;;  %s2752_s6 = smov [#allocation19]  }
 0x449   :  { %1560 = sst [smem:[#allocation20 + $0x7]] %s2737_s5  ;;  %1328 = vmatpush1.bf16.msra.mxu1 %v1190_v28  ;;  %1288 = vmatprep.subr.bf16.mxu0 %v1161_v30  ;;  %v1196_v42 = vld [vmem:[#allocation2 + $0x540] sm:$0xff]  ;;  %v1199_v45 = vld [vmem:[#allocation2 + $0x558] sm:$0xff]  ;;  %v1166_v46 = vld [vmem:[#allocation2 + $0x450] sm:$0xff]  ;;  %s1530_s5 = scalar_lea.hbm %s3121_s1, 81920 }
 0x44a   :  { %1562 = sst [smem:[#allocation20 + $0x8]] %s2740_s10  ;;  %1329 = vmatprep.subr.bf16.mxu1 %v1193_v31  ;;  %v1198_v47 = vld [vmem:[#allocation2 + $0x550] sm:$0xff]  ;;  %v1169_v48 = vld [vmem:[#allocation2 + $0x468] sm:$0xff]  ;;  %v1168_v50 = vld [vmem:[#allocation2 + $0x460] sm:$0xff] }
 0x44b   :  { %v1201_v49 = vld [vmem:[#allocation2 + $0x568] sm:$0xff]  ;;  %v1200_v51 = vld [vmem:[#allocation2 + $0x560] sm:$0xff]  ;;  %v1171_v52 = vld [vmem:[#allocation2 + $0x478] sm:$0xff] }
 0x44c   :  { %1289 = vmatpush1.bf16.msra.mxu0 %v1160_v32  ;;  %v1203_v53 = vld [vmem:[#allocation2 + $0x578] sm:$0xff]  ;;  %v1170_v54 = vld [vmem:[#allocation2 + $0x470] sm:$0xff]  ;;  %v1173_v56 = vld [vmem:[#allocation2 + $0x488] sm:$0xff] }
 0x44d   :  { %1330 = vmatpush1.bf16.msra.mxu1 %v1192_v33  ;;  %1290 = vmatprep.subr.bf16.mxu0 %v1163_v34  ;;  %v1202_v55 = vld [vmem:[#allocation2 + $0x570] sm:$0xff]  ;;  %v1205_v57 = vld [vmem:[#allocation2 + $0x588] sm:$0xff]  ;;  %v1172_v58 = vld [vmem:[#allocation2 + $0x480] sm:$0xff] }
 0x44e   :  { %1331 = vmatprep.subr.bf16.mxu1 %v1195_v35  ;;  %v1204_v59 = vld [vmem:[#allocation2 + $0x580] sm:$0xff]  ;;  %v1175_v60 = vld [vmem:[#allocation2 + $0x498] sm:$0xff]  ;;  %v1174_v62 = vld [vmem:[#allocation2 + $0x490] sm:$0xff] }
 0x44f   :  { %v1207_v61 = vld [vmem:[#allocation2 + $0x598] sm:$0xff]  ;;  %v1206_v63 = vld [vmem:[#allocation2 + $0x590] sm:$0xff]  ;;  %v1177_v6 = vld [vmem:[#allocation2 + $0x4a8] sm:$0xff] }
 0x450   :  { %1291 = vmatpush1.bf16.msra.mxu0 %v1162_v36  ;;  %v1209_v7 = vld [vmem:[#allocation2 + $0x5a8] sm:$0xff]  ;;  %v1176_v8 = vld [vmem:[#allocation2 + $0x4a0] sm:$0xff]  ;;  %v1179_v10 = vld [vmem:[#allocation2 + $0x4b8] sm:$0xff] }
 0x451   :  { %1332 = vmatpush1.bf16.msra.mxu1 %v1194_v37  ;;  %1292 = vmatprep.subr.bf16.mxu0 %v1165_v38  ;;  %v1208_v9 = vld [vmem:[#allocation2 + $0x5a0] sm:$0xff]  ;;  %v1211_v11 = vld [vmem:[#allocation2 + $0x5b8] sm:$0xff]  ;;  %v1178_v12 = vld [vmem:[#allocation2 + $0x4b0] sm:$0xff] }
 0x452   :  { %1333 = vmatprep.subr.bf16.mxu1 %v1197_v39  ;;  %v1210_v13 = vld [vmem:[#allocation2 + $0x5b0] sm:$0xff]  ;;  %v1181_v16 = vld [vmem:[#allocation2 + $0x4c8] sm:$0xff]  ;;  %v1180_v19 = vld [vmem:[#allocation2 + $0x4c0] sm:$0xff] }
 0x453   :  { %v1213_v17 = vld [vmem:[#allocation2 + $0x5c8] sm:$0xff]  ;;  %v1212_v1 = vld [vmem:[#allocation2 + $0x5c0] sm:$0xff]  ;;  %v1183_v24 = vld [vmem:[#allocation2 + $0x4d8] sm:$0xff] }
 0x454   :  { %1293 = vmatpush1.bf16.msra.mxu0 %v1164_v41  ;;  %v1215_v2 = vld [vmem:[#allocation2 + $0x5d8] sm:$0xff]  ;;  %v1182_v25 = vld [vmem:[#allocation2 + $0x4d0] sm:$0xff]  ;;  %v1185_v5 = vld [vmem:[#allocation2 + $0x4e8] sm:$0xff] }
 0x455   :  { %1334 = vmatpush1.bf16.msra.mxu1 %v1196_v42  ;;  %1294 = vmatprep.subr.bf16.mxu0 %v1167_v44  ;;  %v1214_v4 = vld [vmem:[#allocation2 + $0x5d0] sm:$0xff]  ;;  %v1217_v26 = vld [vmem:[#allocation2 + $0x5e8] sm:$0xff]  ;;  %v1184_v3 = vld [vmem:[#allocation2 + $0x4e0] sm:$0xff] }
 0x456   :  { %1335 = vmatprep.subr.bf16.mxu1 %v1199_v45  ;;  %v1216_v28 = vld [vmem:[#allocation2 + $0x5e0] sm:$0xff]  ;;  %v1187_v30 = vld [vmem:[#allocation2 + $0x4f8] sm:$0xff]  ;;  %v1186_v32 = vld [vmem:[#allocation2 + $0x4f0] sm:$0xff] }
 0x457   :  { %v1219_v31 = vld [vmem:[#allocation2 + $0x5f8] sm:$0xff]  ;;  %v1218_v33 = vld [vmem:[#allocation2 + $0x5f0] sm:$0xff]  ;;  %v1221_v34 = vld [vmem:[#allocation2 + $0x608] sm:$0xff] }
 0x458   :  { %1295 = vmatpush1.bf16.msra.mxu0 %v1166_v46  ;;  %v1253_v35 = vld [vmem:[#allocation2 + $0x708] sm:$0xff]  ;;  %v1220_v36 = vld [vmem:[#allocation2 + $0x600] sm:$0xff]  ;;  %v1223_v38 = vld [vmem:[#allocation2 + $0x618] sm:$0xff] }
 0x459   :  { %1336 = vmatpush1.bf16.msra.mxu1 %v1198_v47  ;;  %1296 = vmatprep.subr.bf16.mxu0 %v1169_v48  ;;  %v1252_v37 = vld [vmem:[#allocation2 + $0x700] sm:$0xff]  ;;  %v1255_v39 = vld [vmem:[#allocation2 + $0x718] sm:$0xff]  ;;  %v1222_v41 = vld [vmem:[#allocation2 + $0x610] sm:$0xff] }
 0x45a   :  { %1337 = vmatprep.subr.bf16.mxu1 %v1201_v49  ;;  %v1254_v42 = vld [vmem:[#allocation2 + $0x710] sm:$0xff]  ;;  %v1225_v44 = vld [vmem:[#allocation2 + $0x628] sm:$0xff]  ;;  %v1224_v46 = vld [vmem:[#allocation2 + $0x620] sm:$0xff] }
 0x45b   :  { %v1257_v45 = vld [vmem:[#allocation2 + $0x728] sm:$0xff]  ;;  %v1227_v47 = vld [vmem:[#allocation2 + $0x638] sm:$0xff]  ;;  %v1226_v48 = vld [vmem:[#allocation2 + $0x630] sm:$0xff] }
 0x45c   :  { %1297 = vmatpush1.bf16.msra.mxu0 %v1168_v50  ;;  %v1258_v49 = vld [vmem:[#allocation2 + $0x730] sm:$0xff]  ;;  %v1229_v50 = vld [vmem:[#allocation2 + $0x648] sm:$0xff] }
 0x45d   :  { %1338 = vmatpush1.bf16.msra.mxu1 %v1200_v51  ;;  %1298 = vmatprep.subr.bf16.mxu0 %v1171_v52  ;;  %v1261_v51 = vld [vmem:[#allocation2 + $0x748] sm:$0xff]  ;;  %v1231_v52 = vld [vmem:[#allocation2 + $0x658] sm:$0xff] }
 0x45e   :  { %1339 = vmatprep.subr.bf16.mxu1 %v1203_v53  ;;  %v1263_v53 = vld [vmem:[#allocation2 + $0x758] sm:$0xff] }
 0x460   :  { %1299 = vmatpush1.bf16.msra.mxu0 %v1170_v54  ;;  %v1230_v54 = vld [vmem:[#allocation2 + $0x650] sm:$0xff] }
 0x461   :  { %1340 = vmatpush1.bf16.msra.mxu1 %v1202_v55  ;;  %1300 = vmatprep.subr.bf16.mxu0 %v1173_v56  ;;  %v1262_v55 = vld [vmem:[#allocation2 + $0x750] sm:$0xff]  ;;  %v1233_v56 = vld [vmem:[#allocation2 + $0x668] sm:$0xff] }
 0x462   :  { %1341 = vmatprep.subr.bf16.mxu1 %v1205_v57  ;;  %v1265_v57 = vld [vmem:[#allocation2 + $0x768] sm:$0xff] }
 0x464   :  { %1301 = vmatpush1.bf16.msra.mxu0 %v1172_v58  ;;  %v1232_v58 = vld [vmem:[#allocation2 + $0x660] sm:$0xff] }
 0x465   :  { %1342 = vmatpush1.bf16.msra.mxu1 %v1204_v59  ;;  %1302 = vmatprep.subr.bf16.mxu0 %v1175_v60  ;;  %v1264_v59 = vld [vmem:[#allocation2 + $0x760] sm:$0xff]  ;;  %v1235_v60 = vld [vmem:[#allocation2 + $0x678] sm:$0xff] }
 0x466   :  { %1343 = vmatprep.subr.bf16.mxu1 %v1207_v61  ;;  %v1267_v61 = vld [vmem:[#allocation2 + $0x778] sm:$0xff] }
 0x468   :  { %1303 = vmatpush1.bf16.msra.mxu0 %v1174_v62  ;;  %v1234_v62 = vld [vmem:[#allocation2 + $0x670] sm:$0xff] }
 0x469   :  { %1344 = vmatpush1.bf16.msra.mxu1 %v1206_v63  ;;  %1304 = vmatprep.subr.bf16.mxu0 %v1177_v6  ;;  %v1266_v63 = vld [vmem:[#allocation2 + $0x770] sm:$0xff]  ;;  %v1237_v6 = vld [vmem:[#allocation2 + $0x688] sm:$0xff] }
 0x46a   :  { %1345 = vmatprep.subr.bf16.mxu1 %v1209_v7  ;;  %v1269_v7 = vld [vmem:[#allocation2 + $0x788] sm:$0xff] }
 0x46c   :  { %1305 = vmatpush1.bf16.msra.mxu0 %v1176_v8  ;;  %v1236_v8 = vld [vmem:[#allocation2 + $0x680] sm:$0xff] }
 0x46d   :  { %1346 = vmatpush1.bf16.msra.mxu1 %v1208_v9  ;;  %1306 = vmatprep.subr.bf16.mxu0 %v1179_v10  ;;  %v1268_v9 = vld [vmem:[#allocation2 + $0x780] sm:$0xff]  ;;  %v1239_v10 = vld [vmem:[#allocation2 + $0x698] sm:$0xff] }
 0x46e   :  { %1347 = vmatprep.subr.bf16.mxu1 %v1211_v11  ;;  %v1271_v11 = vld [vmem:[#allocation2 + $0x798] sm:$0xff] }
 0x470   :  { %1307 = vmatpush1.bf16.msra.mxu0 %v1178_v12  ;;  %v1238_v12 = vld [vmem:[#allocation2 + $0x690] sm:$0xff] }
 0x471   :  { %1348 = vmatpush1.bf16.msra.mxu1 %v1210_v13  ;;  %1308 = vmatprep.subr.bf16.mxu0 %v1181_v16  ;;  %v1270_v13 = vld [vmem:[#allocation2 + $0x790] sm:$0xff]  ;;  %v1241_v16 = vld [vmem:[#allocation2 + $0x6a8] sm:$0xff] }
 0x472   :  { %1349 = vmatprep.subr.bf16.mxu1 %v1213_v17  ;;  %v1273_v17 = vld [vmem:[#allocation2 + $0x7a8] sm:$0xff] }
 0x474   :  { %1309 = vmatpush1.bf16.msra.mxu0 %v1180_v19  ;;  %v1240_v19 = vld [vmem:[#allocation2 + $0x6a0] sm:$0xff] }
 0x475   :  { %1350 = vmatpush1.bf16.msra.mxu1 %v1212_v1  ;;  %1310 = vmatprep.subr.bf16.mxu0 %v1183_v24  ;;  %v1272_v1 = vld [vmem:[#allocation2 + $0x7a0] sm:$0xff]  ;;  %v1243_v24 = vld [vmem:[#allocation2 + $0x6b8] sm:$0xff] }
 0x476   :  { %1351 = vmatprep.subr.bf16.mxu1 %v1215_v2  ;;  %v1275_v2 = vld [vmem:[#allocation2 + $0x7b8] sm:$0xff] }
 0x478   :  { %1311 = vmatpush1.bf16.msra.mxu0 %v1182_v25  ;;  %v1242_v25 = vld [vmem:[#allocation2 + $0x6b0] sm:$0xff] }
 0x479   :  { %1352 = vmatpush1.bf16.msra.mxu1 %v1214_v4  ;;  %1312 = vmatprep.subr.bf16.mxu0 %v1185_v5  ;;  %v1274_v4 = vld [vmem:[#allocation2 + $0x7b0] sm:$0xff]  ;;  %v1245_v5 = vld [vmem:[#allocation2 + $0x6c8] sm:$0xff] }
 0x47a   :  { %1353 = vmatprep.subr.bf16.mxu1 %v1217_v26  ;;  %v1277_v26 = vld [vmem:[#allocation2 + $0x7c8] sm:$0xff] }
 0x47c   :  { %1313 = vmatpush1.bf16.msra.mxu0 %v1184_v3  ;;  %v1244_v3 = vld [vmem:[#allocation2 + $0x6c0] sm:$0xff] }
 0x47d   :  { %1354 = vmatpush1.bf16.msra.mxu1 %v1216_v28  ;;  %1314 = vmatprep.subr.bf16.mxu0 %v1187_v30  ;;  %v1276_v28 = vld [vmem:[#allocation2 + $0x7c0] sm:$0xff]  ;;  %v1247_v30 = vld [vmem:[#allocation2 + $0x6d8] sm:$0xff] }
 0x47e   :  { %1355 = vmatprep.subr.bf16.mxu1 %v1219_v31  ;;  %v1279_v31 = vld [vmem:[#allocation2 + $0x7d8] sm:$0xff] }
 0x480   :  { %1315 = vmatpush1.bf16.msra.mxu0 %v1186_v32  ;;  %v1246_v32 = vld [vmem:[#allocation2 + $0x6d0] sm:$0xff] }
 0x481   :  { %1356 = vmatpush1.bf16.msra.mxu1 %v1218_v33  ;;  %1366 = vmatprep.subr.bf16.mxu0 %v1221_v34  ;;  %v1278_v33 = vld [vmem:[#allocation2 + $0x7d0] sm:$0xff]  ;;  %v1249_v34 = vld [vmem:[#allocation2 + $0x6e8] sm:$0xff] }
 0x482   :  { %1407 = vmatprep.subr.bf16.mxu1 %v1253_v35  ;;  %v1281_v35 = vld [vmem:[#allocation2 + $0x7e8] sm:$0xff] }
 0x483   :  { %1317 = vmatmul.mubr.bf16.vlgmr.msra.gmra.mrb[24].mxu0 %v2882_v14  ;;  %v1256_v14 = vld [vmem:[#allocation2 + $0x720] sm:$0xff] }
 0x484   :  { %1358 = vmatmul.mubr.bf16.vlgmr.msra.gmra.mrb[24].mxu1 %v2886_v15  ;;  %1367 = vmatpush1.bf16.msra.mxu0 %v1220_v36  ;;  %v1259_v15 = vld [vmem:[#allocation2 + $0x738] sm:$0xff]  ;;  %v1248_v36 = vld [vmem:[#allocation2 + $0x6e0] sm:$0xff] }
 0x485   :  { %1408 = vmatpush1.bf16.msra.mxu1 %v1252_v37  ;;  %1368 = vmatprep.subr.bf16.mxu0 %v1223_v38  ;;  %v1280_v37 = vld [vmem:[#allocation2 + $0x7e0] sm:$0xff]  ;;  %v1251_v38 = vld [vmem:[#allocation2 + $0x6f8] sm:$0xff] }
 0x486   :  { %1409 = vmatprep.subr.bf16.mxu1 %v1255_v39  ;;  %1398 = vmatprep.mubr.bf16.mxu0 %v2890_v20  ;;  %v1228_v20 = vld [vmem:[#allocation2 + $0x640] sm:$0xff]  ;;  %v1283_v39 = vld [vmem:[#allocation2 + $0x7f8] sm:$0xff] }
 0x487   :  { %1439 = vmatprep.mubr.bf16.mxu1 %v2894_v0  ;;  %v1260_v0 = vld [vmem:[#allocation2 + $0x740] sm:$0xff] }
 0x488   :  { %1369 = vmatpush1.bf16.msra.mxu0 %v1222_v41  ;;  %v1250_v41 = vld [vmem:[#allocation2 + $0x6f0] sm:$0xff] }
 0x489   :  { %1410 = vmatpush1.bf16.msra.mxu1 %v1254_v42  ;;  %1370 = vmatprep.subr.bf16.mxu0 %v1225_v44  ;;  %v1282_v42 = vld [vmem:[#allocation2 + $0x7f0] sm:$0xff]  ;;  %v1450_v44 = vlaneseq }
 0x48a   :  { %1411 = vmatprep.subr.bf16.mxu1 %v1257_v45 }
 0x48b   :  { %v2991_v45 = vshrl.u32 %v1450_v44, 7 }
 0x48c   :  { %1371 = vmatpush1.bf16.msra.mxu0 %v1224_v46  ;;  %v2993_v46 = vld [vmem:[#allocation5] sm:$0xff] }
 0x48d   :  { %1412 = vmatpush1.bf16.msra.mxu1 %v1256_v14  ;;  %1372 = vmatprep.subr.bf16.mxu0 %v1227_v47  ;;  %v2996_v14 = vsub.s32 0, %v2991_v45  ;;  %v2999_v47 = vsub.s32 1, %v2991_v45  ;;  %1564 = dma.general %s1530_s5, 16384, %s2832_s22, %s2747_s14, %s2752_s6, [#allocation20], %s2801_s9, 0  }
 0x48e   :  { %1413 = vmatprep.subr.bf16.mxu1 %v1259_v15  ;;  %v1460_v15 = vsub.s32 2, %v2991_v45 }
 0x490   :  { %1373 = vmatpush1.bf16.msra.mxu0 %v1226_v48  ;;  %v1464_v48 = vsub.s32 3, %v2991_v45 }
 0x491   :  { %1414 = vmatpush1.bf16.msra.mxu1 %v1258_v49  ;;  %1374 = vmatprep.subr.bf16.mxu0 %v1229_v50  ;;  %v1468_v49 = vsub.s32 4, %v2991_v45  ;;  %v1457_v50 = vrot.slane %v2993_v46, %v2999_v47 }
 0x492   :  { %1415 = vmatprep.subr.bf16.mxu1 %v1261_v51  ;;  %v1461_v51 = vrot.slane %v2993_v46, %v1460_v15 }
 0x494   :  { %1375 = vmatpush1.bf16.msra.mxu0 %v1228_v20  ;;  %v1465_v20 = vrot.slane %v2993_v46, %v1464_v48 }
 0x495   :  { %1416 = vmatpush1.bf16.msra.mxu1 %v1260_v0  ;;  %1376 = vmatprep.subr.bf16.mxu0 %v1231_v52  ;;  %v1469_v0 = vrot.slane %v2993_v46, %v1468_v49 }
 0x496   :  { %1417 = vmatprep.subr.bf16.mxu1 %v1263_v53 }
 0x498   :  { %1377 = vmatpush1.bf16.msra.mxu0 %v1230_v54  ;;  %v1491_v54 = vadd.f32 %v1457_v50, %v2918_v43 }
 0x499   :  { %1418 = vmatpush1.bf16.msra.mxu1 %v1262_v55  ;;  %1378 = vmatprep.subr.bf16.mxu0 %v1233_v56  ;;  %v1492_v55 = vadd.f32 %v1461_v51, %v2943_v27  ;;  %v1493_v56 = vadd.f32 %v1465_v20, %v2945_v29 }
 0x49a   :  { %1419 = vmatprep.subr.bf16.mxu1 %v1265_v57  ;;  %v1494_v57 = vadd.f32 %v1469_v0, %v2970_v18  ;;  %vm1499_vm1 = vcmp.ge.f32.partialorder %v1491_v54, 0.0 }
 0x49b   :  { %vm1500_vm2 = vcmp.ge.f32.partialorder %v1492_v55, 0.0  ;;  %vm1501_vm3 = vcmp.ge.f32.partialorder %v1493_v56, 0.0  ;;  %v1509_v43 = vmul.f32 0.01, %v1493_v56 }
 0x49c   :  { %1379 = vmatpush1.bf16.msra.mxu0 %v1232_v58  ;;  %vm1502_vm4 = vcmp.ge.f32.partialorder %v1494_v57, 0.0 }
 0x49d   :  { %1420 = vmatpush1.bf16.msra.mxu1 %v1264_v59  ;;  %1380 = vmatprep.subr.bf16.mxu0 %v1235_v60  ;;  %v1508_v60 = vmul.f32 0.01, %v1492_v55 }
 0x49e   :  { %1421 = vmatprep.subr.bf16.mxu1 %v1267_v61  ;;  %v1510_v61 = vmul.f32 0.01, %v1494_v57 }
 0x49f   :  { %v1516_v18 = vsel %vm1500_vm2, %v1492_v55, %v1508_v60 }
 0x4a0   :  { %1381 = vmatpush1.bf16.msra.mxu0 %v1234_v62 }
 0x4a1   :  { %1422 = vmatpush1.bf16.msra.mxu1 %v1266_v63  ;;  %1382 = vmatprep.subr.bf16.mxu0 %v1237_v6  ;;  %v1518_v63 = vsel %vm1502_vm4, %v1494_v57, %v1510_v61 }
 0x4a2   :  { %1423 = vmatprep.subr.bf16.mxu1 %v1269_v7 }
 0x4a4   :  { %1383 = vmatpush1.bf16.msra.mxu0 %v1236_v8 }
 0x4a5   :  { %1424 = vmatpush1.bf16.msra.mxu1 %v1268_v9  ;;  %1384 = vmatprep.subr.bf16.mxu0 %v1239_v10  ;;  %v3034_v9 = vpack.c.bf16 %v1516_v18, %v1516_v18 }
 0x4a6   :  { %1425 = vmatprep.subr.bf16.mxu1 %v1271_v11  ;;  %v3038_v11 = vpack.c.bf16 %v1518_v63, %v1518_v63 }
 0x4a8   :  { %1385 = vmatpush1.bf16.msra.mxu0 %v1238_v12 }
 0x4a9   :  { %1426 = vmatpush1.bf16.msra.mxu1 %v1270_v13  ;;  %1386 = vmatprep.subr.bf16.mxu0 %v1241_v16 }
 0x4aa   :  { %1427 = vmatprep.subr.bf16.mxu1 %v1273_v17 }
 0x4ac   :  { %1387 = vmatpush1.bf16.msra.mxu0 %v1240_v19 }
 0x4ad   :  { %1428 = vmatpush1.bf16.msra.mxu1 %v1272_v1  ;;  %1388 = vmatprep.subr.bf16.mxu0 %v1243_v24 }
 0x4ae   :  { %1429 = vmatprep.subr.bf16.mxu1 %v1275_v2 }
 0x4b0   :  { %1389 = vmatpush1.bf16.msra.mxu0 %v1242_v25 }
 0x4b1   :  { %1430 = vmatpush1.bf16.msra.mxu1 %v1274_v4  ;;  %1390 = vmatprep.subr.bf16.mxu0 %v1245_v5 }
 0x4b2   :  { %1431 = vmatprep.subr.bf16.mxu1 %v1277_v26  ;;  %v1476_v26 = vsub.s32 6, %v2991_v45 }
 0x4b4   :  { %1391 = vmatpush1.bf16.msra.mxu0 %v1244_v3  ;;  %v1480_v3 = vsub.s32 7, %v2991_v45 }
 0x4b5   :  { %1432 = vmatpush1.bf16.msra.mxu1 %v1276_v28  ;;  %1392 = vmatprep.subr.bf16.mxu0 %v1247_v30 }
 0x4b6   :  { %1433 = vmatprep.subr.bf16.mxu1 %v1279_v31 }
 0x4b8   :  { %1393 = vmatpush1.bf16.msra.mxu0 %v1246_v32  ;;  %v1477_v32 = vrot.slane %v2993_v46, %v1476_v26 }
 0x4b9   :  { %1434 = vmatpush1.bf16.msra.mxu1 %v1278_v33  ;;  %1394 = vmatprep.subr.bf16.mxu0 %v1249_v34 }
 0x4ba   :  { %1435 = vmatprep.subr.bf16.mxu1 %v1281_v35 }
 0x4bc   :  { %1395 = vmatpush1.bf16.msra.mxu0 %v1248_v36  ;;  %v1481_v36 = vrot.slane %v2993_v46, %v1480_v3 }
 0x4bd   :  { %1436 = vmatpush1.bf16.msra.mxu1 %v1280_v37  ;;  %1396 = vmatprep.subr.bf16.mxu0 %v1251_v38 }
 0x4be   :  { %1437 = vmatprep.subr.bf16.mxu1 %v1283_v39 }
 0x4c0   :  { %1397 = vmatpush1.bf16.msra.mxu0 %v1250_v41 }
 0x4c1   :  { %1438 = vmatpush1.bf16.msra.mxu1 %v1282_v42 }
 0x4c3   :  { %1399 = vmatmul.mubr.bf16.vlgmr.msra.gmra.mrb[28].mxu0 %v2902_v22  ;;  %v1472_v22 = vsub.s32 5, %v2991_v45 }
 0x4c4   :  { %1440 = vmatmul.mubr.bf16.vlgmr.msra.gmra.mrb[28].mxu1 %v2906_v23  ;;  %v1453_v23 = vrot.slane %v2993_v46, %v2996_v14 }
 0x4c5   :  { %v1473_v52 = vrot.slane %v2993_v46, %v1472_v22 }
 0x4c6   :  { %v1490_v53 = vadd.f32 %v1453_v23, %v2916_v40  ;;  %v1507_v40 = vmul.f32 0.01, %v1491_v54 }
 0x4c7   :  { %v1495_v58 = vadd.f32 %v1473_v52, %v2972_v21  ;;  %v1517_v21 = vsel %vm1501_vm3, %v1493_v56, %v1509_v43 }
 0x4c8   :  { %vm1498_vm0 = vcmp.ge.f32.partialorder %v1490_v53, 0.0  ;;  %v1506_v59 = vmul.f32 0.01, %v1490_v53  ;;  %v1515_v29 = vsel %vm1499_vm1, %v1491_v54, %v1507_v40  ;;  %v3036_v10 = vpack.c.bf16 %v1517_v21, %v1517_v21 }
 0x4c9   :  { %vm1503_vm5 = vcmp.ge.f32.partialorder %v1495_v58, 0.0  ;;  %v1511_v27 = vmul.f32 0.01, %v1495_v58  ;;  %v3032_v8 = vpack.c.bf16 %v1515_v29, %v1515_v29 }
 0x4ca   :  { %v1514_v62 = vsel %vm1498_vm0, %v1490_v53, %v1506_v59 }
 0x4cb   :  { %v3026_v6 = vpack.c.bf16 %v1514_v62, %v1514_v62  ;;  %v1519_v7 = vsel %vm1503_vm5, %v1495_v58, %v1511_v27 }
 0x4cc   :  { %v3040_v12 = vpack.c.bf16 %v1519_v7, %v1519_v7 }
 0x556   :  { %v1318_v13 = vpop.f32.mrb[24].mxu0 }
 0x557   :  { %v1359_v16 = vpop.f32.mrb[24].mxu1  ;;  %v1320_v19 = vpop.f32.mrb[25].mxu0 }
 0x558   :  { %v1360_v17 = vadd.f32 %v1359_v16, %v1318_v13  ;;  %v1361_v1 = vpop.f32.mrb[25].mxu1  ;;  %v1322_v2 = vpop.f32.mrb[26].mxu0 }
 0x559   :  { %v1362_v24 = vadd.f32 %v1361_v1, %v1320_v19  ;;  %v1363_v25 = vpop.f32.mrb[26].mxu1  ;;  %v1323_v4 = vpop.f32.mrb[27].mxu0 }
 0x55a   :  { %v1364_v5 = vpop.f32.mrb[27].mxu1 }
 0x596   :  { %v1400_v28 = vpop.f32.mrb[28].mxu0 }
 0x597   :  { %v1441_v30 = vpop.f32.mrb[28].mxu1  ;;  %v1401_v31 = vadd.f32 %v1400_v28, %v1360_v17  ;;  %v1402_v33 = vpop.f32.mrb[29].mxu0 }
 0x598   :  { %v1443_v34 = vpop.f32.mrb[29].mxu1  ;;  %v1403_v35 = vadd.f32 %v1402_v33, %v1362_v24  ;;  %v1404_v37 = vpop.f32.mrb[30].mxu0 }
 0x599   :  { %v1445_v38 = vpop.f32.mrb[30].mxu1  ;;  %v1442_v39 = vadd.f32 %v1441_v30, %v1401_v31  ;;  %v1405_v41 = vpop.f32.mrb[31].mxu0 }
 0x59a   :  { %v1446_v42 = vpop.f32.mrb[31].mxu1  ;;  %v1444_v44 = vadd.f32 %v1443_v34, %v1403_v35 }
 0x59b   :  { %v1496_v49 = vadd.f32 %v1477_v32, %v1442_v39 }
 0x59c   :  { %v1497_v22 = vadd.f32 %v1481_v36, %v1444_v44 }
 0x59d   :  { %vm1504_vm6 = vcmp.ge.f32.partialorder %v1496_v49, 0.0  ;;  %v1512_v23 = vmul.f32 0.01, %v1496_v49 }
 0x59e   :  { %vm1505_vm7 = vcmp.ge.f32.partialorder %v1497_v22, 0.0  ;;  %v1513_v50 = vmul.f32 0.01, %v1497_v22 }
 0x59f   :  { %v1520_v51 = vsel %vm1504_vm6, %v1496_v49, %v1512_v23 }
 0x5a0   :  { %v3046_v20 = vpack.c.bf16 %v1520_v51, %v1520_v51  ;;  %v1521_v0 = vsel %vm1505_vm7, %v1497_v22, %v1513_v50 }
 0x5a1   :  { %v3048_v52 = vpack.c.bf16 %v1521_v0, %v1521_v0 }
 0x5a2   :  { %2728 = dma.done.wait [#allocation4], 16384 }
 0x5a3   :  { %2729 = vsyncadd [#allocation4], 4294950912  ;;  %1727 = vmatprep.mubr.bf16.mxu0 %v3032_v8  ;;  %1768 = vmatprep.mubr.bf16.mxu1 %v3036_v10  ;;  %v1568_v46 = vld [vmem:[#allocation2 + $0x8] sm:$0xff]  ;;  %v1567_v54 = vld [vmem:[#allocation2] sm:$0xff] }
 0x5a4   :  { %v1600_v53 = vld [vmem:[#allocation2 + $0x108] sm:$0xff]  ;;  %1695 = vmatprep.subr.bf16.mxu0 %v1568_v46  ;;  %v1599_v55 = vld [vmem:[#allocation2 + $0x100] sm:$0xff]  ;;  %v1570_v56 = vld [vmem:[#allocation2 + $0x18] sm:$0xff] }
 0x5a5   :  { %1736 = vmatprep.subr.bf16.mxu1 %v1600_v53  ;;  %v1602_v57 = vld [vmem:[#allocation2 + $0x118] sm:$0xff]  ;;  %1696 = vmatpush1.bf16.msra.mxu0 %v1567_v54  ;;  %v1569_v58 = vld [vmem:[#allocation2 + $0x10] sm:$0xff]  ;;  %v1572_v40 = vld [vmem:[#allocation2 + $0x28] sm:$0xff] }
 0x5a6   :  { %1737 = vmatpush1.bf16.msra.mxu1 %v1599_v55  ;;  %1697 = vmatprep.subr.bf16.mxu0 %v1570_v56  ;;  %v1601_v59 = vld [vmem:[#allocation2 + $0x110] sm:$0xff]  ;;  %v1604_v60 = vld [vmem:[#allocation2 + $0x128] sm:$0xff]  ;;  %v1571_v43 = vld [vmem:[#allocation2 + $0x20] sm:$0xff] }
 0x5a7   :  { %1738 = vmatprep.subr.bf16.mxu1 %v1602_v57  ;;  %v1603_v61 = vld [vmem:[#allocation2 + $0x120] sm:$0xff]  ;;  %v1574_v27 = vld [vmem:[#allocation2 + $0x38] sm:$0xff]  ;;  %v1573_v29 = vld [vmem:[#allocation2 + $0x30] sm:$0xff] }
 0x5a8   :  { %v1606_v62 = vld [vmem:[#allocation2 + $0x138] sm:$0xff]  ;;  %v1605_v18 = vld [vmem:[#allocation2 + $0x130] sm:$0xff]  ;;  %v1576_v21 = vld [vmem:[#allocation2 + $0x48] sm:$0xff] }
 0x5a9   :  { %1698 = vmatpush1.bf16.msra.mxu0 %v1569_v58  ;;  %v1608_v63 = vld [vmem:[#allocation2 + $0x148] sm:$0xff]  ;;  %v1575_v7 = vld [vmem:[#allocation2 + $0x40] sm:$0xff]  ;;  %v1578_v16 = vld [vmem:[#allocation2 + $0x58] sm:$0xff] }
 0x5aa   :  { %1739 = vmatpush1.bf16.msra.mxu1 %v1601_v59  ;;  %1699 = vmatprep.subr.bf16.mxu0 %v1572_v40  ;;  %v1607_v13 = vld [vmem:[#allocation2 + $0x140] sm:$0xff]  ;;  %v1610_v17 = vld [vmem:[#allocation2 + $0x158] sm:$0xff]  ;;  %v1577_v19 = vld [vmem:[#allocation2 + $0x50] sm:$0xff] }
 0x5ab   :  { %1740 = vmatprep.subr.bf16.mxu1 %v1604_v60  ;;  %v1609_v1 = vld [vmem:[#allocation2 + $0x150] sm:$0xff]  ;;  %v1580_v24 = vld [vmem:[#allocation2 + $0x68] sm:$0xff]  ;;  %v1579_v25 = vld [vmem:[#allocation2 + $0x60] sm:$0xff] }
 0x5ac   :  { %v1612_v2 = vld [vmem:[#allocation2 + $0x168] sm:$0xff]  ;;  %v1611_v4 = vld [vmem:[#allocation2 + $0x160] sm:$0xff]  ;;  %v1582_v5 = vld [vmem:[#allocation2 + $0x78] sm:$0xff] }
 0x5ad   :  { %1700 = vmatpush1.bf16.msra.mxu0 %v1571_v43  ;;  %v1614_v26 = vld [vmem:[#allocation2 + $0x178] sm:$0xff]  ;;  %v1581_v3 = vld [vmem:[#allocation2 + $0x70] sm:$0xff]  ;;  %v1584_v30 = vld [vmem:[#allocation2 + $0x88] sm:$0xff] }
 0x5ae   :  { %1741 = vmatpush1.bf16.msra.mxu1 %v1603_v61  ;;  %1701 = vmatprep.subr.bf16.mxu0 %v1574_v27  ;;  %v1613_v28 = vld [vmem:[#allocation2 + $0x170] sm:$0xff]  ;;  %v1616_v31 = vld [vmem:[#allocation2 + $0x188] sm:$0xff]  ;;  %v1583_v32 = vld [vmem:[#allocation2 + $0x80] sm:$0xff] }
 0x5af   :  { %1742 = vmatprep.subr.bf16.mxu1 %v1606_v62  ;;  %v1615_v33 = vld [vmem:[#allocation2 + $0x180] sm:$0xff]  ;;  %v1586_v34 = vld [vmem:[#allocation2 + $0x98] sm:$0xff]  ;;  %v1585_v36 = vld [vmem:[#allocation2 + $0x90] sm:$0xff] }
 0x5b0   :  { %v1618_v35 = vld [vmem:[#allocation2 + $0x198] sm:$0xff]  ;;  %v1617_v37 = vld [vmem:[#allocation2 + $0x190] sm:$0xff]  ;;  %v1588_v38 = vld [vmem:[#allocation2 + $0xa8] sm:$0xff] }
 0x5b1   :  { %1702 = vmatpush1.bf16.msra.mxu0 %v1573_v29  ;;  %v1620_v39 = vld [vmem:[#allocation2 + $0x1a8] sm:$0xff]  ;;  %v1587_v41 = vld [vmem:[#allocation2 + $0xa0] sm:$0xff]  ;;  %v1590_v44 = vld [vmem:[#allocation2 + $0xb8] sm:$0xff] }
 0x5b2   :  { %1743 = vmatpush1.bf16.msra.mxu1 %v1605_v18  ;;  %1703 = vmatprep.subr.bf16.mxu0 %v1576_v21  ;;  %v1619_v42 = vld [vmem:[#allocation2 + $0x1a0] sm:$0xff]  ;;  %v1622_v49 = vld [vmem:[#allocation2 + $0x1b8] sm:$0xff]  ;;  %v1589_v22 = vld [vmem:[#allocation2 + $0xb0] sm:$0xff] }
 0x5b3   :  { %1744 = vmatprep.subr.bf16.mxu1 %v1608_v63  ;;  %v1621_v23 = vld [vmem:[#allocation2 + $0x1b0] sm:$0xff]  ;;  %v1592_v50 = vld [vmem:[#allocation2 + $0xc8] sm:$0xff]  ;;  %v1591_v0 = vld [vmem:[#allocation2 + $0xc0] sm:$0xff] }
 0x5b4   :  { %v1624_v51 = vld [vmem:[#allocation2 + $0x1c8] sm:$0xff]  ;;  %v1623_v46 = vld [vmem:[#allocation2 + $0x1c0] sm:$0xff]  ;;  %v1594_v53 = vld [vmem:[#allocation2 + $0xd8] sm:$0xff] }
 0x5b5   :  { %1704 = vmatpush1.bf16.msra.mxu0 %v1575_v7  ;;  %v1626_v54 = vld [vmem:[#allocation2 + $0x1d8] sm:$0xff]  ;;  %v1593_v55 = vld [vmem:[#allocation2 + $0xd0] sm:$0xff]  ;;  %v1596_v57 = vld [vmem:[#allocation2 + $0xe8] sm:$0xff] }
 0x5b6   :  { %1745 = vmatpush1.bf16.msra.mxu1 %v1607_v13  ;;  %1705 = vmatprep.subr.bf16.mxu0 %v1578_v16  ;;  %v1625_v56 = vld [vmem:[#allocation2 + $0x1d0] sm:$0xff]  ;;  %v1628_v58 = vld [vmem:[#allocation2 + $0x1e8] sm:$0xff]  ;;  %v1595_v59 = vld [vmem:[#allocation2 + $0xe0] sm:$0xff] }
 0x5b7   :  { %1746 = vmatprep.subr.bf16.mxu1 %v1610_v17  ;;  %v1627_v40 = vld [vmem:[#allocation2 + $0x1e0] sm:$0xff]  ;;  %v1598_v60 = vld [vmem:[#allocation2 + $0xf8] sm:$0xff]  ;;  %v1597_v61 = vld [vmem:[#allocation2 + $0xf0] sm:$0xff] }
 0x5b8   :  { %v1630_v43 = vld [vmem:[#allocation2 + $0x1f8] sm:$0xff]  ;;  %v1629_v27 = vld [vmem:[#allocation2 + $0x1f0] sm:$0xff]  ;;  %v1632_v62 = vld [vmem:[#allocation2 + $0x208] sm:$0xff] }
 0x5b9   :  { %1706 = vmatpush1.bf16.msra.mxu0 %v1577_v19  ;;  %v1664_v29 = vld [vmem:[#allocation2 + $0x308] sm:$0xff]  ;;  %v1631_v18 = vld [vmem:[#allocation2 + $0x200] sm:$0xff]  ;;  %v1634_v63 = vld [vmem:[#allocation2 + $0x218] sm:$0xff] }
 0x5ba   :  { %1747 = vmatpush1.bf16.msra.mxu1 %v1609_v1  ;;  %1707 = vmatprep.subr.bf16.mxu0 %v1580_v24  ;;  %v1663_v21 = vld [vmem:[#allocation2 + $0x300] sm:$0xff]  ;;  %v1666_v7 = vld [vmem:[#allocation2 + $0x318] sm:$0xff]  ;;  %v1633_v13 = vld [vmem:[#allocation2 + $0x210] sm:$0xff] }
 0x5bb   :  { %1748 = vmatprep.subr.bf16.mxu1 %v1612_v2  ;;  %v1665_v16 = vld [vmem:[#allocation2 + $0x310] sm:$0xff]  ;;  %v1636_v17 = vld [vmem:[#allocation2 + $0x228] sm:$0xff]  ;;  %v1635_v1 = vld [vmem:[#allocation2 + $0x220] sm:$0xff] }
 0x5bc   :  { %v1668_v19 = vld [vmem:[#allocation2 + $0x328] sm:$0xff]  ;;  %v1667_v24 = vld [vmem:[#allocation2 + $0x320] sm:$0xff]  ;;  %v1638_v2 = vld [vmem:[#allocation2 + $0x238] sm:$0xff] }
 0x5bd   :  { %1708 = vmatpush1.bf16.msra.mxu0 %v1579_v25  ;;  %v1670_v25 = vld [vmem:[#allocation2 + $0x338] sm:$0xff] }
 0x5be   :  { %1749 = vmatpush1.bf16.msra.mxu1 %v1611_v4  ;;  %1709 = vmatprep.subr.bf16.mxu0 %v1582_v5  ;;  %v1637_v4 = vld [vmem:[#allocation2 + $0x230] sm:$0xff] }
 0x5bf   :  { %1750 = vmatprep.subr.bf16.mxu1 %v1614_v26  ;;  %v1669_v5 = vld [vmem:[#allocation2 + $0x330] sm:$0xff]  ;;  %v1640_v26 = vld [vmem:[#allocation2 + $0x248] sm:$0xff] }
 0x5c1   :  { %1710 = vmatpush1.bf16.msra.mxu0 %v1581_v3  ;;  %v1672_v3 = vld [vmem:[#allocation2 + $0x348] sm:$0xff] }
 0x5c2   :  { %1751 = vmatpush1.bf16.msra.mxu1 %v1613_v28  ;;  %1711 = vmatprep.subr.bf16.mxu0 %v1584_v30  ;;  %v1639_v28 = vld [vmem:[#allocation2 + $0x240] sm:$0xff] }
 0x5c3   :  { %1752 = vmatprep.subr.bf16.mxu1 %v1616_v31  ;;  %v1671_v30 = vld [vmem:[#allocation2 + $0x340] sm:$0xff]  ;;  %v1642_v31 = vld [vmem:[#allocation2 + $0x258] sm:$0xff] }
 0x5c5   :  { %1712 = vmatpush1.bf16.msra.mxu0 %v1583_v32  ;;  %v1674_v32 = vld [vmem:[#allocation2 + $0x358] sm:$0xff] }
 0x5c6   :  { %1753 = vmatpush1.bf16.msra.mxu1 %v1615_v33  ;;  %1713 = vmatprep.subr.bf16.mxu0 %v1586_v34  ;;  %v1641_v33 = vld [vmem:[#allocation2 + $0x250] sm:$0xff] }
 0x5c7   :  { %1754 = vmatprep.subr.bf16.mxu1 %v1618_v35  ;;  %v1673_v34 = vld [vmem:[#allocation2 + $0x350] sm:$0xff]  ;;  %v1644_v35 = vld [vmem:[#allocation2 + $0x268] sm:$0xff] }
 0x5c9   :  { %1714 = vmatpush1.bf16.msra.mxu0 %v1585_v36  ;;  %v1676_v36 = vld [vmem:[#allocation2 + $0x368] sm:$0xff] }
 0x5ca   :  { %1755 = vmatpush1.bf16.msra.mxu1 %v1617_v37  ;;  %1715 = vmatprep.subr.bf16.mxu0 %v1588_v38  ;;  %v1643_v37 = vld [vmem:[#allocation2 + $0x260] sm:$0xff] }
 0x5cb   :  { %1756 = vmatprep.subr.bf16.mxu1 %v1620_v39  ;;  %v1675_v38 = vld [vmem:[#allocation2 + $0x360] sm:$0xff]  ;;  %v1646_v39 = vld [vmem:[#allocation2 + $0x278] sm:$0xff] }
 0x5cd   :  { %1716 = vmatpush1.bf16.msra.mxu0 %v1587_v41  ;;  %v1678_v41 = vld [vmem:[#allocation2 + $0x378] sm:$0xff] }
 0x5ce   :  { %1757 = vmatpush1.bf16.msra.mxu1 %v1619_v42  ;;  %1717 = vmatprep.subr.bf16.mxu0 %v1590_v44  ;;  %v1645_v42 = vld [vmem:[#allocation2 + $0x270] sm:$0xff] }
 0x5cf   :  { %1758 = vmatprep.subr.bf16.mxu1 %v1622_v49  ;;  %v1677_v44 = vld [vmem:[#allocation2 + $0x370] sm:$0xff]  ;;  %v1648_v49 = vld [vmem:[#allocation2 + $0x288] sm:$0xff] }
 0x5d1   :  { %1718 = vmatpush1.bf16.msra.mxu0 %v1589_v22  ;;  %v1680_v22 = vld [vmem:[#allocation2 + $0x388] sm:$0xff] }
 0x5d2   :  { %1759 = vmatpush1.bf16.msra.mxu1 %v1621_v23  ;;  %1719 = vmatprep.subr.bf16.mxu0 %v1592_v50  ;;  %v1647_v23 = vld [vmem:[#allocation2 + $0x280] sm:$0xff] }
 0x5d3   :  { %1760 = vmatprep.subr.bf16.mxu1 %v1624_v51  ;;  %v1679_v50 = vld [vmem:[#allocation2 + $0x380] sm:$0xff]  ;;  %v1650_v51 = vld [vmem:[#allocation2 + $0x298] sm:$0xff] }
 0x5d5   :  { %1720 = vmatpush1.bf16.msra.mxu0 %v1591_v0  ;;  %v1682_v0 = vld [vmem:[#allocation2 + $0x398] sm:$0xff] }
 0x5d6   :  { %1761 = vmatpush1.bf16.msra.mxu1 %v1623_v46  ;;  %1721 = vmatprep.subr.bf16.mxu0 %v1594_v53  ;;  %v1649_v46 = vld [vmem:[#allocation2 + $0x290] sm:$0xff] }
 0x5d7   :  { %1762 = vmatprep.subr.bf16.mxu1 %v1626_v54  ;;  %v1681_v53 = vld [vmem:[#allocation2 + $0x390] sm:$0xff]  ;;  %v1652_v54 = vld [vmem:[#allocation2 + $0x2a8] sm:$0xff] }
 0x5d9   :  { %1722 = vmatpush1.bf16.msra.mxu0 %v1593_v55  ;;  %v1684_v55 = vld [vmem:[#allocation2 + $0x3a8] sm:$0xff] }
 0x5da   :  { %1763 = vmatpush1.bf16.msra.mxu1 %v1625_v56  ;;  %1723 = vmatprep.subr.bf16.mxu0 %v1596_v57  ;;  %v1651_v56 = vld [vmem:[#allocation2 + $0x2a0] sm:$0xff] }
 0x5db   :  { %1764 = vmatprep.subr.bf16.mxu1 %v1628_v58  ;;  %v1683_v57 = vld [vmem:[#allocation2 + $0x3a0] sm:$0xff]  ;;  %v1654_v58 = vld [vmem:[#allocation2 + $0x2b8] sm:$0xff] }
 0x5dd   :  { %1724 = vmatpush1.bf16.msra.mxu0 %v1595_v59  ;;  %v1686_v59 = vld [vmem:[#allocation2 + $0x3b8] sm:$0xff] }
 0x5de   :  { %1765 = vmatpush1.bf16.msra.mxu1 %v1627_v40  ;;  %1725 = vmatprep.subr.bf16.mxu0 %v1598_v60  ;;  %v1653_v40 = vld [vmem:[#allocation2 + $0x2b0] sm:$0xff] }
 0x5df   :  { %1766 = vmatprep.subr.bf16.mxu1 %v1630_v43  ;;  %v1685_v60 = vld [vmem:[#allocation2 + $0x3b0] sm:$0xff]  ;;  %v1656_v43 = vld [vmem:[#allocation2 + $0x2c8] sm:$0xff] }
 0x5e1   :  { %1726 = vmatpush1.bf16.msra.mxu0 %v1597_v61  ;;  %v1688_v61 = vld [vmem:[#allocation2 + $0x3c8] sm:$0xff] }
 0x5e2   :  { %1767 = vmatpush1.bf16.msra.mxu1 %v1629_v27  ;;  %1777 = vmatprep.subr.bf16.mxu0 %v1632_v62  ;;  %v1655_v27 = vld [vmem:[#allocation2 + $0x2c0] sm:$0xff] }
 0x5e3   :  { %1818 = vmatprep.subr.bf16.mxu1 %v1664_v29  ;;  %v1687_v62 = vld [vmem:[#allocation2 + $0x3c0] sm:$0xff]  ;;  %v1658_v29 = vld [vmem:[#allocation2 + $0x2d8] sm:$0xff] }
 0x5e4   :  { %1728 = vmatmul.mubr.bf16.vlgmr.msra.gmra.mrb[32].mxu0 %v3026_v6 }
 0x5e5   :  { %1769 = vmatmul.mubr.bf16.vlgmr.msra.gmra.mrb[32].mxu1 %v3034_v9  ;;  %1778 = vmatpush1.bf16.msra.mxu0 %v1631_v18  ;;  %v1690_v18 = vld [vmem:[#allocation2 + $0x3d8] sm:$0xff] }
 0x5e6   :  { %1819 = vmatpush1.bf16.msra.mxu1 %v1663_v21  ;;  %1779 = vmatprep.subr.bf16.mxu0 %v1634_v63  ;;  %v1657_v21 = vld [vmem:[#allocation2 + $0x2d0] sm:$0xff] }
 0x5e7   :  { %1820 = vmatprep.subr.bf16.mxu1 %v1666_v7  ;;  %1809 = vmatprep.mubr.bf16.mxu0 %v3040_v12  ;;  %v1689_v63 = vld [vmem:[#allocation2 + $0x3d0] sm:$0xff]  ;;  %v1660_v7 = vld [vmem:[#allocation2 + $0x2e8] sm:$0xff] }
 0x5e8   :  { %1850 = vmatprep.mubr.bf16.mxu1 %v3048_v52 }
 0x5e9   :  { %1780 = vmatpush1.bf16.msra.mxu0 %v1633_v13  ;;  %v1692_v13 = vld [vmem:[#allocation2 + $0x3e8] sm:$0xff] }
 0x5ea   :  { %1821 = vmatpush1.bf16.msra.mxu1 %v1665_v16  ;;  %1781 = vmatprep.subr.bf16.mxu0 %v1636_v17  ;;  %v1659_v16 = vld [vmem:[#allocation2 + $0x2e0] sm:$0xff] }
 0x5eb   :  { %1822 = vmatprep.subr.bf16.mxu1 %v1668_v19  ;;  %v1691_v17 = vld [vmem:[#allocation2 + $0x3e0] sm:$0xff]  ;;  %v1662_v19 = vld [vmem:[#allocation2 + $0x2f8] sm:$0xff] }
 0x5ed   :  { %1782 = vmatpush1.bf16.msra.mxu0 %v1635_v1  ;;  %v1694_v1 = vld [vmem:[#allocation2 + $0x3f8] sm:$0xff] }
 0x5ee   :  { %1823 = vmatpush1.bf16.msra.mxu1 %v1667_v24  ;;  %1783 = vmatprep.subr.bf16.mxu0 %v1638_v2  ;;  %v1661_v24 = vld [vmem:[#allocation2 + $0x2f0] sm:$0xff] }
 0x5ef   :  { %1824 = vmatprep.subr.bf16.mxu1 %v1670_v25  ;;  %v1693_v2 = vld [vmem:[#allocation2 + $0x3f0] sm:$0xff] }
 0x5f1   :  { %1784 = vmatpush1.bf16.msra.mxu0 %v1637_v4 }
 0x5f2   :  { %1825 = vmatpush1.bf16.msra.mxu1 %v1669_v5  ;;  %1785 = vmatprep.subr.bf16.mxu0 %v1640_v26 }
 0x5f3   :  { %1826 = vmatprep.subr.bf16.mxu1 %v1672_v3 }
 0x5f5   :  { %1786 = vmatpush1.bf16.msra.mxu0 %v1639_v28 }
 0x5f6   :  { %1827 = vmatpush1.bf16.msra.mxu1 %v1671_v30  ;;  %1787 = vmatprep.subr.bf16.mxu0 %v1642_v31 }
 0x5f7   :  { %1828 = vmatprep.subr.bf16.mxu1 %v1674_v32 }
 0x5f9   :  { %1788 = vmatpush1.bf16.msra.mxu0 %v1641_v33 }
 0x5fa   :  { %1829 = vmatpush1.bf16.msra.mxu1 %v1673_v34  ;;  %1789 = vmatprep.subr.bf16.mxu0 %v1644_v35 }
 0x5fb   :  { %1830 = vmatprep.subr.bf16.mxu1 %v1676_v36 }
 0x5fd   :  { %1790 = vmatpush1.bf16.msra.mxu0 %v1643_v37 }
 0x5fe   :  { %1831 = vmatpush1.bf16.msra.mxu1 %v1675_v38  ;;  %1791 = vmatprep.subr.bf16.mxu0 %v1646_v39 }
 0x5ff   :  { %1832 = vmatprep.subr.bf16.mxu1 %v1678_v41 }
 0x601   :  { %1792 = vmatpush1.bf16.msra.mxu0 %v1645_v42 }
 0x602   :  { %1833 = vmatpush1.bf16.msra.mxu1 %v1677_v44  ;;  %1793 = vmatprep.subr.bf16.mxu0 %v1648_v49 }
 0x603   :  { %1834 = vmatprep.subr.bf16.mxu1 %v1680_v22 }
 0x605   :  { %1794 = vmatpush1.bf16.msra.mxu0 %v1647_v23 }
 0x606   :  { %1835 = vmatpush1.bf16.msra.mxu1 %v1679_v50  ;;  %1795 = vmatprep.subr.bf16.mxu0 %v1650_v51 }
 0x607   :  { %1836 = vmatprep.subr.bf16.mxu1 %v1682_v0 }
 0x609   :  { %1796 = vmatpush1.bf16.msra.mxu0 %v1649_v46 }
 0x60a   :  { %1837 = vmatpush1.bf16.msra.mxu1 %v1681_v53  ;;  %1797 = vmatprep.subr.bf16.mxu0 %v1652_v54 }
 0x60b   :  { %1838 = vmatprep.subr.bf16.mxu1 %v1684_v55 }
 0x60d   :  { %1798 = vmatpush1.bf16.msra.mxu0 %v1651_v56 }
 0x60e   :  { %1839 = vmatpush1.bf16.msra.mxu1 %v1683_v57  ;;  %1799 = vmatprep.subr.bf16.mxu0 %v1654_v58 }
 0x60f   :  { %1840 = vmatprep.subr.bf16.mxu1 %v1686_v59 }
 0x611   :  { %1800 = vmatpush1.bf16.msra.mxu0 %v1653_v40 }
 0x612   :  { %1841 = vmatpush1.bf16.msra.mxu1 %v1685_v60  ;;  %1801 = vmatprep.subr.bf16.mxu0 %v1656_v43 }
 0x613   :  { %1842 = vmatprep.subr.bf16.mxu1 %v1688_v61 }
 0x615   :  { %1802 = vmatpush1.bf16.msra.mxu0 %v1655_v27 }
 0x616   :  { %1843 = vmatpush1.bf16.msra.mxu1 %v1687_v62  ;;  %1803 = vmatprep.subr.bf16.mxu0 %v1658_v29 }
 0x617   :  { %1844 = vmatprep.subr.bf16.mxu1 %v1690_v18 }
 0x619   :  { %1804 = vmatpush1.bf16.msra.mxu0 %v1657_v21 }
 0x61a   :  { %1845 = vmatpush1.bf16.msra.mxu1 %v1689_v63  ;;  %1805 = vmatprep.subr.bf16.mxu0 %v1660_v7 }
 0x61b   :  { %1846 = vmatprep.subr.bf16.mxu1 %v1692_v13 }
 0x61d   :  { %1806 = vmatpush1.bf16.msra.mxu0 %v1659_v16 }
 0x61e   :  { %1847 = vmatpush1.bf16.msra.mxu1 %v1691_v17  ;;  %1807 = vmatprep.subr.bf16.mxu0 %v1662_v19 }
 0x61f   :  { %1848 = vmatprep.subr.bf16.mxu1 %v1694_v1 }
 0x621   :  { %1808 = vmatpush1.bf16.msra.mxu0 %v1661_v24 }
 0x622   :  { %1849 = vmatpush1.bf16.msra.mxu1 %v1693_v2 }
 0x624   :  { %1810 = vmatmul.mubr.bf16.vlgmr.msra.gmra.mrb[36].mxu0 %v3038_v11 }
 0x625   :  { %1851 = vmatmul.mubr.bf16.vlgmr.msra.gmra.mrb[36].mxu1 %v3046_v20 }
 0x6b7   :  { %v1729_v25 = vpop.f32.mrb[32].mxu0 }
 0x6b8   :  { %v1770_v4 = vpop.f32.mrb[32].mxu1  ;;  %v1731_v26 = vpop.f32.mrb[33].mxu0 }
 0x6b9   :  { %v1771_v5 = vadd.f32 %v1770_v4, %v1729_v25  ;;  %v1772_v3 = vpop.f32.mrb[33].mxu1  ;;  %v1733_v30 = vpop.f32.mrb[34].mxu0 }
 0x6ba   :  { %v1773_v28 = vadd.f32 %v1772_v3, %v1731_v26  ;;  %v1774_v31 = vpop.f32.mrb[34].mxu1  ;;  %v1734_v32 = vpop.f32.mrb[35].mxu0 }
 0x6bb   :  { %v1775_v33 = vpop.f32.mrb[35].mxu1 }
 0x6f7   :  { %v1811_v34 = vpop.f32.mrb[36].mxu0 }
 0x6f8   :  { %v1852_v35 = vpop.f32.mrb[36].mxu1  ;;  %v1812_v36 = vadd.f32 %v1811_v34, %v1771_v5  ;;  %v1813_v37 = vpop.f32.mrb[37].mxu0 }
 0x6f9   :  { %v1854_v38 = vpop.f32.mrb[37].mxu1  ;;  %v1814_v39 = vadd.f32 %v1813_v37, %v1773_v28  ;;  %v1815_v41 = vpop.f32.mrb[38].mxu0 }
 0x6fa   :  { %v1856_v42 = vpop.f32.mrb[38].mxu1  ;;  %v3058_v44 = vadd.f32 %v1852_v35, %v1812_v36  ;;  %v1816_v49 = vpop.f32.mrb[39].mxu0 }
 0x6fb   :  { %v1857_v22 = vpop.f32.mrb[39].mxu1  ;;  %v3060_v23 = vadd.f32 %v1854_v38, %v1814_v39 }
 0x6fc   :  { %2730 = dma.done.wait [#allocation4 + $0x1], 16384 }
 0x6fd   :  { %2731 = vsyncadd [#allocation4 + $0x1], 4294950912  ;;  %2021 = vmatprep.mubr.bf16.mxu0 %v3032_v8  ;;  %2062 = vmatprep.mubr.bf16.mxu1 %v3036_v10  ;;  %v1862_v50 = vld [vmem:[#allocation2 + $0x408] sm:$0xff]  ;;  %v1861_v0 = vld [vmem:[#allocation2 + $0x400] sm:$0xff] }
 0x6fe   :  { %v1894_v51 = vld [vmem:[#allocation2 + $0x508] sm:$0xff]  ;;  %1989 = vmatprep.subr.bf16.mxu0 %v1862_v50  ;;  %v1893_v46 = vld [vmem:[#allocation2 + $0x500] sm:$0xff]  ;;  %v1864_v53 = vld [vmem:[#allocation2 + $0x418] sm:$0xff] }
 0x6ff   :  { %2030 = vmatprep.subr.bf16.mxu1 %v1894_v51  ;;  %v1896_v54 = vld [vmem:[#allocation2 + $0x518] sm:$0xff]  ;;  %1990 = vmatpush1.bf16.msra.mxu0 %v1861_v0  ;;  %v1863_v55 = vld [vmem:[#allocation2 + $0x410] sm:$0xff]  ;;  %v1866_v57 = vld [vmem:[#allocation2 + $0x428] sm:$0xff] }
 0x700   :  { %2031 = vmatpush1.bf16.msra.mxu1 %v1893_v46  ;;  %1991 = vmatprep.subr.bf16.mxu0 %v1864_v53  ;;  %v1895_v56 = vld [vmem:[#allocation2 + $0x510] sm:$0xff]  ;;  %v1898_v58 = vld [vmem:[#allocation2 + $0x528] sm:$0xff]  ;;  %v1865_v8 = vld [vmem:[#allocation2 + $0x420] sm:$0xff] }
 0x701   :  { %2032 = vmatprep.subr.bf16.mxu1 %v1896_v54  ;;  %v1897_v10 = vld [vmem:[#allocation2 + $0x520] sm:$0xff]  ;;  %v1868_v59 = vld [vmem:[#allocation2 + $0x438] sm:$0xff]  ;;  %v1867_v60 = vld [vmem:[#allocation2 + $0x430] sm:$0xff] }
 0x702   :  { %v1900_v40 = vld [vmem:[#allocation2 + $0x538] sm:$0xff]  ;;  %v1899_v43 = vld [vmem:[#allocation2 + $0x530] sm:$0xff]  ;;  %v1870_v61 = vld [vmem:[#allocation2 + $0x448] sm:$0xff] }
 0x703   :  { %1992 = vmatpush1.bf16.msra.mxu0 %v1863_v55  ;;  %v1902_v27 = vld [vmem:[#allocation2 + $0x548] sm:$0xff]  ;;  %v1869_v62 = vld [vmem:[#allocation2 + $0x440] sm:$0xff]  ;;  %v1872_v18 = vld [vmem:[#allocation2 + $0x458] sm:$0xff] }
 0x704   :  { %2033 = vmatpush1.bf16.msra.mxu1 %v1895_v56  ;;  %1993 = vmatprep.subr.bf16.mxu0 %v1866_v57  ;;  %v1901_v29 = vld [vmem:[#allocation2 + $0x540] sm:$0xff]  ;;  %v1904_v21 = vld [vmem:[#allocation2 + $0x558] sm:$0xff]  ;;  %v1871_v63 = vld [vmem:[#allocation2 + $0x450] sm:$0xff] }
 0x705   :  { %2034 = vmatprep.subr.bf16.mxu1 %v1898_v58  ;;  %v1903_v7 = vld [vmem:[#allocation2 + $0x550] sm:$0xff]  ;;  %v1874_v13 = vld [vmem:[#allocation2 + $0x468] sm:$0xff]  ;;  %v1873_v17 = vld [vmem:[#allocation2 + $0x460] sm:$0xff] }
 0x706   :  { %v1906_v16 = vld [vmem:[#allocation2 + $0x568] sm:$0xff]  ;;  %v1905_v19 = vld [vmem:[#allocation2 + $0x560] sm:$0xff]  ;;  %v1876_v1 = vld [vmem:[#allocation2 + $0x478] sm:$0xff] }
 0x707   :  { %1994 = vmatpush1.bf16.msra.mxu0 %v1865_v8  ;;  %v1908_v24 = vld [vmem:[#allocation2 + $0x578] sm:$0xff]  ;;  %v1875_v2 = vld [vmem:[#allocation2 + $0x470] sm:$0xff]  ;;  %v1878_v4 = vld [vmem:[#allocation2 + $0x488] sm:$0xff] }
 0x708   :  { %2035 = vmatpush1.bf16.msra.mxu1 %v1897_v10  ;;  %1995 = vmatprep.subr.bf16.mxu0 %v1868_v59  ;;  %v1907_v25 = vld [vmem:[#allocation2 + $0x570] sm:$0xff]  ;;  %v1910_v5 = vld [vmem:[#allocation2 + $0x588] sm:$0xff]  ;;  %v1877_v26 = vld [vmem:[#allocation2 + $0x480] sm:$0xff] }
 0x709   :  { %2036 = vmatprep.subr.bf16.mxu1 %v1900_v40  ;;  %v1909_v3 = vld [vmem:[#allocation2 + $0x580] sm:$0xff]  ;;  %v1880_v28 = vld [vmem:[#allocation2 + $0x498] sm:$0xff]  ;;  %v1879_v31 = vld [vmem:[#allocation2 + $0x490] sm:$0xff] }
 0x70a   :  { %v1912_v30 = vld [vmem:[#allocation2 + $0x598] sm:$0xff]  ;;  %v1911_v32 = vld [vmem:[#allocation2 + $0x590] sm:$0xff]  ;;  %v1882_v33 = vld [vmem:[#allocation2 + $0x4a8] sm:$0xff] }
 0x70b   :  { %1996 = vmatpush1.bf16.msra.mxu0 %v1867_v60  ;;  %v1914_v34 = vld [vmem:[#allocation2 + $0x5a8] sm:$0xff]  ;;  %v1881_v35 = vld [vmem:[#allocation2 + $0x4a0] sm:$0xff]  ;;  %v1884_v37 = vld [vmem:[#allocation2 + $0x4b8] sm:$0xff] }
 0x70c   :  { %2037 = vmatpush1.bf16.msra.mxu1 %v1899_v43  ;;  %1997 = vmatprep.subr.bf16.mxu0 %v1870_v61  ;;  %v1913_v36 = vld [vmem:[#allocation2 + $0x5a0] sm:$0xff]  ;;  %v1916_v38 = vld [vmem:[#allocation2 + $0x5b8] sm:$0xff]  ;;  %v1883_v39 = vld [vmem:[#allocation2 + $0x4b0] sm:$0xff] }
 0x70d   :  { %2038 = vmatprep.subr.bf16.mxu1 %v1902_v27  ;;  %v1915_v41 = vld [vmem:[#allocation2 + $0x5b0] sm:$0xff]  ;;  %v1886_v42 = vld [vmem:[#allocation2 + $0x4c8] sm:$0xff]  ;;  %v1885_v22 = vld [vmem:[#allocation2 + $0x4c0] sm:$0xff] }
 0x70e   :  { %v1918_v49 = vld [vmem:[#allocation2 + $0x5c8] sm:$0xff]  ;;  %v1917_v50 = vld [vmem:[#allocation2 + $0x5c0] sm:$0xff]  ;;  %v1888_v51 = vld [vmem:[#allocation2 + $0x4d8] sm:$0xff] }
 0x70f   :  { %1998 = vmatpush1.bf16.msra.mxu0 %v1869_v62  ;;  %v1920_v0 = vld [vmem:[#allocation2 + $0x5d8] sm:$0xff]  ;;  %v1887_v46 = vld [vmem:[#allocation2 + $0x4d0] sm:$0xff]  ;;  %v1890_v54 = vld [vmem:[#allocation2 + $0x4e8] sm:$0xff] }
 0x710   :  { %2039 = vmatpush1.bf16.msra.mxu1 %v1901_v29  ;;  %1999 = vmatprep.subr.bf16.mxu0 %v1872_v18  ;;  %v1919_v53 = vld [vmem:[#allocation2 + $0x5d0] sm:$0xff]  ;;  %v1922_v55 = vld [vmem:[#allocation2 + $0x5e8] sm:$0xff]  ;;  %v1889_v56 = vld [vmem:[#allocation2 + $0x4e0] sm:$0xff] }
 0x711   :  { %2040 = vmatprep.subr.bf16.mxu1 %v1904_v21  ;;  %v1921_v57 = vld [vmem:[#allocation2 + $0x5e0] sm:$0xff]  ;;  %v1892_v58 = vld [vmem:[#allocation2 + $0x4f8] sm:$0xff]  ;;  %v1891_v10 = vld [vmem:[#allocation2 + $0x4f0] sm:$0xff] }
 0x712   :  { %v1924_v8 = vld [vmem:[#allocation2 + $0x5f8] sm:$0xff]  ;;  %v1923_v59 = vld [vmem:[#allocation2 + $0x5f0] sm:$0xff]  ;;  %v1926_v40 = vld [vmem:[#allocation2 + $0x608] sm:$0xff] }
 0x713   :  { %2000 = vmatpush1.bf16.msra.mxu0 %v1871_v63  ;;  %v1958_v60 = vld [vmem:[#allocation2 + $0x708] sm:$0xff]  ;;  %v1925_v43 = vld [vmem:[#allocation2 + $0x600] sm:$0xff]  ;;  %v1928_v27 = vld [vmem:[#allocation2 + $0x618] sm:$0xff] }
 0x714   :  { %2041 = vmatpush1.bf16.msra.mxu1 %v1903_v7  ;;  %2001 = vmatprep.subr.bf16.mxu0 %v1874_v13  ;;  %v1957_v61 = vld [vmem:[#allocation2 + $0x700] sm:$0xff]  ;;  %v1960_v62 = vld [vmem:[#allocation2 + $0x718] sm:$0xff]  ;;  %v1927_v29 = vld [vmem:[#allocation2 + $0x610] sm:$0xff] }
 0x715   :  { %2042 = vmatprep.subr.bf16.mxu1 %v1906_v16  ;;  %v1959_v18 = vld [vmem:[#allocation2 + $0x710] sm:$0xff]  ;;  %v1930_v21 = vld [vmem:[#allocation2 + $0x628] sm:$0xff]  ;;  %v1929_v7 = vld [vmem:[#allocation2 + $0x620] sm:$0xff] }
 0x716   :  { %v1962_v63 = vld [vmem:[#allocation2 + $0x728] sm:$0xff]  ;;  %v1932_v13 = vld [vmem:[#allocation2 + $0x638] sm:$0xff]  ;;  %v1931_v16 = vld [vmem:[#allocation2 + $0x630] sm:$0xff] }
 0x717   :  { %2002 = vmatpush1.bf16.msra.mxu0 %v1873_v17  ;;  %v1963_v17 = vld [vmem:[#allocation2 + $0x730] sm:$0xff] }
 0x718   :  { %2043 = vmatpush1.bf16.msra.mxu1 %v1905_v19  ;;  %2003 = vmatprep.subr.bf16.mxu0 %v1876_v1  ;;  %v1934_v19 = vld [vmem:[#allocation2 + $0x648] sm:$0xff] }
 0x719   :  { %2044 = vmatprep.subr.bf16.mxu1 %v1908_v24  ;;  %v1966_v1 = vld [vmem:[#allocation2 + $0x748] sm:$0xff]  ;;  %v1936_v24 = vld [vmem:[#allocation2 + $0x658] sm:$0xff] }
 0x71b   :  { %2004 = vmatpush1.bf16.msra.mxu0 %v1875_v2  ;;  %v1968_v2 = vld [vmem:[#allocation2 + $0x758] sm:$0xff] }
 0x71c   :  { %2045 = vmatpush1.bf16.msra.mxu1 %v1907_v25  ;;  %2005 = vmatprep.subr.bf16.mxu0 %v1878_v4  ;;  %v1935_v25 = vld [vmem:[#allocation2 + $0x650] sm:$0xff] }
 0x71d   :  { %2046 = vmatprep.subr.bf16.mxu1 %v1910_v5  ;;  %v1967_v4 = vld [vmem:[#allocation2 + $0x750] sm:$0xff]  ;;  %v1938_v5 = vld [vmem:[#allocation2 + $0x668] sm:$0xff] }
 0x71f   :  { %2006 = vmatpush1.bf16.msra.mxu0 %v1877_v26  ;;  %v1970_v26 = vld [vmem:[#allocation2 + $0x768] sm:$0xff] }
 0x720   :  { %2047 = vmatpush1.bf16.msra.mxu1 %v1909_v3  ;;  %2007 = vmatprep.subr.bf16.mxu0 %v1880_v28  ;;  %v1937_v3 = vld [vmem:[#allocation2 + $0x660] sm:$0xff] }
 0x721   :  { %2048 = vmatprep.subr.bf16.mxu1 %v1912_v30  ;;  %v1969_v28 = vld [vmem:[#allocation2 + $0x760] sm:$0xff]  ;;  %v1940_v30 = vld [vmem:[#allocation2 + $0x678] sm:$0xff] }
 0x723   :  { %2008 = vmatpush1.bf16.msra.mxu0 %v1879_v31  ;;  %v1972_v31 = vld [vmem:[#allocation2 + $0x778] sm:$0xff] }
 0x724   :  { %2049 = vmatpush1.bf16.msra.mxu1 %v1911_v32  ;;  %2009 = vmatprep.subr.bf16.mxu0 %v1882_v33  ;;  %v1939_v32 = vld [vmem:[#allocation2 + $0x670] sm:$0xff] }
 0x725   :  { %2050 = vmatprep.subr.bf16.mxu1 %v1914_v34  ;;  %v1971_v33 = vld [vmem:[#allocation2 + $0x770] sm:$0xff]  ;;  %v1942_v34 = vld [vmem:[#allocation2 + $0x688] sm:$0xff] }
 0x727   :  { %2010 = vmatpush1.bf16.msra.mxu0 %v1881_v35  ;;  %v1974_v35 = vld [vmem:[#allocation2 + $0x788] sm:$0xff] }
 0x728   :  { %2051 = vmatpush1.bf16.msra.mxu1 %v1913_v36  ;;  %2011 = vmatprep.subr.bf16.mxu0 %v1884_v37  ;;  %v1941_v36 = vld [vmem:[#allocation2 + $0x680] sm:$0xff] }
 0x729   :  { %2052 = vmatprep.subr.bf16.mxu1 %v1916_v38  ;;  %v1973_v37 = vld [vmem:[#allocation2 + $0x780] sm:$0xff]  ;;  %v1944_v38 = vld [vmem:[#allocation2 + $0x698] sm:$0xff] }
 0x72b   :  { %2012 = vmatpush1.bf16.msra.mxu0 %v1883_v39  ;;  %v1976_v39 = vld [vmem:[#allocation2 + $0x798] sm:$0xff] }
 0x72c   :  { %2053 = vmatpush1.bf16.msra.mxu1 %v1915_v41  ;;  %2013 = vmatprep.subr.bf16.mxu0 %v1886_v42  ;;  %v1943_v41 = vld [vmem:[#allocation2 + $0x690] sm:$0xff] }
 0x72d   :  { %2054 = vmatprep.subr.bf16.mxu1 %v1918_v49  ;;  %v1975_v42 = vld [vmem:[#allocation2 + $0x790] sm:$0xff]  ;;  %v1946_v49 = vld [vmem:[#allocation2 + $0x6a8] sm:$0xff] }
 0x72f   :  { %2014 = vmatpush1.bf16.msra.mxu0 %v1885_v22  ;;  %v1978_v22 = vld [vmem:[#allocation2 + $0x7a8] sm:$0xff] }
 0x730   :  { %2055 = vmatpush1.bf16.msra.mxu1 %v1917_v50  ;;  %2015 = vmatprep.subr.bf16.mxu0 %v1888_v51  ;;  %v1945_v50 = vld [vmem:[#allocation2 + $0x6a0] sm:$0xff] }
 0x731   :  { %2056 = vmatprep.subr.bf16.mxu1 %v1920_v0  ;;  %v1977_v51 = vld [vmem:[#allocation2 + $0x7a0] sm:$0xff]  ;;  %v1948_v0 = vld [vmem:[#allocation2 + $0x6b8] sm:$0xff] }
 0x733   :  { %2016 = vmatpush1.bf16.msra.mxu0 %v1887_v46  ;;  %v1980_v46 = vld [vmem:[#allocation2 + $0x7b8] sm:$0xff] }
 0x734   :  { %2057 = vmatpush1.bf16.msra.mxu1 %v1919_v53  ;;  %2017 = vmatprep.subr.bf16.mxu0 %v1890_v54  ;;  %v1947_v53 = vld [vmem:[#allocation2 + $0x6b0] sm:$0xff] }
 0x735   :  { %2058 = vmatprep.subr.bf16.mxu1 %v1922_v55  ;;  %v1979_v54 = vld [vmem:[#allocation2 + $0x7b0] sm:$0xff]  ;;  %v1950_v55 = vld [vmem:[#allocation2 + $0x6c8] sm:$0xff] }
 0x737   :  { %2018 = vmatpush1.bf16.msra.mxu0 %v1889_v56  ;;  %v1982_v56 = vld [vmem:[#allocation2 + $0x7c8] sm:$0xff] }
 0x738   :  { %2059 = vmatpush1.bf16.msra.mxu1 %v1921_v57  ;;  %2019 = vmatprep.subr.bf16.mxu0 %v1892_v58  ;;  %v1949_v57 = vld [vmem:[#allocation2 + $0x6c0] sm:$0xff] }
 0x739   :  { %2060 = vmatprep.subr.bf16.mxu1 %v1924_v8  ;;  %v1981_v58 = vld [vmem:[#allocation2 + $0x7c0] sm:$0xff]  ;;  %v1952_v8 = vld [vmem:[#allocation2 + $0x6d8] sm:$0xff] }
 0x73b   :  { %2020 = vmatpush1.bf16.msra.mxu0 %v1891_v10  ;;  %v1984_v10 = vld [vmem:[#allocation2 + $0x7d8] sm:$0xff] }
 0x73c   :  { %2061 = vmatpush1.bf16.msra.mxu1 %v1923_v59  ;;  %2071 = vmatprep.subr.bf16.mxu0 %v1926_v40  ;;  %v1951_v59 = vld [vmem:[#allocation2 + $0x6d0] sm:$0xff] }
 0x73d   :  { %2112 = vmatprep.subr.bf16.mxu1 %v1958_v60  ;;  %v1983_v40 = vld [vmem:[#allocation2 + $0x7d0] sm:$0xff]  ;;  %v1954_v60 = vld [vmem:[#allocation2 + $0x6e8] sm:$0xff] }
 0x73e   :  { %2022 = vmatmul.mubr.bf16.vlgmr.msra.gmra.mrb[40].mxu0 %v3026_v6  ;;  %v1961_v6 = vld [vmem:[#allocation2 + $0x720] sm:$0xff] }
 0x73f   :  { %2063 = vmatmul.mubr.bf16.vlgmr.msra.gmra.mrb[40].mxu1 %v3034_v9  ;;  %2072 = vmatpush1.bf16.msra.mxu0 %v1925_v43  ;;  %v1964_v9 = vld [vmem:[#allocation2 + $0x738] sm:$0xff]  ;;  %v1986_v43 = vld [vmem:[#allocation2 + $0x7e8] sm:$0xff] }
 0x740   :  { %2113 = vmatpush1.bf16.msra.mxu1 %v1957_v61  ;;  %2073 = vmatprep.subr.bf16.mxu0 %v1928_v27  ;;  %v1953_v61 = vld [vmem:[#allocation2 + $0x6e0] sm:$0xff] }
 0x741   :  { %2114 = vmatprep.subr.bf16.mxu1 %v1960_v62  ;;  %2103 = vmatprep.mubr.bf16.mxu0 %v3040_v12  ;;  %v1933_v12 = vld [vmem:[#allocation2 + $0x640] sm:$0xff]  ;;  %v1956_v62 = vld [vmem:[#allocation2 + $0x6f8] sm:$0xff] }
 0x742   :  { %2144 = vmatprep.mubr.bf16.mxu1 %v3048_v52  ;;  %v1965_v52 = vld [vmem:[#allocation2 + $0x740] sm:$0xff] }
 0x743   :  { %2074 = vmatpush1.bf16.msra.mxu0 %v1927_v29  ;;  %v1985_v27 = vld [vmem:[#allocation2 + $0x7e0] sm:$0xff]  ;;  %v1988_v29 = vld [vmem:[#allocation2 + $0x7f8] sm:$0xff] }
 0x744   :  { %2115 = vmatpush1.bf16.msra.mxu1 %v1959_v18  ;;  %2075 = vmatprep.subr.bf16.mxu0 %v1930_v21  ;;  %v1955_v18 = vld [vmem:[#allocation2 + $0x6f0] sm:$0xff] }
 0x745   :  { %2116 = vmatprep.subr.bf16.mxu1 %v1962_v63  ;;  %v1987_v21 = vld [vmem:[#allocation2 + $0x7f0] sm:$0xff]  ;;  %v2153_v63 = vld [vmem:[#allocation5 + $0x8] sm:$0xf] }
 0x747   :  { %2076 = vmatpush1.bf16.msra.mxu0 %v1929_v7  ;;  %v2158_v7 = vrot.slane %v2153_v63, %v2996_v14 }
 0x748   :  { %2117 = vmatpush1.bf16.msra.mxu1 %v1961_v6  ;;  %2077 = vmatprep.subr.bf16.mxu0 %v1932_v13  ;;  %v2162_v6 = vrot.slane %v2153_v63, %v2999_v47 }
 0x749   :  { %2118 = vmatprep.subr.bf16.mxu1 %v1964_v9  ;;  %v2175_v13 = vadd.f32 %v2158_v7, %v3058_v44 }
 0x74a   :  { %v2176_v9 = vadd.f32 %v2162_v6, %v3060_v23 }
 0x74b   :  { %2078 = vmatpush1.bf16.msra.mxu0 %v1931_v16  ;;  %vm2179_vm8 = vcmp.ge.f32.partialorder %v2175_v13, 0.0  ;;  %v2183_v16 = vmul.f32 0.01, %v2175_v13 }
 0x74c   :  { %2119 = vmatpush1.bf16.msra.mxu1 %v1963_v17  ;;  %2079 = vmatprep.subr.bf16.mxu0 %v1934_v19  ;;  %vm2180_vm9 = vcmp.ge.f32.partialorder %v2176_v9, 0.0  ;;  %v2184_v17 = vmul.f32 0.01, %v2176_v9 }
 0x74d   :  { %2120 = vmatprep.subr.bf16.mxu1 %v1966_v1  ;;  %v3074_v19 = vsel %vm2179_vm8, %v2175_v13, %v2183_v16 }
 0x74e   :  { %v2188_v1 = vsel %vm2180_vm9, %v2176_v9, %v2184_v17 }
 0x74f   :  { %2080 = vmatpush1.bf16.msra.mxu0 %v1933_v12 }
 0x750   :  { %2121 = vmatpush1.bf16.msra.mxu1 %v1965_v52  ;;  %2081 = vmatprep.subr.bf16.mxu0 %v1936_v24 }
 0x751   :  { %2122 = vmatprep.subr.bf16.mxu1 %v1968_v2 }
 0x753   :  { %2082 = vmatpush1.bf16.msra.mxu0 %v1935_v25 }
 0x754   :  { %2123 = vmatpush1.bf16.msra.mxu1 %v1967_v4  ;;  %2083 = vmatprep.subr.bf16.mxu0 %v1938_v5 }
 0x755   :  { %2124 = vmatprep.subr.bf16.mxu1 %v1970_v26 }
 0x757   :  { %2084 = vmatpush1.bf16.msra.mxu0 %v1937_v3 }
 0x758   :  { %2125 = vmatpush1.bf16.msra.mxu1 %v1969_v28  ;;  %2085 = vmatprep.subr.bf16.mxu0 %v1940_v30 }
 0x759   :  { %2126 = vmatprep.subr.bf16.mxu1 %v1972_v31  ;;  %v2166_v31 = vrot.slane %v2153_v63, %v1460_v15 }
 0x75b   :  { %2086 = vmatpush1.bf16.msra.mxu0 %v1939_v32 }
 0x75c   :  { %2127 = vmatpush1.bf16.msra.mxu1 %v1971_v33  ;;  %2087 = vmatprep.subr.bf16.mxu0 %v1942_v34 }
 0x75d   :  { %2128 = vmatprep.subr.bf16.mxu1 %v1974_v35  ;;  %v2170_v35 = vrot.slane %v2153_v63, %v1464_v48 }
 0x75f   :  { %2088 = vmatpush1.bf16.msra.mxu0 %v1941_v36 }
 0x760   :  { %2129 = vmatpush1.bf16.msra.mxu1 %v1973_v37  ;;  %2089 = vmatprep.subr.bf16.mxu0 %v1944_v38 }
 0x761   :  { %2130 = vmatprep.subr.bf16.mxu1 %v1976_v39 }
 0x763   :  { %2090 = vmatpush1.bf16.msra.mxu0 %v1943_v41 }
 0x764   :  { %2131 = vmatpush1.bf16.msra.mxu1 %v1975_v42  ;;  %2091 = vmatprep.subr.bf16.mxu0 %v1946_v49 }
 0x765   :  { %2132 = vmatprep.subr.bf16.mxu1 %v1978_v22 }
 0x767   :  { %2092 = vmatpush1.bf16.msra.mxu0 %v1945_v50 }
 0x768   :  { %2133 = vmatpush1.bf16.msra.mxu1 %v1977_v51  ;;  %2093 = vmatprep.subr.bf16.mxu0 %v1948_v0 }
 0x769   :  { %2134 = vmatprep.subr.bf16.mxu1 %v1980_v46 }
 0x76b   :  { %2094 = vmatpush1.bf16.msra.mxu0 %v1947_v53 }
 0x76c   :  { %2135 = vmatpush1.bf16.msra.mxu1 %v1979_v54  ;;  %2095 = vmatprep.subr.bf16.mxu0 %v1950_v55 }
 0x76d   :  { %2136 = vmatprep.subr.bf16.mxu1 %v1982_v56 }
 0x76f   :  { %2096 = vmatpush1.bf16.msra.mxu0 %v1949_v57 }
 0x770   :  { %2137 = vmatpush1.bf16.msra.mxu1 %v1981_v58  ;;  %2097 = vmatprep.subr.bf16.mxu0 %v1952_v8 }
 0x771   :  { %2138 = vmatprep.subr.bf16.mxu1 %v1984_v10 }
 0x773   :  { %2098 = vmatpush1.bf16.msra.mxu0 %v1951_v59 }
 0x774   :  { %2139 = vmatpush1.bf16.msra.mxu1 %v1983_v40  ;;  %2099 = vmatprep.subr.bf16.mxu0 %v1954_v60 }
 0x775   :  { %2140 = vmatprep.subr.bf16.mxu1 %v1986_v43 }
 0x777   :  { %2100 = vmatpush1.bf16.msra.mxu0 %v1953_v61 }
 0x778   :  { %2141 = vmatpush1.bf16.msra.mxu1 %v1985_v27  ;;  %2101 = vmatprep.subr.bf16.mxu0 %v1956_v62 }
 0x779   :  { %2142 = vmatprep.subr.bf16.mxu1 %v1988_v29 }
 0x77b   :  { %2102 = vmatpush1.bf16.msra.mxu0 %v1955_v18 }
 0x77c   :  { %2143 = vmatpush1.bf16.msra.mxu1 %v1987_v21 }
 0x77e   :  { %2104 = vmatmul.mubr.bf16.vlgmr.msra.gmra.mrb[44].mxu0 %v3038_v11  ;;  %v2191_v11 = vpack.c.bf16 %v3074_v19, %v3074_v19 }
 0x77f   :  { %2145 = vmatmul.mubr.bf16.vlgmr.msra.gmra.mrb[44].mxu1 %v3046_v20  ;;  %v2192_v20 = vpack.c.bf16 %v2188_v1, %v2188_v1 }
 0x811   :  { %v2023_v12 = vpop.f32.mrb[40].mxu0 }
 0x812   :  { %v2064_v52 = vpop.f32.mrb[40].mxu1  ;;  %v2025_v2 = vpop.f32.mrb[41].mxu0 }
 0x813   :  { %v2065_v24 = vadd.f32 %v2064_v52, %v2023_v12  ;;  %v2066_v25 = vpop.f32.mrb[41].mxu1  ;;  %v2027_v44 = vpop.f32.mrb[42].mxu0 }
 0x814   :  { %v2067_v4 = vadd.f32 %v2066_v25, %v2025_v2  ;;  %v2068_v5 = vpop.f32.mrb[42].mxu1  ;;  %v2028_v23 = vpop.f32.mrb[43].mxu0 }
 0x815   :  { %v2069_v26 = vpop.f32.mrb[43].mxu1 }
 0x851   :  { %v2105_v3 = vpop.f32.mrb[44].mxu0 }
 0x852   :  { %v2146_v28 = vpop.f32.mrb[44].mxu1  ;;  %v2106_v30 = vadd.f32 %v2105_v3, %v2065_v24  ;;  %v2107_v32 = vpop.f32.mrb[45].mxu0 }
 0x853   :  { %v2148_v33 = vpop.f32.mrb[45].mxu1  ;;  %v2108_v34 = vadd.f32 %v2107_v32, %v2067_v4  ;;  %v2109_v36 = vpop.f32.mrb[46].mxu0 }
 0x854   :  { %v2150_v37 = vpop.f32.mrb[46].mxu1  ;;  %v2147_v38 = vadd.f32 %v2146_v28, %v2106_v30  ;;  %v2110_v39 = vpop.f32.mrb[47].mxu0 }
 0x855   :  { %v2151_v41 = vpop.f32.mrb[47].mxu1  ;;  %v2149_v42 = vadd.f32 %v2148_v33, %v2108_v34 }
 0x856   :  { %v2177_v49 = vadd.f32 %v2166_v31, %v2147_v38 }
 0x857   :  { %v2178_v22 = vadd.f32 %v2170_v35, %v2149_v42 }
 0x858   :  { %vm2181_vm10 = vcmp.ge.f32.partialorder %v2177_v49, 0.0  ;;  %v2185_v50 = vmul.f32 0.01, %v2177_v49 }
 0x859   :  { %vm2182_vm11 = vcmp.ge.f32.partialorder %v2178_v22, 0.0  ;;  %v2186_v51 = vmul.f32 0.01, %v2178_v22 }
 0x85a   :  { %v3082_v0 = vsel %vm2181_vm10, %v2177_v49, %v2185_v50 }
 0x85b   :  { %v2193_v15 = vpack.c.bf16 %v3082_v0, %v3082_v0  ;;  %v3086_v46 = vsel %vm2182_vm11, %v2178_v22, %v2186_v51 }
 0x85c   :  { %v2194_v45 = vpack.c.bf16 %v3086_v46, %v3086_v46 }
 0x85d   :  { %2732 = dma.done.wait [#allocation4 + $0x2], 15360 }
 0x85e   :  { %2733 = vsyncadd [#allocation4 + $0x2], 4294951936  ;;  %2307 = vmatprep.mubr.bf16.mxu0 %v2192_v20  ;;  %v2200_v48 = vld [vmem:[#allocation3 + $0x8] sm:$0xff]  ;;  %v2199_v53 = vld [vmem:[#allocation3] sm:$0xff]  ;;  %vm2754_vm14 = vmmov 0   ;;  %vm2502_vm1 = vcmask 523264  }
 0x85f   :  { %v2202_v54 = vld [vmem:[#allocation3 + $0x18] sm:$0xff]  ;;  %2275 = vmatprep.subr.bf16.mxu0 %v2200_v48  ;;  %v2201_v55 = vld [vmem:[#allocation3 + $0x10] sm:$0xff]  ;;  %v2204_v56 = vld [vmem:[#allocation3 + $0x28] sm:$0xff] }
 0x860   :  { %2276 = vmatpush1.bf16.msra.mxu0 %v2199_v53  ;;  %v2203_v57 = vld [vmem:[#allocation3 + $0x20] sm:$0xff]  ;;  %v2206_v58 = vld [vmem:[#allocation3 + $0x38] sm:$0xff]  ;;  %v2205_v8 = vld [vmem:[#allocation3 + $0x30] sm:$0xff] }
 0x861   :  { %2277 = vmatprep.subr.bf16.mxu0 %v2202_v54  ;;  %v2208_v10 = vld [vmem:[#allocation3 + $0x48] sm:$0xff]  ;;  %v2207_v59 = vld [vmem:[#allocation3 + $0x40] sm:$0xff]  ;;  %v2210_v40 = vld [vmem:[#allocation3 + $0x58] sm:$0xff] }
 0x862   :  { %v2209_v60 = vld [vmem:[#allocation3 + $0x50] sm:$0xff]  ;;  %v2212_v43 = vld [vmem:[#allocation3 + $0x68] sm:$0xff]  ;;  %v2373_v61 = vld [vmem:[#allocation3 + $0x280] sm:$0xff] }
 0x863   :  { %v2365_v27 = vld [vmem:[#allocation3 + $0x200] sm:$0xff]  ;;  %2601 = vmatprep.subr.bf16.mxu1 %v2373_v61  ;;  %v2374_v62 = vld [vmem:[#allocation3 + $0x290] sm:$0xff]  ;;  %v2214_v18 = vld [vmem:[#allocation3 + $0x78] sm:$0xff] }
 0x864   :  { %2278 = vmatpush1.bf16.msra.mxu0 %v2201_v55  ;;  %v2211_v29 = vld [vmem:[#allocation3 + $0x60] sm:$0xff]  ;;  %2602 = vmatpush3.bf16.msra.mxu1 %v2365_v27  ;;  %v2366_v21 = vld [vmem:[#allocation3 + $0x210] sm:$0xff]  ;;  %v2216_v6 = vld [vmem:[#allocation3 + $0x88] sm:$0xff] }
 0x865   :  { %2279 = vmatprep.subr.bf16.mxu0 %v2204_v56  ;;  %2603 = vmatprep.subr.bf16.mxu1 %v2374_v62  ;;  %v2375_v63 = vld [vmem:[#allocation3 + $0x2a0] sm:$0xff]  ;;  %v2213_v7 = vld [vmem:[#allocation3 + $0x70] sm:$0xff]  ;;  %v2218_v17 = vld [vmem:[#allocation3 + $0x98] sm:$0xff] }
 0x866   :  { %v2367_v13 = vld [vmem:[#allocation3 + $0x220] sm:$0xff]  ;;  %v2376_v9 = vld [vmem:[#allocation3 + $0x2b0] sm:$0xff]  ;;  %v2220_v52 = vld [vmem:[#allocation3 + $0xa8] sm:$0xff] }
 0x867   :  { %v2215_v16 = vld [vmem:[#allocation3 + $0x80] sm:$0xff]  ;;  %v2368_v1 = vld [vmem:[#allocation3 + $0x230] sm:$0xff]  ;;  %v2222_v4 = vld [vmem:[#allocation3 + $0xb8] sm:$0xff] }
 0x868   :  { %2280 = vmatpush1.bf16.msra.mxu0 %v2203_v57  ;;  %2604 = vmatpush3.bf16.msra.mxu1 %v2366_v21  ;;  %v2377_v20 = vld [vmem:[#allocation3 + $0x2c0] sm:$0xff]  ;;  %v2217_v12 = vld [vmem:[#allocation3 + $0x90] sm:$0xff]  ;;  %v2224_v23 = vld [vmem:[#allocation3 + $0xc8] sm:$0xff] }
 0x869   :  { %2281 = vmatprep.subr.bf16.mxu0 %v2206_v58  ;;  %2605 = vmatprep.subr.bf16.mxu1 %v2375_v63  ;;  %v2369_v24 = vld [vmem:[#allocation3 + $0x240] sm:$0xff]  ;;  %v2378_v2 = vld [vmem:[#allocation3 + $0x2d0] sm:$0xff]  ;;  %v2226_v3 = vld [vmem:[#allocation3 + $0xd8] sm:$0xff] }
 0x86a   :  { %v2219_v25 = vld [vmem:[#allocation3 + $0xa0] sm:$0xff]  ;;  %v2370_v44 = vld [vmem:[#allocation3 + $0x250] sm:$0xff]  ;;  %v2228_v30 = vld [vmem:[#allocation3 + $0xe8] sm:$0xff] }
 0x86b   :  { %v2221_v5 = vld [vmem:[#allocation3 + $0xb0] sm:$0xff]  ;;  %v2223_v26 = vld [vmem:[#allocation3 + $0xc0] sm:$0xff]  ;;  %v2230_v32 = vld [vmem:[#allocation3 + $0xf8] sm:$0xff] }
 0x86c   :  { %2282 = vmatpush1.bf16.msra.mxu0 %v2205_v8  ;;  %2606 = vmatpush3.bf16.msra.mxu1 %v2367_v13  ;;  %v2225_v28 = vld [vmem:[#allocation3 + $0xd0] sm:$0xff]  ;;  %v2227_v31 = vld [vmem:[#allocation3 + $0xe0] sm:$0xff]  ;;  %v2232_v34 = vld [vmem:[#allocation3 + $0x108] sm:$0xff] }
 0x86d   :  { %2283 = vmatprep.subr.bf16.mxu0 %v2208_v10  ;;  %2607 = vmatprep.subr.bf16.mxu1 %v2376_v9  ;;  %v2229_v33 = vld [vmem:[#allocation3 + $0xf0] sm:$0xff]  ;;  %v2231_v35 = vld [vmem:[#allocation3 + $0x100] sm:$0xff]  ;;  %v2234_v36 = vld [vmem:[#allocation3 + $0x118] sm:$0xff] }
 0x86e   :  { %v2233_v37 = vld [vmem:[#allocation3 + $0x110] sm:$0xff]  ;;  %v2236_v38 = vld [vmem:[#allocation3 + $0x128] sm:$0xff]  ;;  %v2235_v39 = vld [vmem:[#allocation3 + $0x120] sm:$0xff] }
 0x86f   :  { %v2238_v41 = vld [vmem:[#allocation3 + $0x138] sm:$0xff]  ;;  %v2237_v42 = vld [vmem:[#allocation3 + $0x130] sm:$0xff]  ;;  %v2240_v49 = vld [vmem:[#allocation3 + $0x148] sm:$0xff] }
 0x870   :  { %2284 = vmatpush1.bf16.msra.mxu0 %v2207_v59  ;;  %2608 = vmatpush3.bf16.msra.mxu1 %v2368_v1  ;;  %v2239_v19 = vld [vmem:[#allocation3 + $0x140] sm:$0xff]  ;;  %v2241_v22 = vld [vmem:[#allocation3 + $0x150] sm:$0xff]  ;;  %v2244_v50 = vld [vmem:[#allocation3 + $0x168] sm:$0xff] }
 0x871   :  { %2285 = vmatprep.subr.bf16.mxu0 %v2210_v40  ;;  %2609 = vmatprep.subr.bf16.mxu1 %v2377_v20  ;;  %v2243_v51 = vld [vmem:[#allocation3 + $0x160] sm:$0xff]  ;;  %v2246_v46 = vld [vmem:[#allocation3 + $0x178] sm:$0xff]  ;;  %v2248_v48 = vld [vmem:[#allocation3 + $0x188] sm:$0xff] }
 0x872   :  { %v2247_v53 = vld [vmem:[#allocation3 + $0x180] sm:$0xff]  ;;  %v2250_v54 = vld [vmem:[#allocation3 + $0x198] sm:$0xff]  ;;  %v2249_v55 = vld [vmem:[#allocation3 + $0x190] sm:$0xff] }
 0x873   :  { %v2252_v56 = vld [vmem:[#allocation3 + $0x1a8] sm:$0xff]  ;;  %v2251_v57 = vld [vmem:[#allocation3 + $0x1a0] sm:$0xff]  ;;  %v2254_v58 = vld [vmem:[#allocation3 + $0x1b8] sm:$0xff] }
 0x874   :  { %2286 = vmatpush1.bf16.msra.mxu0 %v2209_v60  ;;  %2610 = vmatpush3.bf16.msra.mxu1 %v2369_v24  ;;  %v2253_v8 = vld [vmem:[#allocation3 + $0x1b0] sm:$0xff]  ;;  %v2256_v10 = vld [vmem:[#allocation3 + $0x1c8] sm:$0xff]  ;;  %v2255_v59 = vld [vmem:[#allocation3 + $0x1c0] sm:$0xff] }
 0x875   :  { %2287 = vmatprep.subr.bf16.mxu0 %v2212_v43  ;;  %2611 = vmatprep.subr.bf16.mxu1 %v2378_v2  ;;  %v2258_v40 = vld [vmem:[#allocation3 + $0x1d8] sm:$0xff]  ;;  %v2257_v60 = vld [vmem:[#allocation3 + $0x1d0] sm:$0xff]  ;;  %v2260_v43 = vld [vmem:[#allocation3 + $0x1e8] sm:$0xff] }
 0x876   :  { %v2259_v61 = vld [vmem:[#allocation3 + $0x1e0] sm:$0xff]  ;;  %v2262_v27 = vld [vmem:[#allocation3 + $0x1f8] sm:$0xff]  ;;  %v2261_v62 = vld [vmem:[#allocation3 + $0x1f0] sm:$0xff] }
 0x877   :  { %v2380_v21 = vld [vmem:[#allocation3 + $0x2f0] sm:$0xff] }
 0x878   :  { %2288 = vmatpush1.bf16.msra.mxu0 %v2211_v29  ;;  %2612 = vmatpush3.bf16.msra.mxu1 %v2370_v44  ;;  %v2379_v29 = vld [vmem:[#allocation3 + $0x2e0] sm:$0xff]  ;;  %v2372_v63 = vld [vmem:[#allocation3 + $0x270] sm:$0xff] }
 0x879   :  { %2289 = vmatprep.subr.bf16.mxu0 %v2214_v18  ;;  %2613 = vmatprep.subr.bf16.mxu1 %v2379_v29  ;;  %v2371_v18 = vld [vmem:[#allocation3 + $0x260] sm:$0xff] }
 0x87a   :  { %v2432_v44 = vld [vmem:[#allocation3 + $0x300] sm:$0xff] }
 0x87c   :  { %2290 = vmatpush1.bf16.msra.mxu0 %v2213_v7  ;;  %2614 = vmatpush3.bf16.msra.mxu1 %v2371_v18  ;;  %v2753_v7 = vmov 0.0  }
 0x87d   :  { %2291 = vmatprep.subr.bf16.mxu0 %v2216_v6  ;;  %2615 = vmatprep.subr.bf16.mxu1 %v2380_v21  ;;  %v2263_v6 = vld [vmem:[#allocation5 + $0xc] sm:$0x3] }
 0x87e   :  { %v2268_v13 = vrot.slane %v2263_v6, %v2996_v14  ;;  %v2272_v9 = vrot.slane %v2263_v6, %v2999_v47  ;;  %v2433_v14 = vld [vmem:[#allocation3 + $0x310] sm:$0xff]  ;;  %v2434_v47 = vld [vmem:[#allocation3 + $0x320] sm:$0xff] }
 0x880   :  { %2292 = vmatpush1.bf16.msra.mxu0 %v2215_v16  ;;  %2616 = vmatpush3.bf16.msra.mxu1 %v2372_v63 }
 0x881   :  { %2293 = vmatprep.subr.bf16.mxu0 %v2218_v17  ;;  %2637 = vmatprep.subr.bf16.mxu1 %v2753_v7 }
 0x884   :  { %2294 = vmatpush1.bf16.msra.mxu0 %v2217_v12 }
 0x885   :  { %2295 = vmatprep.subr.bf16.mxu0 %v2220_v52 }
 0x888   :  { %2296 = vmatpush1.bf16.msra.mxu0 %v2219_v25 }
 0x889   :  { %2297 = vmatprep.subr.bf16.mxu0 %v2222_v4 }
 0x88c   :  { %2298 = vmatpush1.bf16.msra.mxu0 %v2221_v5  ;;  %v2435_v5 = vld [vmem:[#allocation3 + $0x330] sm:$0xff] }
 0x88d   :  { %2299 = vmatprep.subr.bf16.mxu0 %v2224_v23  ;;  %v2436_v23 = vld [vmem:[#allocation3 + $0x340] sm:$0xff] }
 0x890   :  { %2300 = vmatpush1.bf16.msra.mxu0 %v2223_v26  ;;  %v2437_v26 = vld [vmem:[#allocation3 + $0x350] sm:$0xff] }
 0x891   :  { %2301 = vmatprep.subr.bf16.mxu0 %v2226_v3  ;;  %v2438_v3 = vld [vmem:[#allocation3 + $0x360] sm:$0xff] }
 0x894   :  { %2302 = vmatpush1.bf16.msra.mxu0 %v2225_v28  ;;  %v2439_v28 = vld [vmem:[#allocation3 + $0x370] sm:$0xff] }
 0x895   :  { %2303 = vmatprep.subr.bf16.mxu0 %v2228_v30 }
 0x898   :  { %2304 = vmatpush1.bf16.msra.mxu0 %v2227_v31  ;;  %v2594_v31 = vld [vmem:[#allocation5 + $0xe] ss:$0 sm:$0xff] }
 0x899   :  { %2305 = vmatprep.subr.bf16.mxu0 %v2230_v32 }
 0x89c   :  { %2306 = vmatpush1.bf16.msra.mxu0 %v2229_v33 }
 0x89d   :  { %2316 = vmatprep.subr.bf16.mxu0 %v2232_v34 }
 0x89f   :  { %2308 = vmatmul.mubr.bf16.vlgmr.msra.gmra.mrb[48].mxu0 %v2191_v11  ;;  %v2242_v11 = vld [vmem:[#allocation3 + $0x158] sm:$0xff] }
 0x8a0   :  { %2317 = vmatpush1.bf16.msra.mxu0 %v2231_v35  ;;  %2348 = vmatprep.mubr.bf16.mxu0 %v2194_v45  ;;  %v2245_v45 = vld [vmem:[#allocation3 + $0x170] sm:$0xff] }
 0x8a1   :  { %2318 = vmatprep.subr.bf16.mxu0 %v2234_v36 }
 0x8a4   :  { %2319 = vmatpush1.bf16.msra.mxu0 %v2233_v37 }
 0x8a5   :  { %2320 = vmatprep.subr.bf16.mxu0 %v2236_v38 }
 0x8a8   :  { %2321 = vmatpush1.bf16.msra.mxu0 %v2235_v39 }
 0x8a9   :  { %2322 = vmatprep.subr.bf16.mxu0 %v2238_v41  ;;  %v2491_v41 = vld [vmem:[#allocation3 + $0x380] sm:$0xff] }
 0x8ac   :  { %2323 = vmatpush1.bf16.msra.mxu0 %v2237_v42  ;;  %v2492_v42 = vld [vmem:[#allocation3 + $0x390] sm:$0xff] }
 0x8ad   :  { %2324 = vmatprep.subr.bf16.mxu0 %v2240_v49  ;;  %v2493_v49 = vld [vmem:[#allocation3 + $0x3a0] sm:$0xff] }
 0x8b0   :  { %2325 = vmatpush1.bf16.msra.mxu0 %v2239_v19  ;;  %v2494_v19 = vld [vmem:[#allocation3 + $0x3b0] sm:$0xff] }
 0x8b1   :  { %2326 = vmatprep.subr.bf16.mxu0 %v2242_v11  ;;  %v2595_v11 = vld [vmem:[#allocation5 + $0xf] ss:$0 sm:$0xff] }
 0x8b4   :  { %2327 = vmatpush1.bf16.msra.mxu0 %v2241_v22 }
 0x8b5   :  { %2328 = vmatprep.subr.bf16.mxu0 %v2244_v50 }
 0x8b8   :  { %2329 = vmatpush1.bf16.msra.mxu0 %v2243_v51 }
 0x8b9   :  { %2330 = vmatprep.subr.bf16.mxu0 %v2246_v46 }
 0x8bc   :  { %2331 = vmatpush1.bf16.msra.mxu0 %v2245_v45 }
 0x8bd   :  { %2332 = vmatprep.subr.bf16.mxu0 %v2248_v48 }
 0x8c0   :  { %2333 = vmatpush1.bf16.msra.mxu0 %v2247_v53 }
 0x8c1   :  { %2334 = vmatprep.subr.bf16.mxu0 %v2250_v54 }
 0x8c4   :  { %2335 = vmatpush1.bf16.msra.mxu0 %v2249_v55  ;;  %v2596_v55 = vld [vmem:[#allocation5 + $0x10] ss:$0 sm:$0xff] }
 0x8c5   :  { %2336 = vmatprep.subr.bf16.mxu0 %v2252_v56 }
 0x8c8   :  { %2337 = vmatpush1.bf16.msra.mxu0 %v2251_v57 }
 0x8c9   :  { %2338 = vmatprep.subr.bf16.mxu0 %v2254_v58 }
 0x8cc   :  { %2339 = vmatpush1.bf16.msra.mxu0 %v2253_v8 }
 0x8cd   :  { %2340 = vmatprep.subr.bf16.mxu0 %v2256_v10 }
 0x8d0   :  { %2341 = vmatpush1.bf16.msra.mxu0 %v2255_v59 }
 0x8d1   :  { %2342 = vmatprep.subr.bf16.mxu0 %v2258_v40 }
 0x8d4   :  { %2343 = vmatpush1.bf16.msra.mxu0 %v2257_v60 }
 0x8d5   :  { %2344 = vmatprep.subr.bf16.mxu0 %v2260_v43 }
 0x8d8   :  { %2345 = vmatpush1.bf16.msra.mxu0 %v2259_v61 }
 0x8d9   :  { %2346 = vmatprep.subr.bf16.mxu0 %v2262_v27 }
 0x8dc   :  { %2347 = vmatpush1.bf16.msra.mxu0 %v2261_v62 }
 0x8df   :  { %2349 = vmatmul.mubr.bf16.vlgmr.msra.gmra.mrb[48].mxu0 %v2193_v15 }
 0x9b2   :  { %v2350_v16 = vpop.f32.mrb[48].mxu0 }
 0x9b3   :  { %v2669_v17 = vadd.f32 %v2350_v16, %v2268_v13  ;;  %v2352_v0 = vpop.f32.mrb[49].mxu0 }
 0x9b4   :  { %v2670_v15 = vadd.f32 %v2352_v0, %v2272_v9  ;;  %v2354_v1 = vpop.f32.mrb[50].mxu0 }
 0x9b5   :  { %vm2357_vm12 = vcmp.ge.f32.partialorder %v2669_v17, 0.0  ;;  %v2359_v20 = vmul.f32 0.01, %v2669_v17  ;;  %v2355_v12 = vpop.f32.mrb[51].mxu0 }
 0x9b6   :  { %vm2358_vm13 = vcmp.ge.f32.partialorder %v2670_v15, 0.0  ;;  %v2360_v52 = vmul.f32 0.01, %v2670_v15 }
 0x9b7   :  { %v2361_v24 = vsel %vm2357_vm12, %v2669_v17, %v2359_v20 }
 0x9b8   :  { %v2362_v2 = vsel %vm2358_vm13, %v2670_v15, %v2360_v52  ;;  %v2363_v4 = vpack.c.bf16 %v2361_v24, %v2361_v24 }
 0x9b9   :  { %v2364_v25 = vpack.c.bf16 %v2362_v2, %v2362_v2 }
 0x9bb   :  { %2420 = vmatprep.mubr.bf16.mxu1 %v2364_v25 }
 0x9bc   :  { %2421 = vmatmul.mubr.bf16.vlgmr.msra.gmra.mrb[48].mxu1 %v2363_v4 }
 0x9bd   :  { %2638 = vmatpush3.bf16.msra.mxu1 %v2432_v44  ;;  %2653 = vmatprep.mubr.msk.bf16.mxu1 %vm2754_vm14, %v2753_v7 }
 0x9be   :  { %2639 = vmatprep.subr.bf16.mxu1 %v2753_v7 }
 0x9c1   :  { %2640 = vmatpush3.bf16.msra.mxu1 %v2433_v14 }
 0x9c2   :  { %2641 = vmatprep.subr.bf16.mxu1 %v2753_v7 }
 0x9c5   :  { %2642 = vmatpush3.bf16.msra.mxu1 %v2434_v47 }
 0x9c6   :  { %2643 = vmatprep.subr.bf16.mxu1 %v2753_v7 }
 0x9c9   :  { %2644 = vmatpush3.bf16.msra.mxu1 %v2435_v5 }
 0x9ca   :  { %2645 = vmatprep.subr.bf16.mxu1 %v2753_v7 }
 0x9cd   :  { %2646 = vmatpush3.bf16.msra.mxu1 %v2436_v23 }
 0x9ce   :  { %2647 = vmatprep.subr.bf16.mxu1 %v2753_v7 }
 0x9d1   :  { %2648 = vmatpush3.bf16.msra.mxu1 %v2437_v26 }
 0x9d2   :  { %2649 = vmatprep.subr.bf16.mxu1 %v2753_v7 }
 0x9d5   :  { %2650 = vmatpush3.bf16.msra.mxu1 %v2438_v3 }
 0x9d6   :  { %2651 = vmatprep.subr.bf16.mxu1 %v2753_v7 }
 0x9d9   :  { %2652 = vmatpush3.bf16.msra.mxu1 %v2439_v28 }
 0x9da   :  { %2657 = vmatprep.subr.bf16.mxu1 %v2753_v7 }
 0xa8f   :  { %v2617_v30 = vpop.f32.mrb[48].mxu1 }
 0xa90   :  { %v2618_v32 = vpop.f32.mrb[49].mxu1 }
 0xa91   :  { %v2619_v33 = vadd.f32 %v2618_v32, %v2617_v30  ;;  %v2620_v34 = vpop.f32.mrb[50].mxu1 }
 0xa92   :  { %v2621_v35 = vpop.f32.mrb[51].mxu1 }
 0xa93   :  { %v2423_v36 = vadd.f32 %v2619_v33, %v2594_v31 }
 0xa95   :  { %vm2428_vm15 = vcmp.ge.f32.partialorder %v2423_v36, 0.0  ;;  %v2429_v37 = vmul.f32 0.01, %v2423_v36 }
 0xa97   :  { %v2430_v38 = vsel %vm2428_vm15, %v2423_v36, %v2429_v37 }
 0xa98   :  { %v2431_v39 = vpack.c.bf16 %v2430_v38, %v2430_v38 }
 0xa9a   :  { %2654 = vmatmul.mubr.bf16.vlgmr.msra.gmra.mrb[52].mxu1 %v2431_v39 }
 0xa9b   :  { %2658 = vmatpush3.bf16.msra.mxu1 %v2491_v41  ;;  %2665 = vmatprep.mubr.msk.bf16.mxu1 %vm2754_vm14, %v2753_v7 }
 0xa9c   :  { %2659 = vmatprep.subr.bf16.mxu1 %v2753_v7 }
 0xa9f   :  { %2660 = vmatpush3.bf16.msra.mxu1 %v2492_v42 }
 0xaa0   :  { %2661 = vmatprep.subr.bf16.mxu1 %v2753_v7 }
 0xaa3   :  { %2662 = vmatpush3.bf16.msra.mxu1 %v2493_v49 }
 0xaa4   :  { %2663 = vmatprep.subr.bf16.mxu1 %v2753_v7 }
 0xaa7   :  { %2664 = vmatpush3.bf16.msra.mxu1 %v2494_v19 }
 0xb6d   :  { %v2481_v22 = vpop.f32.mrb[52].mxu1 }
 0xb6e   :  { %v2482_v50 = vadd.f32 %v2595_v11, %v2481_v22  ;;  %v2655_v51 = vpop.f32.mrb[53].mxu1 }
 0xb6f   :  { %v2484_v46 = vpop.f32.mrb[54].mxu1 }
 0xb70   :  { %vm2487_vm0 = vcmp.ge.f32.partialorder %v2482_v50, 0.0  ;;  %v2488_v45 = vmul.f32 0.01, %v2482_v50  ;;  %v2656_v48 = vpop.f32.mrb[55].mxu1 }
 0xb72   :  { %v2489_v53 = vsel %vm2487_vm0, %v2482_v50, %v2488_v45 }
 0xb73   :  { %v2490_v54 = vpack.c.bf16 %v2489_v53, %v2489_v53 }
 0xb75   :  { %2666 = vmatmul.mubr.msk.bf16.vlgmr.msra.gmra.mrb[56].mxu1 %vm2502_vm1, %v2490_v54 }
 0xc48   :  { %v2540_v56 = vpop.f32.mrb[56].mxu1 }
 0xc49   :  { %v2541_v57 = vadd.f32 %v2596_v55, %v2540_v56  ;;  %v2667_v58 = vpop.f32.mrb[57].mxu1 }
 0xc4a   :  { %v2543_v8 = vpop.f32.mrb[58].mxu1 }
 0xc4b   :  { %2546 = vst [vmem:[%s3124_s4] sm:$0xff] %v2541_v57  ;;  %v2668_v10 = vpop.f32.mrb[59].mxu1 }
 0xc4c   :  { %2551 = vsyncpa [#allocation6], 1 }
 0xc4d   :  { %2552 = vsyncmov [#allocation4] }
 0xc50   :  { %s2553_s9 = vpop.sfrf %2552 }
 0xc51   :  { %p2598_p8 = scmp.ne.s32.totalorder %s2553_s9, 0 }
 0xc53   :  { %2557 = shalt.err (%p2598_p8)  }
 0xc54   :  { %2559 = vsyncmov [#allocation4 + $0x1] }
 0xc57   :  { %s2560_s10 = vpop.sfrf %2559 }
 0xc58   :  { %p2599_p9 = scmp.ne.s32.totalorder %s2560_s10, 0 }
 0xc5a   :  { %2564 = shalt.err (%p2599_p9)  }
 0xc5b   :  { %2566 = vsyncmov [#allocation4 + $0x2] }
 0xc5e   :  { %s2567_s11 = vpop.sfrf %2566 }
 0xc5f   :  { %p2600_p10 = scmp.ne.s32.totalorder %s2567_s11, 0 }
 0xc61   :  { %2571 = shalt.err (%p2600_p10)  }

</bundles_post_ra>
